<compile_context>
chip_gen: v7x
topology: tpu7x:2x2x1
jax: 0.10.0
libtpu: 0.0.40
codegen_flags: <defaults>
</compile_context>

<pallas_src>
import functools
import math

import jax
import jax.numpy as jnp
from jax import lax
from jax.experimental import pallas as pl
from jax.experimental.pallas import tpu as pltpu

# ---------------- model hyper-parameters (synthetic, deterministic) ----------
DIM_IN = 2
DIM_HIDDEN = (32, 32)          # two hidden Siren layers
DIM_OUT = 3
W0 = 1.0
W0_INITIAL = 30.0
C = 6.0
K_AUG = 8                      # layer-0 contraction dim padded to sublane granule


# ---------------- Pallas kernel ----------------------------------------------
def siren_net_kernel(x_ref, w0_ref, w1_ref, b1_ref, wl_ref, bl_ref, o_ref,
                     *, n_sub, sub):
    """Whole SirenNet MLP forward for one lane-tile of coordinate points.

    x_ref  : (K_AUG, TN)  rows 0..1 = coords, row 2 = ones (bias carrier), rest 0
    w0_ref : (H0, K_AUG)  w0_initial-scaled weights; col 2 carries the scaled bias
    w1_ref : (H1, H0)     w0-scaled
    b1_ref : (H1, 1)      w0-scaled, broadcast along lanes
    wl_ref : (DIM_OUT, H1)
    bl_ref : (DIM_OUT, 1)
    o_ref  : (DIM_OUT, TN)
    """
    # weights are tiny; load once per grid step and reuse across sub-chunks
    w0 = w0_ref[...]
    w1 = w1_ref[...]
    b1 = b1_ref[...]
    wl = wl_ref[...]
    bl = bl_ref[...]

    def body(s, carry):
        j = pl.multiple_of(s * sub, sub)
        xs = x_ref[:, pl.ds(j, sub)]                                # (K_AUG, sub)

        # layer 0 (is_first): scale AND bias folded into w0 (ones-row trick)
        # -> single MXU matmul followed by the EUP/VPU sin.
        h = jnp.sin(jnp.dot(w0, xs, preferred_element_type=jnp.float32))

        # layer 1 (hidden Siren layer, w0 folded on host)
        h = jnp.sin(jnp.dot(w1, h, preferred_element_type=jnp.float32) + b1)

        # last layer: sigmoid(z) == 0.5*(tanh(0.5*z) + 1) -> single EUP tanh
        z = jnp.dot(wl, h, preferred_element_type=jnp.float32) + bl
        o_ref[:, pl.ds(j, sub)] = (
            0.5 * (jnp.tanh(0.5 * z) + 1.0)).astype(o_ref.dtype)
        return carry

    lax.fori_loop(0, n_sub, body, 0, unroll=True)


# ---------------- wrapper -----------------------------------------------------
def siren_net_forward(x, params, *, tn=4096, sub=512):
    """x: (N, DIM_IN) float32. params: list of (W, b) with W:(out,in), b:(out,).

    Returns (N, DIM_OUT) float32 matching the PyTorch SirenNet forward (mods=None).
    """
    N, d_in = x.shape
    assert d_in == DIM_IN
    assert sub % 128 == 0

    # ---- lane-tile sizing (amortize per-step overhead; keep >=2 steps for v7x)
    if N >= 2 * sub:
        tn = min(tn, sub * pl.cdiv(N, 2 * sub))   # >= 2 grid steps when N allows
    else:
        tn = sub                                  # N small: single small tile
    tn = max(sub, (tn // sub) * sub)              # multiple of the sub-chunk size
    n_pad = tn * pl.cdiv(N, tn)
    n_sub = tn // sub

    (w0, b0), (w1, b1), (wl, bl) = params
    h0 = w0.shape[0]
    h1 = w1.shape[0]

    # ---- augmented, feature-major input: rows [x.T ; ones ; zeros] -> (K_AUG, n_pad)
    xT = jnp.asarray(x, jnp.float32).T                              # (DIM_IN, N)
    ones = jnp.ones((1, N), jnp.float32)                            # bias carrier row
    x_aug = jnp.concatenate([xT, ones], axis=0)                     # (DIM_IN+1, N)
    x_aug = jnp.pad(x_aug, ((0, K_AUG - (DIM_IN + 1)), (0, n_pad - N)))

    # ---- fold sine frequency into weights/biases: sin(s*(Wx+b)) == sin((sW)x + sb)
    # Layer 0 additionally folds its (scaled) bias into an extra weight column so
    # the bias add rides the MXU.
    w0_aug = jnp.zeros((h0, K_AUG), jnp.float32)
    w0_aug = w0_aug.at[:, :DIM_IN].set(W0_INITIAL * jnp.asarray(w0, jnp.float32))
    w0_aug = w0_aug.at[:, DIM_IN].set(W0_INITIAL * jnp.asarray(b0, jnp.float32))
    w1_s = (W0 * jnp.asarray(w1, jnp.float32))
    b1_s = (W0 * jnp.asarray(b1, jnp.float32)).reshape(-1, 1)
    wl_f = jnp.asarray(wl, jnp.float32)
    bl_f = jnp.asarray(bl, jnp.float32).reshape(-1, 1)

    vmem_resident = pl.BlockSpec(memory_space=pltpu.MemorySpace.VMEM)

    weight_bytes = 4 * (h0 * K_AUG + h1 * h0 + h1 + DIM_OUT * h1 + DIM_OUT)
    cost = pl.CostEstimate(
        flops=2 * n_pad * (K_AUG * h0 + h0 * h1 + h1 * DIM_OUT),
        transcendentals=n_pad * (h0 + h1 + DIM_OUT),
        bytes_accessed=4 * n_pad * (K_AUG + DIM_OUT) + weight_bytes,
    )

    kernel = functools.partial(siren_net_kernel, n_sub=n_sub, sub=sub)

    out_t = pl.pallas_call(
        kernel,
        out_shape=jax.ShapeDtypeStruct((DIM_OUT, n_pad), jnp.float32),
        grid_spec=pltpu.PrefetchScalarGridSpec(
            num_scalar_prefetch=0,
            grid=(n_pad // tn,),
            in_specs=[pl.BlockSpec((K_AUG, tn), lambda i: (0, i))]
                     + [vmem_resident] * 5,
            out_specs=pl.BlockSpec((DIM_OUT, tn), lambda i: (0, i)),
        ),
        compiler_params=pltpu.CompilerParams(
            dimension_semantics=("parallel",)),
        cost_estimate=cost,
    )(x_aug, w0_aug, w1_s, b1_s, wl_f, bl_f)

    # pad-region columns are garbage and sliced off here (keep this slice if the
    # output is ever aliased / written in place).
    return out_t[:, :N].T                                            # (N, DIM_OUT)


# ---------------- deterministic parameter init (matches Siren.init_) ---------
def init_params(key):
    params = []
    dims_in = (DIM_IN,) + DIM_HIDDEN[:-1]
    # hidden layers (sine activation)
    for ind, (d_in, d_out) in enumerate(zip(dims_in, DIM_HIDDEN)):
        is_first = ind == 0
        layer_w0 = W0_INITIAL if is_first else W0
        w_std = (1.0 / d_in) if is_first else math.sqrt(C / d_in) / layer_w0
        key, kw, kb = jax.random.split(key, 3)
        w = jax.random.uniform(kw, (d_out, d_in), jnp.float32, -w_std, w_std)
        b = jax.random.uniform(kb, (d_out,), jnp.float32, -w_std, w_std)
        params.append((w, b))
    # last layer (sigmoid activation, not first, not relu)
    d_in = DIM_HIDDEN[-1]
    w_std = math.sqrt(C / d_in) / W0
    key, kw, kb = jax.random.split(key, 3)
    w = jax.random.uniform(kw, (DIM_OUT, d_in), jnp.float32, -w_std, w_std)
    b = jax.random.uniform(kb, (DIM_OUT,), jnp.float32, -w_std, w_std)
    params.append((w, b))
    return params


# ---------------- plain-JAX reference (original, unfolded semantics) ---------
def siren_net_reference(x, params):
    (w0, b0), (w1, b1), (wl, bl) = params
    h = jnp.sin(W0_INITIAL * (x @ w0.T + b0))
    h = jnp.sin(W0 * (h @ w1.T + b1))
    return jax.nn.sigmoid(h @ wl.T + bl)


if __name__ == "__main__":
    key = jax.random.PRNGKey(0)
    key, kx = jax.random.split(key)
    N = 32 * 32                                   # 32x32 coordinate grid, dim_in=2
    x = jax.random.uniform(kx, (N, DIM_IN), jnp.float32, -1.0, 1.0)

    params = init_params(key)

    out = siren_net_forward(x, params)
    out = jax.block_until_ready(out)

    ref = siren_net_reference(x, params)
    assert out.shape == (N, DIM_OUT)
    # slightly looser tolerance: frequency/bias folding & tanh-sigmoid reorder f32 ops
    assert jnp.allclose(out, ref, atol=1e-4, rtol=1e-4), float(
        jnp.max(jnp.abs(out - ref)))

    print("KERNEL_OK")
</pallas_src>

<mosaic_0001>
module attributes {stable_mosaic.version = 11 : i64} {
  func.func @siren_net_kernel(%arg0: i32, %arg1: memref<8x512xf32, #tpu.memory_space<vmem>>, %arg2: memref<32x8xf32, #tpu.memory_space<vmem>>, %arg3: memref<32x32xf32, #tpu.memory_space<vmem>>, %arg4: memref<32x1xf32, #tpu.memory_space<vmem>>, %arg5: memref<3x32xf32, #tpu.memory_space<vmem>>, %arg6: memref<3x1xf32, #tpu.memory_space<vmem>>, %arg7: memref<3x512xf32, #tpu.memory_space<vmem>>) attributes {dimension_semantics = [#tpu.dimension_semantics<parallel>], iteration_bounds = array<i64: 2>, scalar_prefetch = 0 : i64, scratch_operands = 0 : i64, tpu.core_type = #tpu.core_type<tc>, window_params = [{transform_indices = @transform_0, window_bounds = array<i64: 8, 512>}, {pipeline_mode = #tpu.pipeline_mode<synchronous>, transform_indices = @transform_1, window_bounds = array<i64: 32, 8>}, {pipeline_mode = #tpu.pipeline_mode<synchronous>, transform_indices = @transform_2, window_bounds = array<i64: 32, 32>}, {pipeline_mode = #tpu.pipeline_mode<synchronous>, transform_indices = @transform_3, window_bounds = array<i64: 32, 1>}, {pipeline_mode = #tpu.pipeline_mode<synchronous>, transform_indices = @transform_4, window_bounds = array<i64: 3, 32>}, {pipeline_mode = #tpu.pipeline_mode<synchronous>, transform_indices = @transform_5, window_bounds = array<i64: 3, 1>}, {transform_indices = @transform_6, window_bounds = array<i64: 3, 512>}]} {
    %c0 = arith.constant 0 : index
    %c0_0 = arith.constant 0 : index
    %0 = vector.load %arg2[%c0, %c0_0] : memref<32x8xf32, #tpu.memory_space<vmem>>, vector<32x8xf32>
    %c0_1 = arith.constant 0 : index
    %c0_2 = arith.constant 0 : index
    %1 = vector.load %arg3[%c0_1, %c0_2] : memref<32x32xf32, #tpu.memory_space<vmem>>, vector<32x32xf32>
    %c0_3 = arith.constant 0 : index
    %c0_4 = arith.constant 0 : index
    %2 = vector.load %arg4[%c0_3, %c0_4] : memref<32x1xf32, #tpu.memory_space<vmem>>, vector<32x1xf32>
    %c0_5 = arith.constant 0 : index
    %c0_6 = arith.constant 0 : index
    %3 = vector.load %arg5[%c0_5, %c0_6] : memref<3x32xf32, #tpu.memory_space<vmem>>, vector<3x32xf32>
    %c0_7 = arith.constant 0 : index
    %c0_8 = arith.constant 0 : index
    %4 = vector.load %arg6[%c0_7, %c0_8] : memref<3x1xf32, #tpu.memory_space<vmem>>, vector<3x1xf32>
    %c0_i32 = arith.constant 0 : i32
    %c512_i32 = arith.constant 512 : i32
    %5 = arith.muli %c0_i32, %c512_i32 : i32
    %6 = tpu.assume_multiple %5, 512 : i32
    %c0_9 = arith.constant 0 : index
    %7 = arith.index_cast %6 : i32 to index
    %8 = vector.load %arg1[%c0_9, %7] : memref<8x512xf32, #tpu.memory_space<vmem>>, vector<8x512xf32>
    %cst = arith.constant dense<0.000000e+00> : vector<32x512xf32>
    %9 = tpu.matmul %0, %8, %cst {dimension_numbers = #tpu.dot_dimension_numbers<[1], [0], [0], [1], [0, 0, 1, 1], [], []>} : vector<32x8xf32>, vector<8x512xf32>, vector<32x512xf32> -> vector<32x512xf32>
    %10 = math.sin %9 : vector<32x512xf32>
    %cst_10 = arith.constant dense<0.000000e+00> : vector<32x512xf32>
    %11 = tpu.matmul %1, %10, %cst_10 {dimension_numbers = #tpu.dot_dimension_numbers<[1], [0], [0], [1], [0, 0, 1, 1], [], []>} : vector<32x32xf32>, vector<32x512xf32>, vector<32x512xf32> -> vector<32x512xf32>
    %12 = vector.broadcast %2 : vector<32x1xf32> to vector<32x512xf32>
    %13 = arith.addf %11, %12 : vector<32x512xf32>
    %14 = math.sin %13 : vector<32x512xf32>
    %cst_11 = arith.constant dense<0.000000e+00> : vector<3x512xf32>
    %15 = tpu.matmul %3, %14, %cst_11 {dimension_numbers = #tpu.dot_dimension_numbers<[1], [0], [0], [1], [0, 0, 1, 1], [], []>} : vector<3x32xf32>, vector<32x512xf32>, vector<3x512xf32> -> vector<3x512xf32>
    %16 = vector.broadcast %4 : vector<3x1xf32> to vector<3x512xf32>
    %17 = arith.addf %15, %16 : vector<3x512xf32>
    %cst_12 = arith.constant 5.000000e-01 : f32
    %18 = vector.broadcast %cst_12 : f32 to vector<3x512xf32>
    %19 = arith.mulf %18, %17 : vector<3x512xf32>
    %20 = math.tanh %19 : vector<3x512xf32>
    %cst_13 = arith.constant 1.000000e+00 : f32
    %21 = vector.broadcast %cst_13 : f32 to vector<3x512xf32>
    %22 = arith.addf %20, %21 : vector<3x512xf32>
    %cst_14 = arith.constant 5.000000e-01 : f32
    %23 = vector.broadcast %cst_14 : f32 to vector<3x512xf32>
    %24 = arith.mulf %23, %22 : vector<3x512xf32>
    %c0_15 = arith.constant 0 : index
    %25 = arith.index_cast %6 : i32 to index
    %26 = vector.load %arg7[%c0_15, %25] : memref<3x512xf32, #tpu.memory_space<vmem>>, vector<3x512xf32>
    tpu.vector_store %arg7[%c0_15, %25], %24 {strides = array<i32>} : memref<3x512xf32, #tpu.memory_space<vmem>>, vector<3x512xf32>,
    %c1_i32 = arith.constant 1 : i32
    return
  }
  func.func @transform_0(%arg0: i32) -> (i32, i32) {
    %c0_i32 = arith.constant 0 : i32
    %c0_i32_0 = arith.constant 0 : i32
    return %c0_i32, %arg0 : i32, i32
  }
  func.func @transform_1(%arg0: i32) -> (i32, i32) {
    %c0_i32 = arith.constant 0 : i32
    %c0_i32_0 = arith.constant 0 : i32
    %c0_i32_1 = arith.constant 0 : i32
    return %c0_i32, %c0_i32_0 : i32, i32
  }
  func.func @transform_2(%arg0: i32) -> (i32, i32) {
    %c0_i32 = arith.constant 0 : i32
    %c0_i32_0 = arith.constant 0 : i32
    %c0_i32_1 = arith.constant 0 : i32
    return %c0_i32, %c0_i32_0 : i32, i32
  }
  func.func @transform_3(%arg0: i32) -> (i32, i32) {
    %c0_i32 = arith.constant 0 : i32
    %c0_i32_0 = arith.constant 0 : i32
    %c0_i32_1 = arith.constant 0 : i32
    return %c0_i32, %c0_i32_0 : i32, i32
  }
  func.func @transform_4(%arg0: i32) -> (i32, i32) {
    %c0_i32 = arith.constant 0 : i32
    %c0_i32_0 = arith.constant 0 : i32
    %c0_i32_1 = arith.constant 0 : i32
    return %c0_i32, %c0_i32_0 : i32, i32
  }
  func.func @transform_5(%arg0: i32) -> (i32, i32) {
    %c0_i32 = arith.constant 0 : i32
    %c0_i32_0 = arith.constant 0 : i32
    %c0_i32_1 = arith.constant 0 : i32
    return %c0_i32, %c0_i32_0 : i32, i32
  }
  func.func @transform_6(%arg0: i32) -> (i32, i32) {
    %c0_i32 = arith.constant 0 : i32
    %c0_i32_0 = arith.constant 0 : i32
    return %c0_i32, %arg0 : i32, i32
  }
}

</mosaic_0001>

<bundles_post_ra>
// kernel: tpu_custom_call.1
= control target key start
LH: loop header
LB: loop body
LE: loop exit
PB: predicated region body
PF: predicated region fallthrough
CT: control target
= control target key end

     0   :  { %11 = vsyncpa [#allocation3], 0  ;;  %s8101_s0 = inlined_call_operand.vmem [shape: f32[8,1024], index: 0, kind: input, shape index: {}]   ;;  %s8102_s1 = inlined_call_operand.vmem [shape: f32[32,8], index: 1, kind: input, shape index: {}]   ;;  %s8103_s2 = inlined_call_operand.hbm [shape: f32[32,32], index: 2, kind: input, shape index: {}]   ;;  %s8104_s3 = inlined_call_operand.vmem [shape: f32[32,1], index: 3, kind: input, shape index: {}]   ;;  %s8105_s4 = inlined_call_operand.vmem [shape: f32[3,32], index: 4, kind: input, shape index: {}]   ;;  %s8106_s5 = inlined_call_operand.vmem [shape: f32[3,1], index: 5, kind: input, shape index: {}]   ;;  %s8107_s6 = inlined_call_operand.hbm [shape: f32[3,1024], index: 6, kind: output, shape index: {}]  }
   0x1   :  { %12 = vsyncpa [#allocation4], 0 }
   0x2   :  { %14 = vsyncpa [#allocation4 + $0x1], 0  ;;  %s4940_s21 = smov 0   ;;  %s4942_s22 = smov 0  }
   0x3   :  { %s4944_s23 = smov 0   ;;  %s4946_s24 = smov 0  }
   0x4 LB: > { %s4961_s25 = sadd.s32 4294967295, %s4891_s24   ;;  %s4278_s26 = sadd.s32 4294967294, %s4891_s24   ;;  %s4891_s24 = sphi %s4946_s24, %s8474_s24   ;;  %s4887_s23 = sphi %s4944_s23, %s8473_s23   ;;  %s4883_s22 = sphi %s4942_s22, %s8472_s22   ;;  %s4879_s21 = sphi %s4940_s21, %s8471_s21  }
   0x5   : > { %s4965_s27 = sadd.s32 1, %s4891_s24   ;;  %s158_s28 = sadd.s32 1, %s4887_s23 }
   0x6   : > { %s155_s29 = ssub.s32 %s4891_s24, %s4965_s27  ;;  %p168_p0 = scmp.ne.s32.totalorder %s4887_s23, %s4883_s22 }
   0x7   : > { %p156_p1 = scmp.eq.s32.totalorder %s155_s29, 0  ;;  %p169_p2 = scmp.eq.s32.totalorder %s4961_s25, 1 }
   0x8   : > { %p174_p3 = scmp.ne.s32.totalorder %s4883_s22, %s4879_s21  ;;  %p175_p4 = scmp.eq.s32.totalorder %s4278_s26, 1 }
   0x9   : > { %s4976_s30 = scalar_select %p156_p1, %s4887_s23, %s158_s28  }
   0xa   : > { %p4978_p5 = por %p169_p2, %p168_p0  ;;  %p4982_p6 = por %p175_p4, %p174_p3 }
   0xb   : > { %p4279_p7 = scmp.ge.s32.totalorder %s4891_s24, 1  ;;  %p182_p8 = scmp.lt.s32.totalorder %s4891_s24, 3 }
   0xc   : > { %s8215_s7 = scalar_select %p4978_p5, 1, 0 }
   0xd   : > { %s8216_s8 = scalar_select %p4982_p6, 1, 0 }
   0xe   : > { %p8108_p9 = scmp.eq.s32.totalorder %s4961_s25, 0  ;;  %p4989_p10 = pnand %p4279_p7, %p182_p8 }
   0xf   : > { %s4893_s10 = smov [#allocation2]   ;;  %s4797_s15 = scalar_lea.hbm %s8103_s2, 512 }
  0x10   : > { %s8217_s9 = scalar_select %p4989_p10, 1, 0 }
  0x11   : > { %s197_s11 = sshll.u32 %s4893_s10, 4  ;;  %p4605_p11 = pneg %p4989_p10  ;;  %s198_s11 = int_to_ptr.vmem [resolvable:$true] %s197_s11 }
  0x12   : > { %p4798_p13 = scmp.ne.s32.totalorder %s8103_s2, %s4797_s15  ;;  %p4804_p3 = scmp.lt.u32.totalorder %s4797_s15, %s8103_s2 }
  0x13   : > { %p4997_p12 = pnand %p8108_p9, %p4605_p11 }
  0x15   : > { %p4799_p0 = pneg %p4997_p12 }
  0x17   : > { %p4800_p1 = pnand %p4799_p0, %p4798_p13 }
  0x19   : > { %p4801_p2 = pneg %p4800_p1 }
  0x1b   : > { %p4806_p4 = pnand %p4804_p3, %p4801_p2 }
  0x1d   : > { %4809 = shalt.err (!%p4806_p4)
}
  0x1e   : > { %s4810_s20 = scalar_lea.vmem %s198_s11, 512  ;;  %p4818_p9 = scmp.lt.s32.totalorder %s198_s11, %s198_s11 }
  0x1f   : > { %p4811_p7 = scmp.ne.s32.totalorder %s198_s11, %s4810_s20  ;;  %p4819_p6 = scmp.lt.s32.totalorder %s4810_s20, %s4810_s20 }
  0x21   : > { %p4813_p8 = pnand %p4811_p7, %p4799_p0  ;;  %p4820_p5 = por %p4819_p6, %p4818_p9 }
  0x23   : > { %p4814_p11 = pneg %p4813_p8 }
  0x25   : > { %p4821_p10 = pnand %p4820_p5, %p4814_p11 }
  0x27   : > { %4824 = shalt.err (!%p4821_p10)
}
  0x28   : > { %s4894_s26 = smov 128   ;;  %s4895_s28 = smov 8  }
  0x29   : > { %4608 = dma.hbm_to_vmem [thread:$0]  (!%p4997_p12), %s8103_s2, 512, %s198_s11, [#allocation3], %s4894_s26, %s4894_s26, %s4895_s28  }
  0x2a   : > { %p8219_p13 = scmp.ne.s32.totalorder %s8217_s9, 0 }
  0x2c   : > { %231 = sbr.rel (%p8219_p13) target bundleno = 1552 (0x610), region = 44 }
  0x33   : > { %p8220_p1 = scmp.eq.s32.totalorder %s4961_s25, 0 }
  0x35   : > { %4870 = dma.done.wait (%p8220_p1), [#allocation3], 512   ;;  %p8221_p0 = pmov %p8220_p1 }
  0x36   : > { %s4285_s13 = sshll.u32 %s4961_s25, 2  ;;  %v8111_v0 = vmov 0.0   ;;  %vm286_vm0 = vcmask 64512   ;;  %v268_v5 = vld [vmem:[%s8102_s1] sm:$0xff]  ;;  %v269_v6 = vld [vmem:[%s8102_s1 + $0x8] sm:$0xff]  ;;  %v270_v7 = vld [vmem:[%s8102_s1 + $0x10] sm:$0xff] }
  0x37   : > { %4872 = vsyncadd (%p8221_p0), [#allocation3], 4294966784  ;;  %p262_p5 = scmp.lt.s32.totalorder %s4285_s13, 7  ;;  %363 = vmatprep.mubr.f32.mxu0 %v8111_v0  ;;  %452 = vmatprep.mubr.f32.mxu1 %v8111_v0  ;;  %v271_v8 = vld [vmem:[%s8102_s1 + $0x18] sm:$0xff]  ;;  %v8126_v42 = vmov 683565275  }
  0x38   : > { %v8124_v46 = vmov 2475754826   ;;  %v8122_v48 = vmov 2131351028   ;;  %v8120_v50 = vmov 2102212464  }
  0x39   : > { %s8476_s13 = smov (!%p262_p5, %s4285_s13), 7  ;;  %v8117_v52 = vmov 920167782   ;;  %v8115_v59 = vmov 1326507024   ;;  %s258_s20 = sand.u32 1, %s4883_s22  }
  0x3a   : > { %s4286_s12 = sshll.u32 %s8476_s13, 3  ;;  %s4284_s26 = sshll.u32 %s258_s20, 4 }
  0x3b   : > { %s265_s9 = scalar_lea.vmem %s8101_s0, %s4286_s12  ;;  %s260_s28 = scalar_lea.vmem [#allocation5], %s4284_s26 }
  0x3c   : > { %v283_v1 = vld [vmem:[%s265_s9 + $0x8] sm:$0xff]  ;;  %v285_v2 = vld [vmem:[%s265_s9 + $0x18] sm:$0xff]  ;;  %v282_v3 = vld [vmem:[%s265_s9] sm:$0xff]  ;;  %s4438_s29 = sshll.u32 %s4961_s25, 8  ;;  %s4207_s10 = sshll.u32 %s260_s28, 4  ;;  %s8061_s10 = int_to_ptr.vmem [resolvable:$true] %s4207_s10 }
  0x3d   : > { %299 = vmatprep.subr.mxu0 %v283_v1  ;;  %388 = vmatprep.subr.mxu1 %v285_v2  ;;  %v284_v4 = vld [vmem:[%s265_s9 + $0x10] sm:$0xff]  ;;  %s8059_s11 = scalar_lea.hbm %s8107_s6, %s4438_s29  ;;  %s4193_s14 = scalar_lea.sflag [#allocation4], %s258_s20 }
  0x3e   : > { %300 = vmatpush1.msra.mxu0 %v282_v3  ;;  %389 = vmatpush1.msra.mxu1 %v284_v4  ;;  %s4825_s9 = scalar_lea.vmem %s8061_s10, 256  ;;  %p8469_p9 = scmp.ne.s32.totalorder %s8215_s7, 0 }
  0x3f   : > { %4287 = vmatmul.mubr.msk.f32.vlgmr.msra.gmra.mrb[0].mxu0 %vm286_vm0, %v268_v5  ;;  %4291 = vmatmul.mubr.msk.f32.vlgmr.msra.gmra.mrb[0].mxu1 %vm286_vm0, %v268_v5  ;;  %p4826_p6 = scmp.ne.s32.totalorder %s8061_s10, %s4825_s9  ;;  %s4904_s25 = smov [#allocation5]  }
  0x40   : > { %369 = vmatprep.mubr.f32.mxu0 %v8111_v0  ;;  %458 = vmatprep.mubr.f32.mxu1 %v8111_v0  ;;  %s4829_s15 = sshll.u32 %s4904_s25, 4  ;;  %s4830_s15 = int_to_ptr.vmem [resolvable:$false] %s4829_s15 }
  0x41   : > { %p4827_p10 = pnand %p4826_p6, %p8469_p9  ;;  %s4831_s16 = scalar_lea.vmem %s4830_s15, 512 }
  0x42   : > { %p4832_p2 = scmp.lt.s32.totalorder %s8061_s10, %s4830_s15  ;;  %p4833_p3 = scmp.lt.s32.totalorder %s4831_s16, %s4825_s9 }
  0x43   : > { %4288 = vmatmul.mubr.msk.f32.gmra.mrb[2].mxu0 %vm286_vm0, %v269_v6  ;;  %4292 = vmatmul.mubr.msk.f32.gmra.mrb[2].mxu1 %vm286_vm0, %v269_v6  ;;  %p4828_p12 = pneg %p4827_p10 }
  0x44   : > { %375 = vmatprep.mubr.f32.mxu0 %v8111_v0  ;;  %464 = vmatprep.mubr.f32.mxu1 %v8111_v0  ;;  %p4834_p4 = por %p4833_p3, %p4832_p2 }
  0x46   : > { %p4835_p7 = pnand %p4834_p4, %p4828_p12 }
  0x47   : > { %4289 = vmatmul.mubr.msk.f32.gmra.mrb[4].mxu0 %vm286_vm0, %v270_v7  ;;  %4293 = vmatmul.mubr.msk.f32.gmra.mrb[4].mxu1 %vm286_vm0, %v270_v7 }
  0x48   : > { %381 = vmatprep.mubr.f32.mxu0 %v8111_v0  ;;  %470 = vmatprep.mubr.f32.mxu1 %v8111_v0 }
  0x4b   : > { %4290 = vmatmul.mubr.msk.f32.gmra.mrb[6].mxu0 %vm286_vm0, %v271_v8  ;;  %4294 = vmatmul.mubr.msk.f32.gmra.mrb[6].mxu1 %vm286_vm0, %v271_v8 }
  0x4c   : > { %2238 = vmatprep.mubr.f32.mxu0 %v8111_v0  ;;  %2327 = vmatprep.mubr.f32.mxu1 %v8111_v0 }
 0x112   : > { %v5057_v9 = vpop.f32.mrb[0].mxu0  ;;  %v5059_v10 = vpop.f32.mrb[0].mxu1 }
 0x113   : > { %8222 = vst [vmem:[#allocation8_spill] sm:$0xff] %v5057_v9  ;;  %8223 = vst [vmem:[#allocation9_spill] sm:$0xff] %v5059_v10  ;;  %v477_v11 = vand.u32 2147483647, %v5057_v9  ;;  %v480_v12 = vand.u32 2139095040, %v5057_v9  ;;  %v5063_v13 = vpop.f32.mrb[1].mxu0 }
 0x114   : > { %8224 = vst [vmem:[#allocation10_spill] sm:$0xff] %v5063_v13  ;;  %v5065_v14 = vpop.f32.mrb[1].mxu1  ;;  %v685_v15 = vand.u32 2147483647, %v5059_v10  ;;  %v688_v16 = vand.u32 2139095040, %v5059_v10  ;;  %v584_v21 = vand.u32 2139095040, %v5063_v13 }
 0x115   : > { %8225 = vst [vmem:[#allocation11_spill] sm:$0xff] %v5065_v14  ;;  %v481_v17 = vshrl.u32 %v480_v12, 23  ;;  %v484_v18 = vand.u32 8388607, %v477_v11 }
 0x116   : > { %v689_v19 = vshrl.u32 %v688_v16, 23  ;;  %v692_v20 = vand.u32 8388607, %v685_v15  ;;  %v585_v24 = vshrl.u32 %v584_v21, 23  ;;  %v5074_v25 = vpop.f32.mrb[2].mxu0  ;;  %v5076_v26 = vpop.f32.mrb[2].mxu1 }
 0x117   : > { %v4295_v22 = vadd.s32 4294967169, %v481_v17  ;;  %8226 = vst [vmem:[#allocation12_spill] sm:$0xff] %v5074_v25  ;;  %v485_v28 = vor.u32 8388608, %v484_v18  ;;  %v5078_v32 = vpop.f32.mrb[3].mxu0  ;;  %v5080_v33 = vpop.f32.mrb[3].mxu1 }
 0x118   : > { %v4303_v23 = vadd.s32 4294967169, %v689_v19  ;;  %v693_v29 = vor.u32 8388608, %v692_v20  ;;  %v4299_v31 = vadd.s32 4294967169, %v585_v24 }
 0x119   : > { %v487_v27 = vadd.s32 1, %v4295_v22  ;;  %v5082_v38 = vshll.u32 %v485_v28, 8 }
 0x11a   : > { %v695_v30 = vadd.s32 1, %v4303_v23  ;;  %v5084_v39 = vshll.u32 %v693_v29, 8  ;;  %v5086_v40 = vadd.s32 1, %v4299_v31  ;;  %v5104_v8 = vpop.f32.mrb[4].mxu0 }
 0x11b   : > { %vm488_vm1 = vcmp.gt.s32.totalorder %v487_v27, 0  ;;  %8227 = vst [vmem:[#allocation13_spill] sm:$0xff] %v5104_v8 }
 0x11c   : > { %v489_v34 = vsel %vm488_vm1, %v487_v27, 0  ;;  %vm696_vm2 = vcmp.gt.s32.totalorder %v695_v30, 0  ;;  %vm592_vm7 = vcmp.gt.s32.totalorder %v5086_v40, 0 }
 0x11d   : > { %v490_v35 = vshrl.u32 %v489_v34, 5  ;;  %v491_v36 = vand.u32 31, %v489_v34  ;;  %v697_v37 = vsel %vm696_vm2, %v695_v30, 0 }
 0x11e   : > { %v5089_v44 = vshrl.u32 %v697_v37, 5  ;;  %v699_v45 = vand.u32 31, %v697_v37 }
 0x11f   : > { %v492_v41 = vsub.s32 32, %v491_v36  ;;  %v494_v43 = vshll.u32 %v8126_v42, %v491_v36  ;;  %v497_v47 = vshll.u32 %v8124_v46, %v491_v36  ;;  %v500_v49 = vshll.u32 %v8122_v48, %v491_v36 }
 0x120   : > { %v503_v51 = vshll.u32 %v8120_v50, %v491_v36  ;;  %v506_v53 = vshll.u32 %v8117_v52, %v491_v36  ;;  %vm509_vm3 = vcmp.lt.s32.totalorder %v490_v35, 1  ;;  %vm510_vm4 = vcmp.lt.s32.totalorder %v490_v35, 2 }
 0x121   : > { %v495_v54 = vshrl.u32 %v8124_v46, %v492_v41  ;;  %v498_v55 = vshrl.u32 %v8122_v48, %v492_v41  ;;  %v501_v56 = vshrl.u32 %v8120_v50, %v492_v41  ;;  %v493_v57 = vshrl.u32 %v8126_v42, %v492_v41 }
 0x122   : > { %v504_v58 = vshrl.u32 %v8117_v52, %v492_v41  ;;  %v507_v60 = vshrl.u32 %v8115_v59, %v492_v41  ;;  %v700_v1 = vsub.s32 32, %v699_v45  ;;  %vm511_vm5 = vcmp.lt.s32.totalorder %v490_v35, 3 }
 0x123   : > { %v496_v61 = vor.u32 %v495_v54, %v494_v43  ;;  %v499_v62 = vor.u32 %v498_v55, %v497_v47  ;;  %v502_v63 = vor.u32 %v501_v56, %v500_v49  ;;  %vm512_vm6 = vcmp.lt.s32.totalorder %v490_v35, 4 }
 0x124   : > { %v505_v2 = vor.u32 %v504_v58, %v503_v51  ;;  %v508_v3 = vor.u32 %v507_v60, %v506_v53  ;;  %v702_v18 = vshll.u32 %v8126_v42, %v699_v45  ;;  %v703_v21 = vshrl.u32 %v8124_v46, %v700_v1 }
 0x125   : > { %v513_v4 = vsel %vm509_vm3, %v493_v57, %v496_v61  ;;  %v514_v5 = vsel %vm512_vm6, %v502_v63, 2102212464  ;;  %v517_v6 = vsel %vm509_vm3, %v496_v61, %v499_v62  ;;  %v521_v7 = vsel %vm509_vm3, %v499_v62, %v502_v63 }
 0x126   : > { %v515_v12 = vsel %vm511_vm5, %v499_v62, %v514_v5  ;;  %v518_v16 = vsel %vm512_vm6, %v505_v2, 920167782  ;;  %v522_v17 = vsel %vm512_vm6, %v508_v3, 1326507024  ;;  %v705_v22 = vshll.u32 %v8124_v46, %v699_v45 }
 0x127   : > { %v519_v19 = vsel %vm511_vm5, %v502_v63, %v518_v16  ;;  %v523_v20 = vsel %vm511_vm5, %v505_v2, %v522_v17  ;;  %v516_v23 = vsel %vm510_vm4, %v513_v4, %v515_v12  ;;  %v706_v28 = vshrl.u32 %v8122_v48, %v700_v1 }
 0x128   : > { %v520_v24 = vsel %vm510_vm4, %v517_v6, %v519_v19  ;;  %v524_v27 = vsel %vm510_vm4, %v521_v7, %v523_v20  ;;  %v704_v36 = vor.u32 %v703_v21, %v702_v18  ;;  %v708_v41 = vshll.u32 %v8122_v48, %v699_v45 }
 0x129   : > { %v5115_v29 = vmul.u32.u64.low %v5082_v38, %v524_v27  ;;  %v5116_v30 = vmul.u32.u64.high %v5082_v38, %v524_v27, %v5115_v29  ;;  %v5119_v31 = vmul.u32.u64.low %v5082_v38, %v520_v24  ;;  %v5120_v34 = vmul.u32.u64.high %v5082_v38, %v520_v24, %v5119_v31 }
 0x12a   : > { %v707_v37 = vor.u32 %v706_v28, %v705_v22  ;;  %v709_v43 = vshrl.u32 %v8120_v50, %v700_v1  ;;  %v701_v35 = vshrl.u32 %v8126_v42, %v700_v1  ;;  %v711_v47 = vshll.u32 %v8120_v50, %v699_v45 }
 0x12b   : > { %v712_v49 = vshrl.u32 %v8117_v52, %v700_v1  ;;  %v715_v51 = vshrl.u32 %v8115_v59, %v700_v1  ;;  %v532_v53 = vmul.u32 %v5082_v38, %v516_v23  ;;  %v714_v55 = vshll.u32 %v8117_v52, %v699_v45 }
 0x12c   : > { %v710_v54 = vor.u32 %v709_v43, %v708_v41  ;;  %vm717_vm8 = vcmp.lt.s32.totalorder %v5089_v44, 1  ;;  %vm534_vm9 = vc.u32 %v5116_v30, %v5119_v31  ;;  %v535_v56 = vadd.s32 1, %v5120_v34 }
 0x12d   : > { %v713_v57 = vor.u32 %v712_v49, %v711_v47  ;;  %vm718_vm10 = vcmp.lt.s32.totalorder %v5089_v44, 2  ;;  %v716_v58 = vor.u32 %v715_v51, %v714_v55  ;;  %vm719_vm11 = vcmp.lt.s32.totalorder %v5089_v44, 3 }
 0x12e   : > { %vm720_vm12 = vcmp.lt.s32.totalorder %v5089_v44, 4  ;;  %v725_v60 = vsel %vm717_vm8, %v704_v36, %v707_v37  ;;  %v536_v38 = vsel %vm534_vm9, %v535_v56, %v5120_v34  ;;  %v729_v62 = vsel %vm717_vm8, %v707_v37, %v710_v54 }
 0x12f   : > { %v722_v61 = vsel %vm720_vm12, %v710_v54, 2102212464  ;;  %v726_v45 = vsel %vm720_vm12, %v713_v57, 920167782  ;;  %v537_v63 = vadd.s32 %v536_v38, %v532_v53  ;;  %v721_v1 = vsel %vm717_vm8, %v701_v35, %v704_v36 }
 0x130   : > { %v727_v2 = vsel %vm719_vm11, %v710_v54, %v726_v45  ;;  %v730_v3 = vsel %vm720_vm12, %v716_v58, 1326507024  ;;  %v723_v4 = vsel %vm719_vm11, %v707_v37, %v722_v61  ;;  %v593_v7 = vsel %vm592_vm7, %v5086_v40, 0  ;;  %v5178_v58 = vpop.f32.mrb[4].mxu1 }
 0x131   : > { %v728_v5 = vsel %vm718_vm10, %v725_v60, %v727_v2  ;;  %v731_v6 = vsel %vm719_vm11, %v713_v57, %v730_v3  ;;  %v538_v12 = vadd.s32 536870912, %v537_v63  ;;  %v581_v21 = vand.u32 2147483647, %v5063_v13  ;;  %8228 = vst [vmem:[#allocation14_spill] sm:$0xff] %v5178_v58 }
 0x132   : > { %v732_v16 = vsel %vm718_vm10, %v729_v62, %v731_v6  ;;  %v5147_v17 = vmul.u32.u64.low %v5084_v39, %v728_v5  ;;  %v5148_v18 = vmul.u32.u64.high %v5084_v39, %v728_v5, %v5147_v17  ;;  %v724_v40 = vsel %vm718_vm10, %v721_v1, %v723_v4 }
 0x133   : > { %v5152_v19 = vmul.u32.u64.low %v5084_v39, %v732_v16  ;;  %v5153_v20 = vmul.u32.u64.high %v5084_v39, %v732_v16, %v5152_v19  ;;  %v5156_v22 = vshrl.u32 %v538_v12, 30  ;;  %v595_v23 = vand.u32 31, %v593_v7 }
 0x134   : > { %v743_v27 = vadd.s32 1, %v5148_v18  ;;  %v740_v29 = vmul.u32 %v5084_v39, %v724_v40  ;;  %v588_v34 = vand.u32 8388607, %v581_v21  ;;  %v792_v41 = vand.u32 2139095040, %v5065_v14 }
 0x135   : > { %v540_v24 = vshll.u32 %v5156_v22, 30  ;;  %v596_v28 = vsub.s32 32, %v595_v23  ;;  %vm742_vm13 = vc.u32 %v5153_v20, %v5147_v17  ;;  %v598_v44 = vshll.u32 %v8126_v42, %v595_v23 }
 0x136   : > { %v744_v37 = vsel %vm742_vm13, %v743_v27, %v5148_v18  ;;  %v601_v47 = vshll.u32 %v8124_v46, %v595_v23  ;;  %v594_v51 = vshrl.u32 %v593_v7, 5  ;;  %v604_v53 = vshll.u32 %v8122_v48, %v595_v23 }
 0x137   : > { %v5167_v36 = vsub.s32 %v537_v63, %v540_v24  ;;  %v745_v43 = vadd.s32 %v744_v37, %v740_v29  ;;  %v599_v35 = vshrl.u32 %v8124_v46, %v596_v28  ;;  %v602_v39 = vshrl.u32 %v8122_v48, %v596_v28 }
 0x138   : > { %v605_v54 = vshrl.u32 %v8120_v50, %v596_v28  ;;  %v607_v61 = vshll.u32 %v8120_v50, %v595_v23  ;;  %v608_v45 = vshrl.u32 %v8117_v52, %v596_v28  ;;  %v589_v63 = vor.u32 8388608, %v588_v34 }
 0x139   : > { %v543_v49 = vsub.s32 0, %v5167_v36  ;;  %v746_v55 = vadd.s32 536870912, %v745_v43  ;;  %v600_v56 = vor.u32 %v599_v35, %v598_v44  ;;  %v603_v57 = vor.u32 %v602_v39, %v601_v47 }
 0x13a   : > { %v606_v38 = vor.u32 %v605_v54, %v604_v53  ;;  %v610_v1 = vshll.u32 %v8117_v52, %v595_v23  ;;  %v611_v2 = vshrl.u32 %v8115_v59, %v596_v28  ;;  %v609_v4 = vor.u32 %v608_v45, %v607_v61 }
 0x13b   : > { %v4296_v60 = vmin.u32 %v543_v49, %v5167_v36  ;;  %v5183_v62 = vshrl.u32 %v746_v55, 30  ;;  %vm613_vm14 = vcmp.lt.s32.totalorder %v594_v51, 1  ;;  %v793_v5 = vshrl.u32 %v792_v41, 23 }
 0x13c   : > { %v612_v7 = vor.u32 %v611_v2, %v610_v1  ;;  %vm615_vm15 = vcmp.lt.s32.totalorder %v594_v51, 3  ;;  %vm616_vm0 = vcmp.lt.s32.totalorder %v594_v51, 4  ;;  %v621_v16 = vsel %vm613_vm14, %v600_v56, %v603_v57 }
 0x13d   : > { %v545_v3 = vclz %v4296_v60  ;;  %v748_v6 = vshll.u32 %v5183_v62, 30  ;;  %v622_v18 = vsel %vm616_vm0, %v609_v4, 920167782  ;;  %v625_v19 = vsel %vm613_vm14, %v603_v57, %v606_v38 }
 0x13e   : > { %v623_v23 = vsel %vm615_vm15, %v606_v38, %v622_v18  ;;  %v626_v24 = vsel %vm616_vm0, %v612_v7, 1326507024  ;;  %vm614_vm1 = vcmp.lt.s32.totalorder %v594_v51, 2  ;;  %v618_v27 = vsel %vm616_vm0, %v606_v38, 2102212464 }
 0x13f   : > { %v4297_v12 = vadd.s32 4294967294, %v545_v3  ;;  %v5190_v40 = vsub.s32 %v745_v43, %v748_v6  ;;  %v627_v29 = vsel %vm615_vm15, %v609_v4, %v626_v24  ;;  %v629_v34 = vshll.u32 %v589_v63, 8 }
 0x140   : > { %v597_v37 = vshrl.u32 %v8126_v42, %v596_v28  ;;  %v624_v44 = vsel %vm614_vm1, %v621_v16, %v623_v23  ;;  %v628_v41 = vsel %vm614_vm1, %v625_v19, %v627_v29  ;;  %v4307_v35 = vadd.s32 4294967169, %v793_v5  ;;  %v5223_v23 = vpop.f32.mrb[5].mxu0 }
 0x141   : > { %vm4298_vm2 = vcmp.lt.s32.totalorder %v4297_v12, 0  ;;  %v751_v47 = vsub.s32 0, %v5190_v40  ;;  %v619_v39 = vsel %vm615_vm15, %v603_v57, %v618_v27  ;;  %v563_v7 = vsub.s32 4, %v5156_v22 }
 0x142   : > { %v617_v43 = vsel %vm613_vm14, %v597_v37, %v600_v56  ;;  %v5200_v49 = vmul.u32.u64.low %v629_v34, %v628_v41  ;;  %v5201_v53 = vmul.u32.u64.high %v629_v34, %v628_v41, %v5200_v49  ;;  %v5207_v28 = vsel %vm4298_vm2, 0, %v4297_v12 }
 0x143   : > { %v5203_v54 = vmul.u32.u64.low %v629_v34, %v624_v44  ;;  %v5204_v55 = vmul.u32.u64.high %v629_v34, %v624_v44, %v5203_v54  ;;  %v799_v60 = vadd.s32 1, %v4307_v35  ;;  %v4304_v38 = vmin.u32 %v751_v47, %v5190_v40 }
 0x144   : > { %v620_v61 = vsel %vm614_vm1, %v617_v43, %v619_v39  ;;  %v8114_v56 = vand.u32 2147483647, %v5065_v14  ;;  %v553_v57 = vsub.s32 4294967266, %v5207_v28  ;;  %vm479_vm5 = vcmp.lt.s32.totalorder %v5057_v9, 0 }
 0x145   : > { %vm638_vm3 = vc.u32 %v5201_v53, %v5203_v54  ;;  %vm800_vm4 = vcmp.gt.s32.totalorder %v799_v60, 0  ;;  %v639_v45 = vadd.s32 1, %v5204_v55  ;;  %v636_v1 = vmul.u32 %v629_v34, %v620_v61 }
 0x146   : > { %v801_v63 = vsel %vm800_vm4, %v799_v60, 0  ;;  %v753_v3 = vclz %v4304_v38  ;;  %v796_v51 = vand.u32 8388607, %v8114_v56  ;;  %v554_v6 = vadd.s32 127, %v553_v57 }
 0x147   : > { %v803_v2 = vand.u32 31, %v801_v63  ;;  %v640_v4 = vsel %vm638_vm3, %v639_v45, %v5204_v55  ;;  %v533_v18 = vadd.s32 %v5119_v31, %v5116_v30  ;;  %v549_v37 = vsub.s32 32, %v5207_v28 }
 0x148   : > { %v641_v5 = vadd.s32 %v640_v4, %v636_v1  ;;  %v4305_v19 = vadd.s32 4294967294, %v753_v3  ;;  %v797_v27 = vor.u32 8388608, %v796_v51  ;;  %v555_v44 = vshll.u32 %v554_v6, 23 }
 0x149   : > { %v804_v12 = vsub.s32 32, %v803_v2  ;;  %v5233_v41 = vsel %vm479_vm5, %v563_v7, %v5156_v22  ;;  %v806_v35 = vshll.u32 %v8126_v42, %v803_v2  ;;  %v809_v47 = vshll.u32 %v8124_v46, %v803_v2 }
 0x14a   : > { %v642_v16 = vadd.s32 536870912, %v641_v5  ;;  %v896_v43 = vand.u32 2139095040, %v5074_v25  ;;  %vm4306_vm6 = vcmp.lt.s32.totalorder %v4305_v19, 0  ;;  %v812_v39 = vshll.u32 %v8122_v48, %v803_v2 }
 0x14b   : > { %v807_v29 = vshrl.u32 %v8124_v46, %v804_v12  ;;  %v810_v34 = vshrl.u32 %v8122_v48, %v804_v12  ;;  %v813_v30 = vshrl.u32 %v8120_v50, %v804_v12  ;;  %v815_v49 = vshll.u32 %v8120_v50, %v803_v2 }
 0x14c   : > { %v5225_v24 = vshrl.u32 %v642_v16, 30  ;;  %v816_v55 = vshrl.u32 %v8117_v52, %v804_v12  ;;  %v802_v22 = vshrl.u32 %v801_v63, 5  ;;  %v818_v1 = vshll.u32 %v8117_v52, %v803_v2 }
 0x14d   : > { %v808_v38 = vor.u32 %v807_v29, %v806_v35  ;;  %v811_v61 = vor.u32 %v810_v34, %v809_v47  ;;  %v814_v57 = vor.u32 %v813_v30, %v812_v39  ;;  %v819_v3 = vshrl.u32 %v8115_v59, %v804_v12 }
 0x14e   : > { %v644_v31 = vshll.u32 %v5225_v24, 30  ;;  %v817_v45 = vor.u32 %v816_v55, %v815_v49  ;;  %v550_v4 = vshll.u32 %v5167_v36, %v5207_v28  ;;  %v551_v51 = vshrl.u32 %v533_v18, %v549_v37 }
 0x14f   : > { %v771_v6 = vsub.s32 4, %v5183_v62  ;;  %v556_v16 = vor.u32 4788187, %v555_v44  ;;  %v897_v63 = vshrl.u32 %v896_v43, 23  ;;  %v756_v29 = vsel %vm4306_vm6, 0, %v4305_v19 }
 0x150   : > { %v5243_v60 = vsub.s32 %v641_v5, %v644_v31  ;;  %v820_v5 = vor.u32 %v819_v3, %v818_v1  ;;  %v837_v31 = vshll.u32 %v797_v27, 8  ;;  %vm821_vm7 = vcmp.lt.s32.totalorder %v802_v22, 1 }
 0x151   : > { %vm824_vm8 = vcmp.lt.s32.totalorder %v802_v22, 4  ;;  %vm823_vm9 = vcmp.lt.s32.totalorder %v802_v22, 3  ;;  %v829_v30 = vsel %vm821_vm7, %v808_v38, %v811_v61  ;;  %v805_v28 = vshrl.u32 %v8126_v42, %v804_v12 }
 0x152   : > { %v647_v7 = vsub.s32 0, %v5243_v60  ;;  %v826_v2 = vsel %vm824_vm8, %v814_v57, 2102212464  ;;  %v830_v35 = vsel %vm824_vm8, %v817_v45, 920167782  ;;  %vm822_vm10 = vcmp.lt.s32.totalorder %v802_v22, 2 }
 0x153   : > { %v831_v18 = vsel %vm823_vm9, %v814_v57, %v830_v35  ;;  %v761_v37 = vsub.s32 4294967266, %v756_v29  ;;  %v833_v27 = vsel %vm821_vm7, %v811_v61, %v814_v57  ;;  %v834_v47 = vsel %vm824_vm8, %v820_v5, 1326507024 }
 0x154   : > { %v4300_v34 = vmin.u32 %v647_v7, %v5243_v60  ;;  %v832_v44 = vsel %vm822_vm10, %v829_v30, %v831_v18  ;;  %v552_v43 = vor.u32 %v551_v51, %v550_v4  ;;  %v825_v19 = vsel %vm821_vm7, %v805_v28, %v808_v38 }
 0x155   : > { %v827_v39 = vsel %vm823_vm9, %v811_v61, %v826_v2  ;;  %v835_v49 = vsel %vm823_vm9, %v817_v45, %v834_v47  ;;  %v557_v55 = vand.u32 2147483647, %v556_v16  ;;  %v4311_v35 = vadd.s32 4294967169, %v897_v63 }
 0x156   : > { %v649_v36 = vclz %v4300_v34  ;;  %v836_v1 = vsel %vm822_vm10, %v833_v27, %v835_v49  ;;  %v5256_v3 = vmul.u32.u64.low %v837_v31, %v832_v44  ;;  %v5257_v7 = vmul.u32.u64.high %v837_v31, %v832_v44, %v5256_v3 }
 0x157   : > { %v5260_v12 = vmul.u32.u64.low %v837_v31, %v836_v1  ;;  %v5261_v0 = vmul.u32.u64.high %v837_v31, %v836_v1, %v5260_v12  ;;  %vm687_vm11 = vcmp.lt.s32.totalorder %v5059_v10, 0  ;;  %v757_v57 = vsub.s32 32, %v756_v29 }
 0x158   : > { %v4301_v34 = vadd.s32 4294967294, %v649_v36  ;;  %v762_v5 = vadd.s32 127, %v761_v37  ;;  %v828_v38 = vsel %vm822_vm10, %v825_v19, %v827_v39  ;;  %vm5267_vm12 = vcmp.le.f32.partialorder %v477_v11, 0.7853982 }
 0x159   : > { %v559_v45 = vcvt.s32.f32 %v552_v43  ;;  %v8113_v4 = vand.u32 2147483647, %v5074_v25  ;;  %v903_v51 = vadd.s32 1, %v4311_v35  ;;  %v566_v16 = vsel %vm5267_vm12, 0, %v5233_v41 }
 0x15a   : > { %v741_v63 = vadd.s32 %v5147_v17, %v5153_v20  ;;  %v5280_v22 = vsel %vm687_vm11, %v771_v6, %v5183_v62  ;;  %v847_v11 = vadd.s32 1, %v5257_v7  ;;  %vm4302_vm13 = vcmp.lt.s32.totalorder %v4301_v34, 0 }
 0x15b   : > { %v560_v2 = vmul.f32 %v559_v45, %v557_v55  ;;  %v844_v30 = vmul.u32 %v837_v31, %v828_v38  ;;  %vm846_vm14 = vc.u32 %v5261_v0, %v5256_v3  ;;  %v763_v28 = vshll.u32 %v762_v5, 23 }
 0x15c   : > { %v759_v36 = vshrl.u32 %v741_v63, %v757_v57  ;;  %v848_v41 = vsel %vm846_vm14, %v847_v11, %v5257_v7  ;;  %vm904_vm15 = vcmp.gt.s32.totalorder %v903_v51, 0  ;;  %vm5288_vm0 = vcmp.le.f32.partialorder %v685_v15, 0.7853982 }
 0x15d   : > { %vm583_vm1 = vcmp.lt.s32.totalorder %v5063_v13, 0  ;;  %v849_v20 = vadd.s32 %v848_v41, %v844_v30  ;;  %v900_v62 = vand.u32 8388607, %v8113_v4  ;;  %v905_v6 = vsel %vm904_vm15, %v903_v51, 0 }
 0x15e   : > { %v5295_v31 = vadd.s32 3, %v566_v16  ;;  %v758_v18 = vshll.u32 %v5190_v40, %v756_v29  ;;  %v5298_v37 = vsel %vm4302_vm13, 0, %v4301_v34  ;;  %v907_v44 = vand.u32 31, %v905_v6  ;;  %v5314_v34 = vpop.f32.mrb[5].mxu1 }
 0x15f   : > { %v561_v27 = vxor.u32 2147483648, %v560_v2  ;;  %v774_v15 = vsel %vm5288_vm0, 0, %v5280_v22  ;;  %v637_v47 = vadd.s32 %v5203_v54, %v5201_v53  ;;  %v850_v43 = vadd.s32 536870912, %v849_v20  ;;  %8233 = vst [vmem:[#allocation15_spill] sm:$0xff] %v5314_v34 }
 0x160   : > { %v5305_v19 = vor.u32 %v759_v36, %v758_v18  ;;  %v5307_v39 = vor.u32 4788187, %v763_v28  ;;  %v667_v49 = vsub.s32 4, %v5225_v24  ;;  %v908_v55 = vsub.s32 32, %v907_v44 }
 0x161   : > { %v657_v40 = vsub.s32 4294967266, %v5298_v37  ;;  %v5311_v29 = vshrl.u32 %v850_v43, 30  ;;  %v901_v1 = vor.u32 8388608, %v900_v62  ;;  %v1104_v7 = vand.u32 2139095040, %v5076_v26 }
 0x162   : > { %v910_v12 = vshll.u32 %v8126_v42, %v907_v44  ;;  %v911_v53 = vshrl.u32 %v8124_v46, %v908_v55  ;;  %v914_v54 = vshrl.u32 %v8122_v48, %v908_v55  ;;  %v917_v35 = vshrl.u32 %v8120_v50, %v908_v55 }
 0x163   : > { %v852_v57 = vshll.u32 %v5311_v29, 30  ;;  %v913_v5 = vshll.u32 %v8124_v46, %v907_v44  ;;  %v916_v38 = vshll.u32 %v8122_v48, %v907_v44  ;;  %v920_v45 = vshrl.u32 %v8117_v52, %v908_v55 }
 0x164   : > { %v906_v51 = vshrl.u32 %v905_v6, 5  ;;  %v919_v16 = vshll.u32 %v8120_v50, %v907_v44  ;;  %v922_v63 = vshll.u32 %v8117_v52, %v907_v44  ;;  %v923_v11 = vshrl.u32 %v8115_v59, %v908_v55 }
 0x165   : > { %v5327_v30 = vsub.s32 %v849_v20, %v852_v57  ;;  %v912_v36 = vor.u32 %v911_v53, %v910_v12  ;;  %v915_v28 = vor.u32 %v914_v54, %v913_v5  ;;  %v918_v41 = vor.u32 %v917_v35, %v916_v38 }
 0x166   : > { %v562_v62 = vsel %vm479_vm5, %v561_v27, %v560_v2  ;;  %v765_v18 = vand.u32 2147483647, %v5307_v39  ;;  %v668_v6 = vsel %vm583_vm1, %v667_v49, %v5225_v24  ;;  %v921_v43 = vor.u32 %v920_v45, %v919_v16 }
 0x167   : > { %v653_v4 = vsub.s32 32, %v5298_v37  ;;  %v855_v44 = vsub.s32 0, %v5327_v30  ;;  %v924_v56 = vor.u32 %v923_v11, %v922_v63  ;;  %v941_v20 = vshll.u32 %v901_v1, 8 }
 0x168   : > { %vm5339_vm2 = vcmp.le.f32.partialorder %v581_v21, 0.7853982  ;;  %v658_v2 = vadd.s32 127, %v657_v40  ;;  %vm925_vm3 = vcmp.lt.s32.totalorder %v906_v51, 1  ;;  %vm928_vm4 = vcmp.lt.s32.totalorder %v906_v51, 4 }
 0x169   : > { %v1105_v27 = vshrl.u32 %v1104_v7, 23  ;;  %v4308_v39 = vmin.u32 %v855_v44, %v5327_v30  ;;  %v909_v24 = vshrl.u32 %v8126_v42, %v908_v55  ;;  %v930_v49 = vsel %vm928_vm4, %v918_v41, 2102212464 }
 0x16a   : > { %v933_v53 = vsel %vm925_vm3, %v912_v36, %v915_v28  ;;  %vm926_vm5 = vcmp.lt.s32.totalorder %v906_v51, 2  ;;  %vm927_vm6 = vcmp.lt.s32.totalorder %v906_v51, 3  ;;  %v934_v54 = vsel %vm928_vm4, %v921_v43, 920167782 }
 0x16b   : > { %v937_v1 = vsel %vm925_vm3, %v915_v28, %v918_v41  ;;  %v929_v35 = vsel %vm925_vm3, %v909_v24, %v912_v36  ;;  %v931_v57 = vsel %vm927_vm6, %v915_v28, %v930_v49  ;;  %v935_v21 = vsel %vm927_vm6, %v918_v41, %v934_v54 }
 0x16c   : > { %v938_v5 = vsel %vm928_vm4, %v924_v56, 1326507024  ;;  %v857_v38 = vclz %v4308_v39  ;;  %v936_v40 = vsel %vm926_vm5, %v933_v53, %v935_v21  ;;  %v4319_v16 = vadd.s32 4294967169, %v1105_v27  ;;  %v5381_v39 = vpop.f32.mrb[6].mxu0 }
 0x16d   : > { %v939_v45 = vsel %vm927_vm6, %v921_v43, %v938_v5  ;;  %v5347_v63 = vmul.u32.u64.low %v941_v20, %v936_v40  ;;  %v5348_v11 = vmul.u32.u64.high %v941_v20, %v936_v40, %v5347_v63  ;;  %v8119_v55 = vand.u32 2147483647, %v5076_v26 }
 0x16e   : > { %v940_v7 = vsel %vm926_vm5, %v937_v1, %v939_v45  ;;  %v655_v44 = vshrl.u32 %v637_v47, %v653_v4  ;;  %v1111_v36 = vadd.s32 1, %v4319_v16  ;;  %v767_v56 = vcvt.s32.f32 %v5305_v19 }
 0x16f   : > { %v5352_v59 = vmul.u32.u64.low %v941_v20, %v940_v7  ;;  %v5353_v52 = vmul.u32.u64.high %v941_v20, %v940_v7, %v5352_v59  ;;  %v778_v28 = vadd.s32 3, %v774_v15  ;;  %v659_v41 = vshll.u32 %v658_v2, 23 }
 0x170   : > { %v932_v43 = vsel %vm926_vm5, %v929_v35, %v931_v57  ;;  %v5364_v27 = vsel %vm5267_vm12, %v5057_v9, %v562_v62  ;;  %v654_v4 = vshll.u32 %v5243_v60, %v5298_v37  ;;  %v4309_v59 = vadd.s32 4294967294, %v857_v38 }
 0x171   : > { %vm1112_vm7 = vcmp.gt.s32.totalorder %v1111_v36, 0  ;;  %v5368_v47 = vmul.f32 %v767_v56, %v765_v18  ;;  %v670_v19 = vsel %vm5339_vm2, 0, %v668_v6  ;;  %v951_v22 = vadd.s32 1, %v5348_v11 }
 0x172   : > { %v1108_v15 = vand.u32 8388607, %v8119_v55  ;;  %v656_v51 = vor.u32 %v655_v44, %v654_v4  ;;  %v948_v2 = vmul.u32 %v941_v20, %v932_v43  ;;  %vm950_vm8 = vc.u32 %v5353_v52, %v5347_v63 }
 0x173   : > { %v1113_v61 = vsel %vm1112_vm7, %v1111_v36, 0  ;;  %v660_v62 = vor.u32 4788187, %v659_v41  ;;  %v952_v60 = vsel %vm950_vm8, %v951_v22, %v5348_v11  ;;  %v5379_v37 = vand.u32 3, %v5295_v31 }
 0x174   : > { %vm4310_vm9 = vcmp.lt.s32.totalorder %v4309_v59, 0  ;;  %v953_v18 = vadd.s32 %v952_v60, %v948_v2  ;;  %v1115_v6 = vand.u32 31, %v1113_v61  ;;  %4661 = vcosq.f32 %v5364_v27 }
 0x175   : > { %8236 = vst [vmem:[#allocation16_spill] sm:$0xff] %v5379_v37  ;;  %v5385_v20 = vand.u32 3, %v778_v28  ;;  %v5387_v49 = vadd.s32 3, %v670_v19  ;;  %v663_v53 = vcvt.s32.f32 %v656_v51  ;;  %v1109_v1 = vor.u32 8388608, %v1108_v15 }
 0x176   : > { %v954_v54 = vadd.s32 536870912, %v953_v18  ;;  %v1116_v35 = vsub.s32 32, %v1115_v6  ;;  %v661_v57 = vand.u32 2147483647, %v660_v62  ;;  %v5389_v31 = vsel %vm4310_vm9, 0, %v4309_v59 }
 0x177   : > { %8237 = vst [vmem:[#allocation17_spill] sm:$0xff] %v5385_v20  ;;  %v1118_v21 = vshll.u32 %v8126_v42, %v1115_v6  ;;  %v1000_v5 = vand.u32 2139095040, %v5078_v32  ;;  %v1121_v45 = vshll.u32 %v8124_v46, %v1115_v6  ;;  %v1124_v7 = vshll.u32 %v8122_v48, %v1115_v6 }
 0x178   : > { %v5393_v38 = vshrl.u32 %v954_v54, 30  ;;  %v1119_v40 = vshrl.u32 %v8124_v46, %v1116_v35  ;;  %v1122_v16 = vshrl.u32 %v8122_v48, %v1116_v35  ;;  %v1125_v11 = vshrl.u32 %v8120_v50, %v1116_v35 }
 0x179   : > { %v1127_v44 = vshll.u32 %v8120_v50, %v1115_v6  ;;  %v8238_v36 = vmov 920167782   ;;  %v1114_v41 = vshrl.u32 %v1113_v61, 5  ;;  %v8239_v15 = vmov 1326507024  }
 0x17a   : > { %v1128_v56 = vshrl.u32 %v8238_v36, %v1116_v35  ;;  %v956_v28 = vshll.u32 %v5393_v38, 30  ;;  %v1120_v43 = vor.u32 %v1119_v40, %v1118_v21  ;;  %v1130_v4 = vshll.u32 %v8238_v36, %v1115_v6 }
 0x17b   : > { %v1123_v59 = vor.u32 %v1122_v16, %v1121_v45  ;;  %v1126_v19 = vor.u32 %v1125_v11, %v1124_v7  ;;  %v1131_v51 = vshrl.u32 %v8239_v15, %v1116_v35  ;;  %v664_v2 = vmul.f32 %v663_v53, %v661_v57 }
 0x17c   : > { %v1129_v22 = vor.u32 %v1128_v56, %v1127_v44  ;;  %vm791_vm10 = vcmp.lt.s32.totalorder %v5065_v14, 0  ;;  %v845_v62 = vadd.s32 %v5256_v3, %v5261_v0  ;;  %v865_v60 = vsub.s32 4294967266, %v5389_v31 }
 0x17d   : > { %v5409_v54 = vsub.s32 %v953_v18, %v956_v28  ;;  %v861_v61 = vsub.s32 32, %v5389_v31  ;;  %v875_v21 = vsub.s32 4, %v5311_v29  ;;  %v1132_v6 = vor.u32 %v1131_v51, %v1130_v4 }
 0x17e   : > { %v1149_v40 = vshll.u32 %v1109_v1, 8  ;;  %vm1133_vm12 = vcmp.lt.s32.totalorder %v1114_v41, 1  ;;  %vm1136_vm13 = vcmp.lt.s32.totalorder %v1114_v41, 4  ;;  %v1001_v53 = vshrl.u32 %v1000_v5, 23  ;;  %v5414_v57 = vpop.eup %4661 }
 0x17f   : > { %v959_v45 = vsub.s32 0, %v5409_v54  ;;  %8240 = vst [vmem:[#allocation18_spill] sm:$0xff] %v5414_v57  ;;  %v8241_v16 = vand.u32 2147483647, %v5065_v14  ;;  %v1117_v3 = vshrl.u32 %v8126_v42, %v1116_v35  ;;  %v1138_v18 = vsel %vm1136_vm13, %v1126_v19, 2102212464 }
 0x180   : > { %v1141_v7 = vsel %vm1133_vm12, %v1120_v43, %v1123_v59  ;;  %v1142_v11 = vsel %vm1136_vm13, %v1129_v22, 920167782  ;;  %v866_v44 = vadd.s32 127, %v865_v60  ;;  %vm1135_vm15 = vcmp.lt.s32.totalorder %v1114_v41, 3 }
 0x181   : > { %vm5418_vm14 = vcmp.le.f32.partialorder %v8241_v16, 0.7853982  ;;  %v4312_v1 = vmin.u32 %v959_v45, %v5409_v54  ;;  %v1145_v56 = vsel %vm1133_vm12, %v1123_v59, %v1126_v19  ;;  %vm1134_vm3 = vcmp.lt.s32.totalorder %v1114_v41, 2 }
 0x182   : > { %v1137_v5 = vsel %vm1133_vm12, %v1117_v3, %v1120_v43  ;;  %v1143_v28 = vsel %vm1135_vm15, %v1126_v19, %v1142_v11  ;;  %v1146_v4 = vsel %vm1136_vm13, %v1132_v6, 1326507024  ;;  %v1139_v55 = vsel %vm1135_vm15, %v1123_v59, %v1138_v18 }
 0x183   : > { %v961_v51 = vclz %v4312_v1  ;;  %v1144_v16 = vsel %vm1134_vm3, %v1141_v7, %v1143_v28  ;;  %v1147_v50 = vsel %vm1135_vm15, %v1129_v22, %v1146_v4  ;;  %v4315_v60 = vadd.s32 4294967169, %v1001_v53 }
 0x184   : > { %v1148_v48 = vsel %vm1134_vm3, %v1145_v56, %v1147_v50  ;;  %v5426_v35 = vmul.u32.u64.low %v1149_v40, %v1144_v16  ;;  %v5427_v46 = vmul.u32.u64.high %v1149_v40, %v1144_v16, %v5426_v35  ;;  %v665_v42 = vxor.u32 2147483648, %v664_v2 }
 0x185   : > { %v863_v45 = vshrl.u32 %v845_v62, %v861_v61  ;;  %v5430_v24 = vmul.u32.u64.low %v1149_v40, %v1148_v48  ;;  %v5431_v20 = vmul.u32.u64.high %v1149_v40, %v1148_v48, %v5430_v24  ;;  %v8244_v43 = vxor.u32 2147483648, %v5368_v47 }
 0x186   : > { %v867_v19 = vshll.u32 %v866_v44, 23  ;;  %v876_v50 = vsel %vm791_vm10, %v875_v21, %v5311_v29  ;;  %v1007_v22 = vadd.s32 1, %v4315_v60  ;;  %v862_v6 = vshll.u32 %v5327_v30, %v5389_v31 }
 0x187   : > { %v770_v59 = vsel %vm687_vm11, %v8244_v43, %v5368_v47  ;;  %v1140_v62 = vsel %vm1134_vm3, %v1137_v5, %v1139_v55  ;;  %v8129_v48 = vand.u32 2147483647, %v5078_v32  ;;  %v1208_v24 = vand.u32 2139095040, %v5080_v33  ;;  %v5478_v5 = vpop.f32.mrb[6].mxu1 }
 0x188   : > { %4663 = vsinq.f32 %v5364_v27  ;;  %v4313_v61 = vadd.s32 4294967294, %v961_v51  ;;  %v1159_v47 = vadd.s32 1, %v5427_v46  ;;  %vm1008_vm11 = vcmp.gt.s32.totalorder %v1007_v22, 0 }
 0x189   : > { %v5451_v29 = vsel %vm5288_vm0, %v5059_v10, %v770_v59  ;;  %v666_v30 = vsel %vm583_vm1, %v665_v42, %v664_v2  ;;  %v864_v31 = vor.u32 %v863_v45, %v862_v6  ;;  %v878_v55 = vsel %vm5418_vm14, 0, %v876_v50 }
 0x18a   : > { %v868_v41 = vor.u32 4788187, %v867_v19  ;;  %v1156_v21 = vmul.u32 %v1149_v40, %v1140_v62  ;;  %vm1158_vm4 = vc.u32 %v5431_v20, %v5426_v35  ;;  %v1009_v27 = vsel %vm1008_vm11, %v1007_v22, 0 }
 0x18b   : > { %v5460_v53 = vand.u32 3, %v5387_v49  ;;  %v1160_v17 = vsel %vm1158_vm4, %v1159_v47, %v5427_v46  ;;  %v1004_v3 = vand.u32 8388607, %v8129_v48  ;;  %v1209_v18 = vshrl.u32 %v1208_v24, 23 }
 0x18c   : > { %4665 = vcosq.f32 %v5451_v29  ;;  %vm4314_vm0 = vcmp.lt.s32.totalorder %v4313_v61, 0  ;;  %v1161_v42 = vadd.s32 %v1160_v17, %v1156_v21  ;;  %v1011_v2 = vand.u32 31, %v1009_v27 }
 0x18d   : > { %v5469_v40 = vsel %vm5339_vm2, %v5063_v13, %v666_v30  ;;  %v5471_v7 = vadd.s32 3, %v878_v55  ;;  %v5475_v49 = vadd.s32 %v5347_v63, %v5353_v52  ;;  %v8130_v46 = vand.u32 2147483647, %v5080_v33 }
 0x18e   : > { %v869_v11 = vand.u32 2147483647, %v868_v41  ;;  %v871_v44 = vcvt.s32.f32 %v864_v31  ;;  %v1162_v1 = vadd.s32 536870912, %v1161_v42  ;;  %v1012_v56 = vsub.s32 32, %v1011_v2 }
 0x18f   : > { %v5480_v28 = vsel %vm4314_vm0, 0, %v4313_v61  ;;  %v1005_v4 = vor.u32 8388608, %v1004_v3  ;;  %v8245_v12 = vmov 683565275   ;;  %v4323_v16 = vadd.s32 4294967169, %v1209_v18 }
 0x190   : > { %v1014_v51 = vshll.u32 %v8245_v12, %v1011_v2  ;;  %v5483_v60 = vshrl.u32 %v1162_v1, 30  ;;  %v8246_v45 = vmov 2475754826   ;;  %v8247_v63 = vmov 2131351028  }
 0x191   : > { %v1015_v43 = vshrl.u32 %v8246_v45, %v1012_v56  ;;  %v1017_v52 = vshll.u32 %v8246_v45, %v1011_v2  ;;  %v1018_v59 = vshrl.u32 %v8247_v63, %v1012_v56  ;;  %v1020_v19 = vshll.u32 %v8247_v63, %v1011_v2 }
 0x192   : > { %v8248_v50 = vmov 2102212464   ;;  %v1024_v62 = vshrl.u32 %v8238_v36, %v1012_v56  ;;  %v5492_v24 = vpop.eup %4663  ;;  %v1164_v61 = vshll.u32 %v5483_v60, 30  ;;  %v1010_v47 = vshrl.u32 %v1009_v27, 5 }
 0x193   : > { %v1021_v22 = vshrl.u32 %v8248_v50, %v1012_v56  ;;  %v1023_v6 = vshll.u32 %v8248_v50, %v1011_v2  ;;  %8249 = vst [vmem:[#allocation19_spill] sm:$0xff] %v5492_v24  ;;  %v1016_v30 = vor.u32 %v1015_v43, %v1014_v51  ;;  %v1026_v31 = vshll.u32 %v8238_v36, %v1011_v2 }
 0x194   : > { %v1019_v55 = vor.u32 %v1018_v59, %v1017_v52  ;;  %v1027_v17 = vshrl.u32 %v8239_v15, %v1012_v56  ;;  %v5497_v3 = vmul.f32 %v871_v44, %v869_v11  ;;  %vm895_vm1 = vcmp.lt.s32.totalorder %v5074_v25, 0 }
 0x195   : > { %v1022_v41 = vor.u32 %v1021_v22, %v1020_v19  ;;  %v1025_v21 = vor.u32 %v1024_v62, %v1023_v6  ;;  %v969_v18 = vsub.s32 4294967266, %v5480_v28  ;;  %v979_v1 = vsub.s32 4, %v5393_v38 }
 0x196   : > { %v5502_v48 = vsub.s32 %v1161_v42, %v1164_v61  ;;  %v965_v27 = vsub.s32 32, %v5480_v28  ;;  %v1028_v51 = vor.u32 %v1027_v17, %v1026_v31  ;;  %v1045_v43 = vshll.u32 %v1005_v4, 8  ;;  %v5507_v52 = vpop.eup %4665 }
 0x197   : > { %v1212_v2 = vand.u32 8388607, %v8130_v46  ;;  %8250 = vst [vmem:[#allocation20_spill] sm:$0xff] %v5507_v52  ;;  %vm1029_vm2 = vcmp.lt.s32.totalorder %v1010_v47, 1  ;;  %vm1032_vm5 = vcmp.lt.s32.totalorder %v1010_v47, 4  ;;  %v1215_v44 = vadd.s32 1, %v4323_v16 }
 0x198   : > { %v1167_v11 = vsub.s32 0, %v5502_v48  ;;  %v8251_v59 = vand.u32 2147483647, %v5074_v25  ;;  %v1013_v42 = vshrl.u32 %v8245_v12, %v1012_v56  ;;  %v1034_v22 = vsel %vm1032_vm5, %v1022_v41, 2102212464 }
 0x199   : > { %v1037_v4 = vsel %vm1029_vm2, %v1016_v30, %v1019_v55  ;;  %v1038_v6 = vsel %vm1032_vm5, %v1025_v21, 920167782  ;;  %v970_v62 = vadd.s32 127, %v969_v18  ;;  %vm1031_vm7 = vcmp.lt.s32.totalorder %v1010_v47, 3 }
 0x19a   : > { %vm5512_vm6 = vcmp.le.f32.partialorder %v8251_v59, 0.7853982  ;;  %v4320_v61 = vmin.u32 %v1167_v11, %v5502_v48  ;;  %v1041_v31 = vsel %vm1029_vm2, %v1019_v55, %v1022_v41  ;;  %vm1030_vm8 = vcmp.lt.s32.totalorder %v1010_v47, 2 }
 0x19b   : > { %v1033_v17 = vsel %vm1029_vm2, %v1013_v42, %v1016_v30  ;;  %v1039_v46 = vsel %vm1031_vm7, %v1022_v41, %v1038_v6  ;;  %v1042_v16 = vsel %vm1032_vm5, %v1028_v51, 1326507024  ;;  %v1035_v10 = vsel %vm1031_vm7, %v1019_v55, %v1034_v22 }
 0x19c   : > { %v1169_v52 = vclz %v4320_v61  ;;  %v1040_v59 = vsel %vm1030_vm8, %v1037_v4, %v1039_v46  ;;  %v1043_v57 = vsel %vm1031_vm7, %v1025_v21, %v1042_v16  ;;  %vm1216_vm9 = vcmp.gt.s32.totalorder %v1215_v44, 0 }
 0x19d   : > { %v1044_v37 = vsel %vm1030_vm8, %v1041_v31, %v1043_v57  ;;  %v5520_v56 = vmul.u32.u64.low %v1045_v43, %v1040_v59  ;;  %v5521_v9 = vmul.u32.u64.high %v1045_v43, %v1040_v59, %v5520_v56  ;;  %v971_v18 = vshll.u32 %v970_v62, 23 }
 0x19e   : > { %v5524_v11 = vmul.u32.u64.low %v1045_v43, %v1044_v37  ;;  %v5525_v24 = vmul.u32.u64.high %v1045_v43, %v1044_v37, %v5524_v11  ;;  %v1217_v13 = vsel %vm1216_vm9, %v1215_v44, 0  ;;  %4667 = vsinq.f32 %v5451_v29 }
 0x19f   : > { %v5531_v30 = vsel %vm895_vm1, %v979_v1, %v5393_v38  ;;  %v1213_v46 = vor.u32 8388608, %v1212_v2  ;;  %v1219_v55 = vand.u32 31, %v1217_v13  ;;  %4669 = vcosq.f32 %v5469_v40 }
 0x1a0   : > { %v5535_v57 = vand.u32 3, %v5471_v7  ;;  %v967_v41 = vshrl.u32 %v5475_v49, %v965_v27  ;;  %v1036_v37 = vsel %vm1030_vm8, %v1033_v17, %v1035_v10  ;;  %4671 = vsinq.f32 %v5469_v40 }
 0x1a1   : > { %v4321_v21 = vadd.s32 4294967294, %v1169_v52  ;;  %v1055_v29 = vadd.s32 1, %v5521_v9  ;;  %v1220_v51 = vsub.s32 32, %v1219_v55  ;;  %v966_v1 = vshll.u32 %v5409_v54, %v5480_v28  ;;  %v5555_v28 = vpop.f32.mrb[7].mxu0 }
 0x1a2   : > { %8254 = vst [vmem:[#allocation21_spill] sm:$0xff] %v5535_v57  ;;  %v972_v2 = vor.u32 4788187, %v971_v18  ;;  %v1052_v44 = vmul.u32 %v1045_v43, %v1036_v37  ;;  %vm1054_vm12 = vc.u32 %v5525_v24, %v5520_v56  ;;  %v5550_v40 = vshll.u32 %v1213_v46, 8 }
 0x1a3   : > { %v1223_v10 = vshrl.u32 %v8246_v45, %v1220_v51  ;;  %v968_v49 = vor.u32 %v967_v41, %v966_v1  ;;  %v1056_v47 = vsel %vm1054_vm12, %v1055_v29, %v5521_v9  ;;  %v1222_v27 = vshll.u32 %v8245_v12, %v1219_v55 }
 0x1a4   : > { %v1226_v54 = vshrl.u32 %v8247_v63, %v1220_v51  ;;  %vm1103_vm13 = vcmp.lt.s32.totalorder %v5076_v26, 0  ;;  %vm4322_vm15 = vcmp.lt.s32.totalorder %v4321_v21, 0  ;;  %v1057_v43 = vadd.s32 %v1056_v47, %v1052_v44 }
 0x1a5   : > { %v1225_v52 = vshll.u32 %v8246_v45, %v1219_v55  ;;  %v1229_v42 = vshrl.u32 %v8248_v50, %v1220_v51  ;;  %v973_v22 = vand.u32 2147483647, %v972_v2  ;;  %v1218_v4 = vshrl.u32 %v1217_v13, 5 }
 0x1a6   : > { %v1224_v6 = vor.u32 %v1223_v10, %v1222_v27  ;;  %v1228_v62 = vshll.u32 %v8247_v63, %v1219_v55  ;;  %v1058_v9 = vadd.s32 536870912, %v1057_v43  ;;  %v1231_v31 = vshll.u32 %v8248_v50, %v1219_v55 }
 0x1a7   : > { %v1227_v61 = vor.u32 %v1226_v54, %v1225_v52  ;;  %v1232_v17 = vshrl.u32 %v8238_v36, %v1220_v51  ;;  %v975_v16 = vcvt.s32.f32 %v968_v49  ;;  %v5563_v59 = vsel %vm4322_vm15, 0, %v4321_v21 }
 0x1a8   : > { %v1234_v18 = vshll.u32 %v8238_v36, %v1219_v55  ;;  %v1235_v11 = vshrl.u32 %v8239_v15, %v1220_v51  ;;  %v5567_v46 = vpop.eup %4667  ;;  %v1187_v13 = vsub.s32 4, %v5483_v60  ;;  %v5570_v41 = vshrl.u32 %v1058_v9, 30 }
 0x1a9   : > { %8255 = vst [vmem:[#allocation22_spill] sm:$0xff] %v5567_v46  ;;  %v1230_v37 = vor.u32 %v1229_v42, %v1228_v62  ;;  %v1233_v29 = vor.u32 %v1232_v17, %v1231_v31  ;;  %v5572_v1 = vpop.eup %4669  ;;  %v976_v2 = vmul.f32 %v975_v16, %v973_v22  ;;  %v8256_v44 = vand.u32 2147483647, %v5076_v26 }
 0x1aa   : > { %v1236_v55 = vor.u32 %v1235_v11, %v1234_v18  ;;  %vm1237_vm11 = vcmp.lt.s32.totalorder %v1218_v4, 1  ;;  %v1312_v10 = vand.u32 2139095040, %v5104_v8  ;;  %v5581_v49 = vpop.eup %4671  ;;  %v1177_v47 = vsub.s32 4294967266, %v5563_v59 }
 0x1ab   : > { %vm5576_vm3 = vcmp.le.f32.partialorder %v8256_v44, 0.7853982  ;;  %v1060_v27 = vshll.u32 %v5570_v41, 30  ;;  %vm1240_vm4 = vcmp.lt.s32.totalorder %v1218_v4, 4  ;;  %v1245_v54 = vsel %vm1237_vm11, %v1224_v6, %v1227_v61 }
 0x1ac   : > { %v1221_v52 = vshrl.u32 %v8245_v12, %v1220_v51  ;;  %vm1238_vm0 = vcmp.lt.s32.totalorder %v1218_v4, 2  ;;  %vm1239_vm2 = vcmp.lt.s32.totalorder %v1218_v4, 3  ;;  %v1246_v42 = vsel %vm1240_vm4, %v1233_v29, 920167782 }
 0x1ad   : > { %v5587_v22 = vsub.s32 %v1057_v43, %v1060_v27  ;;  %v1242_v62 = vsel %vm1240_vm4, %v1230_v37, 2102212464  ;;  %v1247_v9 = vsel %vm1239_vm2, %v1230_v37, %v1246_v42  ;;  %v1249_v31 = vsel %vm1237_vm11, %v1227_v61, %v1230_v37 }
 0x1ae   : > { %v1173_v17 = vsub.s32 32, %v5563_v59  ;;  %v1188_v16 = vsel %vm1103_vm13, %v1187_v13, %v5483_v60  ;;  %v1248_v18 = vsel %vm1238_vm0, %v1245_v54, %v1247_v9  ;;  %v1250_v11 = vsel %vm1240_vm4, %v1236_v55, 1326507024 }
 0x1af   : > { %v1178_v44 = vadd.s32 127, %v1177_v47  ;;  %v1063_v51 = vsub.s32 0, %v5587_v22  ;;  %v1241_v7 = vsel %vm1237_vm11, %v1221_v52, %v1224_v6  ;;  %v1251_v43 = vsel %vm1239_vm2, %v1233_v29, %v1250_v11 }
 0x1b0   : > { %v1243_v27 = vsel %vm1239_vm2, %v1227_v61, %v1242_v62  ;;  %v1252_v42 = vsel %vm1238_vm0, %v1249_v31, %v1251_v43  ;;  %v5599_v37 = vmul.u32.u64.low %v5550_v40, %v1248_v18  ;;  %v5600_v38 = vmul.u32.u64.high %v5550_v40, %v1248_v18, %v5599_v37 }
 0x1b1   : > { %v8259_v60 = vxor.u32 2147483648, %v5497_v3  ;;  %v8260_v55 = vsel %vm5512_vm6, 0, %v5531_v30  ;;  %v4316_v61 = vmin.u32 %v1063_v51, %v5587_v22  ;;  %v1313_v29 = vshrl.u32 %v1312_v10, 23 }
 0x1b2   : > { %v986_v6 = vadd.s32 3, %v8260_v55  ;;  %v977_v47 = vxor.u32 2147483648, %v976_v2  ;;  %v1157_v54 = vadd.s32 %v5426_v35, %v5431_v20  ;;  %v1190_v9 = vsel %vm5576_vm3, 0, %v1188_v16 }
 0x1b3   : > { %v874_v13 = vsel %vm791_vm10, %v8259_v60, %v5497_v3  ;;  %v5616_v52 = vmul.u32.u64.low %v5550_v40, %v1252_v42  ;;  %v5617_v62 = vmul.u32.u64.high %v5550_v40, %v1252_v42, %v5616_v52  ;;  %v1065_v3 = vclz %v4316_v61 }
 0x1b4   : > { %v1244_v31 = vsel %vm1238_vm0, %v1241_v7, %v1243_v27  ;;  %v4327_v18 = vadd.s32 4294967169, %v1313_v29  ;;  %v877_v30 = vsel %vm5418_vm14, %v5065_v14, %v874_v13  ;;  %v1175_v10 = vshrl.u32 %v1157_v54, %v1173_v17  ;;  %v5652_v54 = vpop.f32.mrb[7].mxu1 }
 0x1b5   : > { %v1179_v11 = vshll.u32 %v1178_v44, 23  ;;  %v1263_v51 = vadd.s32 1, %v5600_v38  ;;  %v4317_v20 = vadd.s32 4294967294, %v1065_v3  ;;  %v8141_v35 = vand.u32 2147483647, %v5104_v8 }
 0x1b6   : > { %v1319_v43 = vadd.s32 1, %v4327_v18  ;;  %v1520_v42 = vand.u32 2139095040, %v5178_v58  ;;  %v1174_v16 = vshll.u32 %v5502_v48, %v5563_v59  ;;  %v1194_v4 = vadd.s32 3, %v1190_v9 }
 0x1b7   : > { %v1260_v7 = vmul.u32 %v5550_v40, %v1244_v31  ;;  %vm1262_vm10 = vc.u32 %v5617_v62, %v5599_v37  ;;  %v978_v0 = vsel %vm895_vm1, %v977_v47, %v976_v2  ;;  %vm4318_vm14 = vcmp.lt.s32.totalorder %v4317_v20, 0 }
 0x1b8   : > { %v1264_v17 = vsel %vm1262_vm10, %v1263_v51, %v5600_v38  ;;  %vm1320_vm5 = vcmp.gt.s32.totalorder %v1319_v43, 0  ;;  %v1176_v44 = vor.u32 %v1175_v10, %v1174_v16  ;;  %v1180_v27 = vor.u32 4788187, %v1179_v11 }
 0x1b9   : > { %v1265_v60 = vadd.s32 %v1264_v17, %v1260_v7  ;;  %v1321_v13 = vsel %vm1320_vm5, %v1319_v43, 0  ;;  %4673 = vcosq.f32 %v877_v30  ;;  %v5636_v55 = vand.u32 3, %v986_v6 }
 0x1ba   : > { %v1316_v48 = vand.u32 8388607, %v8141_v35  ;;  %v1521_v40 = vshrl.u32 %v1520_v42, 23  ;;  %4675 = vsinq.f32 %v877_v30  ;;  %v5640_v59 = vsel %vm4318_vm14, 0, %v4317_v20 }
 0x1bb   : > { %8261 = vst [vmem:[#allocation23_spill] sm:$0xff] %v5636_v55  ;;  %v1266_v61 = vadd.s32 536870912, %v1265_v60  ;;  %v1323_v2 = vand.u32 31, %v1321_v13  ;;  %v5645_v38 = vsel %vm5512_vm6, %v5074_v25, %v978_v0  ;;  %v5647_v29 = vand.u32 3, %v1194_v4 }
 0x1bc   : > { %v1053_v6 = vadd.s32 %v5520_v56, %v5525_v24  ;;  %v8147_v47 = vand.u32 2147483647, %v5178_v58  ;;  %v1181_v52 = vand.u32 2147483647, %v1180_v27  ;;  %v1183_v9 = vcvt.s32.f32 %v1176_v44 }
 0x1bd   : > { %8262 = vst [vmem:[#allocation24_spill] sm:$0xff] %v5647_v29  ;;  %v5654_v3 = vshrl.u32 %v1266_v61, 30  ;;  %v1324_v31 = vsub.s32 32, %v1323_v2  ;;  %v1069_v18 = vsub.s32 32, %v5640_v59  ;;  %v1317_v30 = vor.u32 8388608, %v1316_v48 }
 0x1be   : > { %v4335_v10 = vadd.s32 4294967169, %v1521_v40  ;;  %v1073_v11 = vsub.s32 4294967266, %v5640_v59  ;;  %v1326_v24 = vshll.u32 %v8245_v12, %v1323_v2  ;;  %v1329_v20 = vshll.u32 %v8246_v45, %v1323_v2 }
 0x1bf   : > { %v1268_v51 = vshll.u32 %v5654_v3, 30  ;;  %v1327_v56 = vshrl.u32 %v8246_v45, %v1324_v31  ;;  %v1330_v43 = vshrl.u32 %v8247_v63, %v1324_v31  ;;  %v1332_v42 = vshll.u32 %v8247_v63, %v1323_v2 }
 0x1c0   : > { %v1333_v16 = vshrl.u32 %v8248_v50, %v1324_v31  ;;  %v1322_v7 = vshrl.u32 %v1321_v13, 5  ;;  %v1335_v0 = vshll.u32 %v8248_v50, %v1323_v2  ;;  %v1336_v17 = vshrl.u32 %v8238_v36, %v1324_v31 }
 0x1c1   : > { %v5666_v4 = vsub.s32 %v1265_v60, %v1268_v51  ;;  %v1184_v44 = vmul.f32 %v1183_v9, %v1181_v52  ;;  %v1328_v27 = vor.u32 %v1327_v56, %v1326_v24  ;;  %v1331_v48 = vor.u32 %v1330_v43, %v1329_v20 }
 0x1c2   : > { %v1334_v40 = vor.u32 %v1333_v16, %v1332_v42  ;;  %v1337_v35 = vor.u32 %v1336_v17, %v1335_v0  ;;  %v1357_v19 = vshll.u32 %v1317_v30, 8  ;;  %v1524_v29 = vand.u32 8388607, %v8147_v47 }
 0x1c3   : > { %v1271_v61 = vsub.s32 0, %v5666_v4  ;;  %v5673_v46 = vpop.eup %4673  ;;  %v1071_v60 = vshrl.u32 %v1053_v6, %v1069_v18  ;;  %v1338_v13 = vshll.u32 %v8238_v36, %v1323_v2  ;;  %v1339_v51 = vshrl.u32 %v8239_v15, %v1324_v31 }
 0x1c4   : > { %8263 = vst [vmem:[#allocation25_spill] sm:$0xff] %v5673_v46  ;;  %v1527_v55 = vadd.s32 1, %v4335_v10  ;;  %v5677_v25 = vpop.eup %4675  ;;  %vm999_vm1 = vcmp.lt.s32.totalorder %v5078_v32, 0  ;;  %v1074_v52 = vadd.s32 127, %v1073_v11  ;;  %vm1341_vm6 = vcmp.lt.s32.totalorder %v1322_v7, 1 }
 0x1c5   : > { %v4324_v9 = vmin.u32 %v1271_v61, %v5666_v4  ;;  %vm1344_vm7 = vcmp.lt.s32.totalorder %v1322_v7, 4  ;;  %v1325_v30 = vshrl.u32 %v8245_v12, %v1324_v31  ;;  %v1340_v24 = vor.u32 %v1339_v51, %v1338_v13 }
 0x1c6   : > { %v1346_v56 = vsel %vm1344_vm7, %v1334_v40, 2102212464  ;;  %v1349_v20 = vsel %vm1341_vm6, %v1328_v27, %v1331_v48  ;;  %vm1343_vm8 = vcmp.lt.s32.totalorder %v1322_v7, 3  ;;  %v1350_v2 = vsel %vm1344_vm7, %v1337_v35, 920167782 }
 0x1c7   : > { %v1273_v6 = vclz %v4324_v9  ;;  %v1353_v18 = vsel %vm1341_vm6, %v1331_v48, %v1334_v40  ;;  %vm1342_vm9 = vcmp.lt.s32.totalorder %v1322_v7, 2  ;;  %v1345_v10 = vsel %vm1341_vm6, %v1325_v30, %v1328_v27 }
 0x1c8   : > { %v1351_v43 = vsel %vm1343_vm8, %v1334_v40, %v1350_v2  ;;  %v1354_v42 = vsel %vm1344_vm7, %v1340_v24, 1326507024  ;;  %v1347_v0 = vsel %vm1343_vm8, %v1331_v48, %v1346_v56  ;;  %v1185_v61 = vxor.u32 2147483648, %v1184_v44 }
 0x1c9   : > { %v4325_v16 = vadd.s32 4294967294, %v1273_v6  ;;  %v1352_v11 = vsel %vm1342_vm9, %v1349_v20, %v1351_v43  ;;  %v1355_v17 = vsel %vm1343_vm8, %v1337_v35, %v1354_v42  ;;  %v1070_v31 = vshll.u32 %v5587_v22, %v5640_v59 }
 0x1ca   : > { %v1356_v47 = vsel %vm1342_vm9, %v1353_v18, %v1355_v17  ;;  %v5682_v14 = vmul.u32.u64.low %v1357_v19, %v1352_v11  ;;  %v5683_v46 = vmul.u32.u64.high %v1357_v19, %v1352_v11, %v5682_v14  ;;  %v1348_v27 = vsel %vm1342_vm9, %v1345_v10, %v1347_v0 }
 0x1cb   : > { %vm4326_vm12 = vcmp.lt.s32.totalorder %v4325_v16, 0  ;;  %v5688_v13 = vmul.u32.u64.low %v1357_v19, %v1356_v47  ;;  %v5689_v51 = vmul.u32.u64.high %v1357_v19, %v1356_v47, %v5688_v13  ;;  %v1525_v40 = vor.u32 8388608, %v1524_v29 }
 0x1cc   : > { %v5691_v7 = vsel %vm4326_vm12, 0, %v4325_v16  ;;  %vm1528_vm15 = vcmp.gt.s32.totalorder %v1527_v55, 0  ;;  %4677 = vcosq.f32 %v5645_v38  ;;  %v5694_v35 = vor.u32 %v1071_v60, %v1070_v31 }
 0x1cd   : > { %v1075_v48 = vshll.u32 %v1074_v52, 23  ;;  %vm1207_vm11 = vcmp.lt.s32.totalorder %v5080_v33, 0  ;;  %v1529_v9 = vsel %vm1528_vm15, %v1527_v55, 0  ;;  %4679 = vsinq.f32 %v5645_v38 }
 0x1ce   : > { %v8264_v22 = vsub.s32 4, %v5570_v41  ;;  %v1367_v29 = vadd.s32 1, %v5683_v46  ;;  %v1531_v47 = vand.u32 31, %v1529_v9  ;;  %v5708_v60 = vsel %vm1103_vm13, %v1185_v61, %v1184_v44 }
 0x1cf   : > { %v1281_v52 = vsub.s32 4294967266, %v5691_v7  ;;  %v1364_v30 = vmul.u32 %v1357_v19, %v1348_v27  ;;  %vm1366_vm4 = vc.u32 %v5689_v51, %v5682_v14  ;;  %v1261_v55 = vadd.s32 %v5599_v37, %v5617_v62 }
 0x1d0   : > { %v5703_v59 = vsel %vm999_vm1, %v8264_v22, %v5570_v41  ;;  %v1368_v38 = vsel %vm1366_vm4, %v1367_v29, %v5683_v46  ;;  %v1532_v41 = vsub.s32 32, %v1531_v47  ;;  %v5716_v24 = vshll.u32 %v1525_v40, 8 }
 0x1d1   : > { %v1076_v56 = vor.u32 4788187, %v1075_v48  ;;  %v1079_v20 = vcvt.s32.f32 %v5694_v35  ;;  %v1291_v44 = vsub.s32 4, %v5654_v3  ;;  %v1369_v6 = vadd.s32 %v1368_v38, %v1364_v30 }
 0x1d2   : > { %v1277_v2 = vsub.s32 32, %v5691_v7  ;;  %v1535_v19 = vshrl.u32 %v8246_v45, %v1532_v41  ;;  %v1538_v18 = vshrl.u32 %v8247_v63, %v1532_v41  ;;  %v1541_v10 = vshrl.u32 %v8248_v50, %v1532_v41 }
 0x1d3   : > { %v1282_v37 = vadd.s32 127, %v1281_v52  ;;  %v1370_v62 = vadd.s32 536870912, %v1369_v6  ;;  %v1530_v46 = vshrl.u32 %v1529_v9, 5  ;;  %v1540_v43 = vshll.u32 %v8247_v63, %v1531_v47 }
 0x1d4   : > { %v1534_v42 = vshll.u32 %v8245_v12, %v1531_v47  ;;  %v1537_v16 = vshll.u32 %v8246_v45, %v1531_v47  ;;  %v1543_v0 = vshll.u32 %v8248_v50, %v1531_v47  ;;  %v1544_v11 = vshrl.u32 %v8238_v36, %v1532_v41 }
 0x1d5   : > { %v5729_v17 = vshrl.u32 %v1370_v62, 30  ;;  %v1542_v61 = vor.u32 %v1541_v10, %v1540_v43  ;;  %v1546_v31 = vshll.u32 %v8238_v36, %v1531_v47  ;;  %v1547_v13 = vshrl.u32 %v8239_v15, %v1532_v41 }
 0x1d6   : > { %v1292_v27 = vsel %vm1207_vm11, %v1291_v44, %v5654_v3  ;;  %v1536_v40 = vor.u32 %v1535_v19, %v1534_v42  ;;  %v1539_v35 = vor.u32 %v1538_v18, %v1537_v16  ;;  %v1545_v48 = vor.u32 %v1544_v11, %v1543_v0  ;;  %v5736_v9 = vpop.eup %4677 }
 0x1d7   : > { %8265 = vst [vmem:[#allocation26_spill] sm:$0xff] %v5736_v9  ;;  %v8266_v22 = vand.u32 2147483647, %v5078_v32  ;;  %v1077_v52 = vand.u32 2147483647, %v1076_v56  ;;  %v1278_v47 = vshll.u32 %v5666_v4, %v5691_v7  ;;  %v1372_v30 = vshll.u32 %v5729_v17, 30  ;;  %v5747_v10 = vpop.eup %4679 }
 0x1d8   : > { %v1548_v38 = vor.u32 %v1547_v13, %v1546_v31  ;;  %8269 = vst [vmem:[#allocation27_spill] sm:$0xff] %v5747_v10  ;;  %v8270_v3 = vand.u32 2147483647, %v5080_v33  ;;  %v1279_v19 = vshrl.u32 %v1261_v55, %v1277_v2  ;;  %v1283_v18 = vshll.u32 %v1282_v37, 23 }
 0x1d9   : > { %vm5740_vm13 = vcmp.le.f32.partialorder %v8266_v22, 0.7853982  ;;  %vm1552_vm2 = vcmp.lt.s32.totalorder %v1530_v46, 4  ;;  %v1416_v62 = vand.u32 2139095040, %v5223_v23  ;;  %v5756_v56 = vsub.s32 %v1369_v6, %v1372_v30 }
 0x1da   : > { %vm5751_vm0 = vcmp.le.f32.partialorder %v8270_v3, 0.7853982  ;;  %v1533_v4 = vshrl.u32 %v8245_v12, %v1532_v41  ;;  %vm1549_vm10 = vcmp.lt.s32.totalorder %v1530_v46, 1  ;;  %v1554_v7 = vsel %vm1552_vm2, %v1542_v61, 2102212464 }
 0x1db   : > { %vm1551_vm14 = vcmp.lt.s32.totalorder %v1530_v46, 3  ;;  %v1557_v43 = vsel %vm1549_vm10, %v1536_v40, %v1539_v35  ;;  %v1558_v42 = vsel %vm1552_vm2, %v1545_v48, 920167782  ;;  %v1562_v16 = vsel %vm1552_vm2, %v1548_v38, 1326507024 }
 0x1dc   : > { %v1375_v0 = vsub.s32 0, %v5756_v56  ;;  %v1553_v11 = vsel %vm1549_vm10, %v1533_v4, %v1536_v40  ;;  %v1555_v31 = vsel %vm1551_vm14, %v1539_v35, %v1554_v7  ;;  %v1561_v13 = vsel %vm1549_vm10, %v1539_v35, %v1542_v61 }
 0x1dd   : > { %v1080_v55 = vmul.f32 %v1079_v20, %v1077_v52  ;;  %vm1550_vm5 = vcmp.lt.s32.totalorder %v1530_v46, 2  ;;  %v1559_v2 = vsel %vm1551_vm14, %v1542_v61, %v1558_v42  ;;  %v1563_v37 = vsel %vm1551_vm14, %v1545_v48, %v1562_v16 }
 0x1de   : > { %v1280_v22 = vor.u32 %v1279_v19, %v1278_v47  ;;  %v1284_v6 = vor.u32 4788187, %v1283_v18  ;;  %v4328_v30 = vmin.u32 %v1375_v0, %v5756_v56  ;;  %v1560_v41 = vsel %vm1550_vm5, %v1557_v43, %v1559_v2 }
 0x1df   : > { %v1556_v3 = vsel %vm1550_vm5, %v1553_v11, %v1555_v31  ;;  %v1564_v9 = vsel %vm1550_vm5, %v1561_v13, %v1563_v37  ;;  %v5762_v10 = vmul.u32.u64.low %v5716_v24, %v1560_v41  ;;  %v5763_v57 = vmul.u32.u64.high %v5716_v24, %v1560_v41, %v5762_v10 }
 0x1e0   : > { %v1377_v38 = vclz %v4328_v30  ;;  %v5767_v40 = vmul.u32.u64.low %v5716_v24, %v1564_v9  ;;  %v5768_v35 = vmul.u32.u64.high %v5716_v24, %v1564_v9, %v5767_v40  ;;  %v1417_v20 = vshrl.u32 %v1416_v62, 23 }
 0x1e1   : > { %v1189_v46 = vsel %vm5576_vm3, %v5076_v26, %v5708_v60  ;;  %v1086_v61 = vsel %vm5740_vm13, 0, %v5703_v59  ;;  %v8155_v48 = vand.u32 2147483647, %v5223_v23  ;;  %v1624_v52 = vand.u32 2139095040, %v5314_v34 }
 0x1e2   : > { %v1285_v47 = vand.u32 2147483647, %v1284_v6  ;;  %v1294_v19 = vsel %vm5751_vm0, 0, %v1292_v27  ;;  %vm1311_vm6 = vcmp.lt.s32.totalorder %v5104_v8, 0  ;;  %v4329_v9 = vadd.s32 4294967294, %v1377_v38 }
 0x1e3   : > { %v4331_v18 = vadd.s32 4294967169, %v1417_v20  ;;  %v1081_v62 = vxor.u32 2147483648, %v1080_v55  ;;  %v1287_v4 = vcvt.s32.f32 %v1280_v22  ;;  %v1572_v21 = vmul.u32 %v5716_v24, %v1556_v3 }
 0x1e4   : > { %v1575_v60 = vadd.s32 1, %v5763_v57  ;;  %vm4330_vm3 = vcmp.lt.s32.totalorder %v4329_v9, 0  ;;  %vm1574_vm7 = vc.u32 %v5768_v35, %v5762_v10  ;;  %v1625_v7 = vshrl.u32 %v1624_v52, 23 }
 0x1e5   : > { %v1423_v59 = vadd.s32 1, %v4331_v18  ;;  %v1090_v43 = vadd.s32 3, %v1086_v61  ;;  %v1298_v42 = vadd.s32 3, %v1294_v19  ;;  %v1380_v16 = vsel %vm4330_vm3, 0, %v4329_v9 }
 0x1e6   : > { %v1576_v27 = vsel %vm1574_vm7, %v1575_v60, %v5763_v57  ;;  %4681 = vcosq.f32 %v1189_v46  ;;  %v5787_v0 = vmul.f32 %v1287_v4, %v1285_v47  ;;  %v1385_v11 = vsub.s32 4294967266, %v1380_v16 }
 0x1e7   : > { %v1577_v31 = vadd.s32 %v1576_v27, %v1572_v21  ;;  %v1082_v24 = vsel %vm999_vm1, %v1081_v62, %v1080_v55  ;;  %v1395_v13 = vsub.s32 4, %v5729_v17  ;;  %v1420_v2 = vand.u32 8388607, %v8155_v48 }
 0x1e8   : > { %vm1424_vm8 = vcmp.gt.s32.totalorder %v1423_v59, 0  ;;  %v1386_v37 = vadd.s32 127, %v1385_v11  ;;  %v4339_v30 = vadd.s32 4294967169, %v1625_v7  ;;  %4683 = vsinq.f32 %v1189_v46 }
 0x1e9   : > { %v1578_v22 = vadd.s32 536870912, %v1577_v31  ;;  %v1425_v6 = vsel %vm1424_vm8, %v1423_v59, 0  ;;  %v5794_v57 = vand.u32 3, %v1090_v43  ;;  %v5796_v41 = vand.u32 3, %v1298_v42 }
 0x1ea   : > { %v1427_v3 = vand.u32 31, %v1425_v6  ;;  %v5801_v55 = vsel %vm5740_vm13, %v5078_v32, %v1082_v24  ;;  %v1289_v38 = vxor.u32 2147483648, %v5787_v0  ;;  %v1365_v40 = vadd.s32 %v5682_v14, %v5689_v51 }
 0x1eb   : > { %v5806_v20 = vshrl.u32 %v1578_v22, 30  ;;  %v1381_v61 = vsub.s32 32, %v1380_v16  ;;  %v5811_v46 = vsel %vm1311_vm6, %v1395_v13, %v5729_v17  ;;  %v8154_v47 = vand.u32 2147483647, %v5314_v34 }
 0x1ec   : > { %v1428_v52 = vsub.s32 32, %v1427_v3  ;;  %v1387_v19 = vshll.u32 %v1386_v37, 23  ;;  %v1421_v9 = vor.u32 8388608, %v1420_v2  ;;  %v1631_v18 = vadd.s32 1, %v4339_v30 }
 0x1ed   : > { %v1580_v29 = vshll.u32 %v5806_v20, 30  ;;  %v1430_v62 = vshll.u32 %v8245_v12, %v1427_v3  ;;  %v1382_v21 = vshll.u32 %v5756_v56, %v1380_v16  ;;  %v1433_v60 = vshll.u32 %v8246_v45, %v1427_v3 }
 0x1ee   : > { %v1431_v14 = vshrl.u32 %v8246_v45, %v1428_v52  ;;  %v1434_v51 = vshrl.u32 %v8247_v63, %v1428_v52  ;;  %v1437_v4 = vshrl.u32 %v8248_v50, %v1428_v52  ;;  %v1436_v59 = vshll.u32 %v8247_v63, %v1427_v3 }
 0x1ef   : > { %v5820_v17 = vsub.s32 %v1577_v31, %v1580_v29  ;;  %v1383_v7 = vshrl.u32 %v1365_v40, %v1381_v61  ;;  %v1426_v43 = vshrl.u32 %v1425_v6, 5  ;;  %v1439_v27 = vshll.u32 %v8248_v50, %v1427_v3 }
 0x1f0   : > { %v1432_v42 = vor.u32 %v1431_v14, %v1430_v62  ;;  %v5825_v11 = vpop.eup %4681  ;;  %v1435_v13 = vor.u32 %v1434_v51, %v1433_v60  ;;  %v1438_v2 = vor.u32 %v1437_v4, %v1436_v59  ;;  %v1440_v37 = vshrl.u32 %v8238_v36, %v1428_v52 }
 0x1f1   : > { %8273 = vst [vmem:[#allocation28_spill] sm:$0xff] %v5825_v11  ;;  %v1583_v24 = vsub.s32 0, %v5820_v17  ;;  %v1388_v56 = vor.u32 4788187, %v1387_v19  ;;  %v1442_v16 = vshll.u32 %v8238_v36, %v1427_v3  ;;  %v1443_v31 = vshrl.u32 %v8239_v15, %v1428_v52 }
 0x1f2   : > { %vm1632_vm1 = vcmp.gt.s32.totalorder %v1631_v18, 0  ;;  %v1441_v6 = vor.u32 %v1440_v37, %v1439_v27  ;;  %v1461_v30 = vshll.u32 %v1421_v9, 8  ;;  %v5834_v40 = vand.u32 8388607, %v8154_v47  ;;  %v5836_v61 = vpop.eup %4683 }
 0x1f3   : > { %v4336_v22 = vmin.u32 %v1583_v24, %v5820_v17  ;;  %v1384_v29 = vor.u32 %v1383_v7, %v1382_v21  ;;  %v1444_v62 = vor.u32 %v1443_v31, %v1442_v16  ;;  %vm1445_vm9 = vcmp.lt.s32.totalorder %v1426_v43, 1 }
 0x1f4   : > { %vm1448_vm12 = vcmp.lt.s32.totalorder %v1426_v43, 4  ;;  %v1453_v14 = vsel %vm1445_vm9, %v1432_v42, %v1435_v13  ;;  %v1633_v51 = vsel %vm1632_vm1, %v1631_v18, 0  ;;  %v1389_v4 = vand.u32 2147483647, %v1388_v56 }
 0x1f5   : > { %v1585_v19 = vclz %v4336_v22  ;;  %v1450_v3 = vsel %vm1448_vm12, %v1438_v2, 2102212464  ;;  %v1429_v60 = vshrl.u32 %v8245_v12, %v1428_v52  ;;  %vm1447_vm15 = vcmp.lt.s32.totalorder %v1426_v43, 3 }
 0x1f6   : > { %v1454_v9 = vsel %vm1448_vm12, %v1441_v6, 920167782  ;;  %vm1446_vm4 = vcmp.lt.s32.totalorder %v1426_v43, 2  ;;  %v1457_v24 = vsel %vm1445_vm9, %v1435_v13, %v1438_v2  ;;  %v1451_v21 = vsel %vm1447_vm15, %v1435_v13, %v1450_v3 }
 0x1f7   : > { %v4337_v59 = vadd.s32 4294967294, %v1585_v19  ;;  %v1455_v27 = vsel %vm1447_vm15, %v1438_v2, %v1454_v9  ;;  %v1449_v37 = vsel %vm1445_vm9, %v1429_v60, %v1432_v42  ;;  %v1458_v16 = vsel %vm1448_vm12, %v1444_v62, 1326507024 }
 0x1f8   : > { %v1456_v7 = vsel %vm1446_vm4, %v1453_v14, %v1455_v27  ;;  %v1459_v31 = vsel %vm1447_vm15, %v1441_v6, %v1458_v16  ;;  %v1573_v52 = vadd.s32 %v5762_v10, %v5768_v35  ;;  %v1635_v9 = vand.u32 31, %v1633_v51 }
 0x1f9   : > { %vm4338_vm13 = vcmp.lt.s32.totalorder %v4337_v59, 0  ;;  %v5843_v22 = vmul.u32.u64.low %v1461_v30, %v1456_v7  ;;  %v5844_v18 = vmul.u32.u64.high %v1461_v30, %v1456_v7, %v5843_v22  ;;  %v1460_v19 = vsel %vm1446_vm4, %v1457_v24, %v1459_v31 }
 0x1fa   : > { %v1588_v56 = vsel %vm4338_vm13, 0, %v4337_v59  ;;  %v1391_v2 = vcvt.s32.f32 %v1384_v29  ;;  %v1452_v13 = vsel %vm1446_vm4, %v1449_v37, %v1451_v21  ;;  %v1629_v3 = vor.u32 8388608, %v5834_v40 }
 0x1fb   : > { %v1593_v42 = vsub.s32 4294967266, %v1588_v56  ;;  %v1589_v62 = vsub.s32 32, %v1588_v56  ;;  %v5852_v14 = vmul.u32.u64.low %v1461_v30, %v1460_v19  ;;  %v5853_v6 = vmul.u32.u64.high %v1461_v30, %v1460_v19, %v5852_v14 }
 0x1fc   : > { %v1636_v60 = vsub.s32 32, %v1635_v9  ;;  %v5855_v27 = vmul.f32 %v1391_v2, %v1389_v4  ;;  %v1603_v10 = vsub.s32 4, %v5806_v20  ;;  %v1471_v35 = vadd.s32 1, %v5844_v18 }
 0x1fd   : > { %v1594_v7 = vadd.s32 127, %v1593_v42  ;;  %v1468_v59 = vmul.u32 %v1461_v30, %v1452_v13  ;;  %v1638_v29 = vshll.u32 %v8245_v12, %v1635_v9  ;;  %v1641_v37 = vshll.u32 %v8246_v45, %v1635_v9 }
 0x1fe   : > { %v1639_v43 = vshrl.u32 %v8246_v45, %v1636_v60  ;;  %v1642_v24 = vshrl.u32 %v8247_v63, %v1636_v60  ;;  %v1644_v21 = vshll.u32 %v8247_v63, %v1635_v9  ;;  %v1645_v4 = vshrl.u32 %v8248_v50, %v1636_v60 }
 0x1ff   : > { %v1595_v40 = vshll.u32 %v1594_v7, 23  ;;  %v1591_v16 = vshrl.u32 %v1573_v52, %v1589_v62  ;;  %vm1470_vm2 = vc.u32 %v5853_v6, %v5843_v22  ;;  %v1634_v31 = vshrl.u32 %v1633_v51, 5 }
 0x200   : > { %v1647_v30 = vshll.u32 %v8248_v50, %v1635_v9  ;;  %v1472_v19 = vsel %vm1470_vm2, %v1471_v35, %v5844_v18  ;;  %v1640_v2 = vor.u32 %v1639_v43, %v1638_v29  ;;  %v1643_v42 = vor.u32 %v1642_v24, %v1641_v37 }
 0x201   : > { %v1646_v13 = vor.u32 %v1645_v4, %v1644_v21  ;;  %v8274_v14 = vand.u32 2147483647, %v5104_v8  ;;  %v1473_v47 = vadd.s32 %v1472_v19, %v1468_v59  ;;  %v1648_v52 = vshrl.u32 %v8238_v36, %v1636_v60 }
 0x202   : > { %v1650_v62 = vshll.u32 %v8238_v36, %v1635_v9  ;;  %v1651_v51 = vshrl.u32 %v8239_v15, %v1636_v60  ;;  %vm1519_vm14 = vcmp.lt.s32.totalorder %v5178_v58, 0  ;;  %v1590_v18 = vshll.u32 %v5820_v17, %v1588_v56 }
 0x203   : > { %vm5871_vm10 = vcmp.le.f32.partialorder %v8274_v14, 0.7853982  ;;  %v1596_v35 = vor.u32 4788187, %v1595_v40  ;;  %v1637_v29 = vshrl.u32 %v8245_v12, %v1636_v60  ;;  %v1669_v43 = vshll.u32 %v1629_v3, 8 }
 0x204   : > { %v1474_v24 = vadd.s32 536870912, %v1473_v47  ;;  %v1649_v37 = vor.u32 %v1648_v52, %v1647_v30  ;;  %v1652_v21 = vor.u32 %v1651_v51, %v1650_v62  ;;  %vm1653_vm5 = vcmp.lt.s32.totalorder %v1634_v31, 1 }
 0x205   : > { %v1592_v4 = vor.u32 %v1591_v16, %v1590_v18  ;;  %vm1655_vm3 = vcmp.lt.s32.totalorder %v1634_v31, 3  ;;  %vm1656_vm7 = vcmp.lt.s32.totalorder %v1634_v31, 4  ;;  %v1661_v59 = vsel %vm1653_vm5, %v1640_v2, %v1643_v42 }
 0x206   : > { %v8277_v9 = vand.u32 2147483647, %v5178_v58  ;;  %v5887_v14 = vshrl.u32 %v1474_v24, 30  ;;  %v1658_v17 = vsel %vm1656_vm7, %v1646_v13, 2102212464  ;;  %v1665_v60 = vsel %vm1653_vm5, %v1643_v42, %v1646_v13 }
 0x207   : > { %v1662_v56 = vsel %vm1656_vm7, %v1649_v37, 920167782  ;;  %v1597_v3 = vand.u32 2147483647, %v1596_v35  ;;  %vm1654_vm1 = vcmp.lt.s32.totalorder %v1634_v31, 2  ;;  %v1657_v52 = vsel %vm1653_vm5, %v1637_v29, %v1640_v2 }
 0x208   : > { %vm5883_vm8 = vcmp.le.f32.partialorder %v8277_v9, 0.7853982  ;;  %v1663_v40 = vsel %vm1655_vm3, %v1646_v13, %v1662_v56  ;;  %v1666_v30 = vsel %vm1656_vm7, %v1652_v21, 1326507024  ;;  %v1476_v16 = vshll.u32 %v5887_v14, 30 }
 0x209   : > { %v1664_v62 = vsel %vm1654_vm1, %v1661_v59, %v1663_v40  ;;  %v1667_v51 = vsel %vm1655_vm3, %v1649_v37, %v1666_v30  ;;  %v1659_v18 = vsel %vm1655_vm3, %v1643_v42, %v1658_v17  ;;  %4685 = vcosq.f32 %v5801_v55 }
 0x20a   : > { %v1668_v24 = vsel %vm1654_vm1, %v1665_v60, %v1667_v51  ;;  %v5895_v9 = vmul.u32.u64.low %v1669_v43, %v1664_v62  ;;  %v5896_v48 = vmul.u32.u64.high %v1669_v43, %v1664_v62, %v5895_v9  ;;  %v1290_v2 = vsel %vm1207_vm11, %v1289_v38, %v5787_v0 }
 0x20b   : > { %v1393_v13 = vxor.u32 2147483648, %v5855_v27  ;;  %v5906_v35 = vsub.s32 %v1473_v47, %v1476_v16  ;;  %v1398_v42 = vsel %vm5871_vm10, 0, %v5811_v46  ;;  %v1599_v29 = vcvt.s32.f32 %v1592_v4 }
 0x20c   : > { %v5911_v37 = vmul.u32.u64.low %v1669_v43, %v1668_v24  ;;  %v5912_v21 = vmul.u32.u64.high %v1669_v43, %v1668_v24, %v5911_v37  ;;  %v1604_v59 = vsel %vm1519_vm14, %v1603_v10, %v5806_v20  ;;  %v1660_v0 = vsel %vm1654_vm1, %v1657_v52, %v1659_v18 }
 0x20d   : > { %v1479_v17 = vsub.s32 0, %v5906_v35  ;;  %v1728_v38 = vand.u32 2139095040, %v5381_v39  ;;  %4687 = vsinq.f32 %v5801_v55  ;;  %v1293_v46 = vsel %vm5751_vm0, %v5080_v33, %v1290_v2 }
 0x20e   : > { %v1600_v47 = vmul.f32 %v1599_v29, %v1597_v3  ;;  %v1679_v4 = vadd.s32 1, %v5896_v48  ;;  %v1394_v56 = vsel %vm1311_vm6, %v1393_v13, %v5855_v27  ;;  %v8156_v10 = vand.u32 2147483647, %v5381_v39 }
 0x20f   : > { %v4332_v20 = vmin.u32 %v1479_v17, %v5906_v35  ;;  %v1729_v31 = vshrl.u32 %v1728_v38, 23  ;;  %v1402_v60 = vadd.s32 3, %v1398_v42  ;;  %v1606_v55 = vsel %vm5883_vm8, 0, %v1604_v59 }
 0x210   : > { %v1676_v40 = vmul.u32 %v1669_v43, %v1660_v0  ;;  %vm1678_vm11 = vc.u32 %v5912_v21, %v5895_v9  ;;  %vm1415_vm0 = vcmp.lt.s32.totalorder %v5223_v23, 0  ;;  %v1936_v27 = vand.u32 2139095040, %v5478_v5 }
 0x211   : > { %v1481_v44 = vclz %v4332_v20  ;;  %v1680_v3 = vsel %vm1678_vm11, %v1679_v4, %v5896_v48  ;;  %v4343_v30 = vadd.s32 4294967169, %v1729_v31  ;;  %4689 = vcosq.f32 %v1293_v46 }
 0x212   : > { %v1397_v16 = vsel %vm5871_vm10, %v5104_v8, %v1394_v56  ;;  %v1601_v52 = vxor.u32 2147483648, %v1600_v47  ;;  %v1681_v62 = vadd.s32 %v1680_v3, %v1676_v40  ;;  %v1610_v51 = vadd.s32 3, %v1606_v55 }
 0x213   : > { %v4333_v43 = vadd.s32 4294967294, %v1481_v44  ;;  %v1732_v18 = vand.u32 8388607, %v8156_v10  ;;  %v1735_v24 = vadd.s32 1, %v4343_v30  ;;  %4691 = vsinq.f32 %v1293_v46  ;;  %v5944_v42 = vpop.eup %4685 }
 0x214   : > { %v5942_v2 = vand.u32 3, %v1402_v60  ;;  %v1682_v48 = vadd.s32 536870912, %v1681_v62  ;;  %v1937_v13 = vshrl.u32 %v1936_v27, 23  ;;  %4693 = vcosq.f32 %v1397_v16 }
 0x215   : > { %vm4334_vm6 = vcmp.lt.s32.totalorder %v4333_v43, 0  ;;  %v1499_v7 = vsub.s32 4, %v5887_v14  ;;  %vm1736_vm9 = vcmp.gt.s32.totalorder %v1735_v24, 0  ;;  %v1602_v29 = vsel %vm1519_vm14, %v1601_v52, %v1600_v47 }
 0x216   : > { %8280 = vst [vmem:[#allocation29_spill] sm:$0xff] %v5942_v2  ;;  %v1484_v37 = vsel %vm4334_vm6, 0, %v4333_v43  ;;  %v5949_v59 = vshrl.u32 %v1682_v48, 30  ;;  %v1737_v17 = vsel %vm1736_vm9, %v1735_v24, 0  ;;  %4695 = vsinq.f32 %v1397_v16 }
 0x217   : > { %v5951_v0 = vand.u32 3, %v1610_v51  ;;  %v1489_v38 = vsub.s32 4294967266, %v1484_v37  ;;  %v1733_v46 = vor.u32 8388608, %v1732_v18  ;;  %v5953_v4 = vpop.eup %4687  ;;  %v1485_v56 = vsub.s32 32, %v1484_v37 }
 0x218   : > { %v1684_v20 = vshll.u32 %v5949_v59, 30  ;;  %v1739_v31 = vand.u32 31, %v1737_v17  ;;  %v4351_v60 = vadd.s32 4294967169, %v1937_v13  ;;  %v5959_v47 = vsel %vm5883_vm8, %v5178_v58, %v1602_v29 }
 0x219   : > { %8281 = vst [vmem:[#allocation30_spill] sm:$0xff] %v5951_v0  ;;  %v1469_v55 = vadd.s32 %v5843_v22, %v5853_v6  ;;  %v1490_v40 = vadd.s32 127, %v1489_v38  ;;  %v5963_v44 = vshrl.u32 %v1737_v17, 5  ;;  %v5968_v3 = vsel %vm1415_vm0, %v1499_v7, %v5887_v14 }
 0x21a   : > { %v5970_v30 = vsub.s32 %v1681_v62, %v1684_v20  ;;  %v1740_v27 = vsub.s32 32, %v1739_v31  ;;  %v1486_v19 = vshll.u32 %v5906_v35, %v1484_v37  ;;  %v1677_v51 = vadd.s32 %v5895_v9, %v5912_v21 }
 0x21b   : > { %v1491_v52 = vshll.u32 %v1490_v40, 23  ;;  %v5976_v22 = vshll.u32 %v1733_v46, 8  ;;  %v5978_v6 = vpop.eup %4689  ;;  %v1487_v43 = vshrl.u32 %v1469_v55, %v1485_v56  ;;  %v1943_v62 = vadd.s32 1, %v4351_v60 }
 0x21c   : > { %v1687_v18 = vsub.s32 0, %v5970_v30  ;;  %v1743_v14 = vshrl.u32 %v8246_v45, %v1740_v27  ;;  %v1742_v24 = vshll.u32 %v8245_v12, %v1739_v31  ;;  %v1745_v48 = vshll.u32 %v8246_v45, %v1739_v31 }
 0x21d   : > { %v1746_v35 = vshrl.u32 %v8247_v63, %v1740_v27  ;;  %vm1757_vm12 = vcmp.lt.s32.totalorder %v5963_v44, 1  ;;  %v5986_v13 = vpop.eup %4691  ;;  %v1492_v9 = vor.u32 4788187, %v1491_v52  ;;  %v1748_v7 = vshll.u32 %v8247_v63, %v1739_v31 }
 0x21e   : > { %v4340_v21 = vmin.u32 %v1687_v18, %v5970_v30  ;;  %v1749_v29 = vshrl.u32 %v8248_v50, %v1740_v27  ;;  %v5991_v37 = vpop.eup %4693  ;;  %v1744_v17 = vor.u32 %v1743_v14, %v1742_v24  ;;  %v1751_v46 = vshll.u32 %v8248_v50, %v1739_v31 }
 0x21f   : > { %8282 = vst [vmem:[#allocation31_spill] sm:$0xff] %v5991_v37  ;;  %v1747_v38 = vor.u32 %v1746_v35, %v1745_v48  ;;  %v1752_v56 = vshrl.u32 %v8238_v36, %v1740_v27  ;;  %v1754_v55 = vshll.u32 %v8238_v36, %v1739_v31  ;;  %v1755_v40 = vshrl.u32 %v8239_v15, %v1740_v27 }
 0x220   : > { %v1689_v20 = vclz %v4340_v21  ;;  %v1750_v60 = vor.u32 %v1749_v29, %v1748_v7  ;;  %v5997_v52 = vpop.eup %4695  ;;  %v8284_v18 = vand.u32 2147483647, %v5223_v23  ;;  %v1488_v14 = vor.u32 %v1487_v43, %v1486_v19 }
 0x221   : > { %8283 = vst [vmem:[#allocation32_spill] sm:$0xff] %v5997_v52  ;;  %v1753_v24 = vor.u32 %v1752_v56, %v1751_v46  ;;  %vm1758_vm4 = vcmp.lt.s32.totalorder %v5963_v44, 2  ;;  %vm1760_vm13 = vcmp.lt.s32.totalorder %v5963_v44, 4  ;;  %v1741_v35 = vshrl.u32 %v8245_v12, %v1740_v27 }
 0x222   : > { %vm6001_vm15 = vcmp.le.f32.partialorder %v8284_v18, 0.7853982  ;;  %v4341_v48 = vadd.s32 4294967294, %v1689_v20  ;;  %v1756_v31 = vor.u32 %v1755_v40, %v1754_v55  ;;  %v1762_v21 = vsel %vm1760_vm13, %v1750_v60, 2102212464 }
 0x223   : > { %v1493_v7 = vand.u32 2147483647, %v1492_v9  ;;  %vm1759_vm2 = vcmp.lt.s32.totalorder %v5963_v44, 3  ;;  %v1765_v29 = vsel %vm1757_vm12, %v1744_v17, %v1747_v38  ;;  %v1766_v19 = vsel %vm1760_vm13, %v1753_v24, 920167782 }
 0x224   : > { %vm4342_vm10 = vcmp.lt.s32.totalorder %v4341_v48, 0  ;;  %v1761_v43 = vsel %vm1757_vm12, %v1741_v35, %v1744_v17  ;;  %v1763_v46 = vsel %vm1759_vm2, %v1747_v38, %v1762_v21  ;;  %v1767_v56 = vsel %vm1759_vm2, %v1750_v60, %v1766_v19 }
 0x225   : > { %v1692_v27 = vsel %vm4342_vm10, 0, %v4341_v48  ;;  %v1768_v20 = vsel %vm1758_vm4, %v1765_v29, %v1767_v56  ;;  %v1769_v9 = vsel %vm1757_vm12, %v1747_v38, %v1750_v60  ;;  %v1770_v55 = vsel %vm1760_vm13, %v1756_v31, 1326507024 }
 0x226   : > { %v1495_v40 = vcvt.s32.f32 %v1488_v14  ;;  %v1693_v18 = vsub.s32 32, %v1692_v27  ;;  %v1697_v16 = vsub.s32 4294967266, %v1692_v27  ;;  %v8287_v0 = vand.u32 2147483647, %v5478_v5 }
 0x227   : > { %v1771_v37 = vsel %vm1759_vm2, %v1753_v24, %v1770_v55  ;;  %v6026_v17 = vmul.u32.u64.low %v5976_v22, %v1768_v20  ;;  %v6027_v35 = vmul.u32.u64.high %v5976_v22, %v1768_v20, %v6026_v17  ;;  %v1832_v48 = vand.u32 2139095040, %v5555_v28 }
 0x228   : > { %v1940_v58 = vand.u32 8388607, %v8287_v0  ;;  %v1496_v21 = vmul.f32 %v1495_v40, %v1493_v7  ;;  %v1698_v29 = vadd.s32 127, %v1697_v16  ;;  %v1764_v38 = vsel %vm1758_vm4, %v1761_v43, %v1763_v46 }
 0x229   : > { %v1772_v60 = vsel %vm1758_vm4, %v1769_v9, %v1771_v37  ;;  %v1695_v14 = vshrl.u32 %v1677_v51, %v1693_v18  ;;  %vm1944_vm14 = vcmp.gt.s32.totalorder %v1943_v62, 0  ;;  %4697 = vcosq.f32 %v5959_v47 }
 0x22a   : > { %v6036_v31 = vmul.u32.u64.low %v5976_v22, %v1772_v60  ;;  %v6037_v0 = vmul.u32.u64.high %v5976_v22, %v1772_v60, %v6036_v31  ;;  %v1502_v24 = vsel %vm6001_vm15, 0, %v5968_v3  ;;  %v1699_v7 = vshll.u32 %v1698_v29, 23 }
 0x22b   : > { %v1945_v16 = vsel %vm1944_vm14, %v1943_v62, 0  ;;  %vm1623_vm5 = vcmp.lt.s32.totalorder %v5314_v34, 0  ;;  %v1694_v19 = vshll.u32 %v5970_v30, %v1692_v27  ;;  %v1783_v44 = vadd.s32 1, %v6027_v35 }
 0x22c   : > { %v1941_v51 = vor.u32 8388608, %v1940_v58  ;;  %v1947_v37 = vand.u32 31, %v1945_v16  ;;  %v1497_v43 = vxor.u32 2147483648, %v1496_v21  ;;  %v1700_v46 = vor.u32 4788187, %v1699_v7 }
 0x22d   : > { %v1707_v56 = vsub.s32 4, %v5949_v59  ;;  %v1780_v20 = vmul.u32 %v5976_v22, %v1764_v38  ;;  %v1696_v9 = vor.u32 %v1695_v14, %v1694_v19  ;;  %vm1782_vm3 = vc.u32 %v6037_v0, %v6026_v17 }
 0x22e   : > { %v1948_v3 = vsub.s32 32, %v1947_v37  ;;  %v1833_v62 = vshrl.u32 %v1832_v48, 23  ;;  %v1701_v55 = vand.u32 2147483647, %v1700_v46  ;;  %v1784_v40 = vsel %vm1782_vm3, %v1783_v44, %v6027_v35 }
 0x22f   : > { %v1946_v30 = vshrl.u32 %v1945_v16, 5  ;;  %v1950_v27 = vshll.u32 %v8245_v12, %v1947_v37  ;;  %v1785_v58 = vadd.s32 %v1784_v40, %v1780_v20  ;;  %v1953_v29 = vshll.u32 %v8246_v45, %v1947_v37 }
 0x230   : > { %v1951_v18 = vshrl.u32 %v8246_v45, %v1948_v3  ;;  %v1954_v60 = vshrl.u32 %v8247_v63, %v1948_v3  ;;  %v1956_v22 = vshll.u32 %v8247_v63, %v1947_v37  ;;  %v1957_v38 = vshrl.u32 %v8248_v50, %v1948_v3 }
 0x231   : > { %v1959_v14 = vshll.u32 %v8248_v50, %v1947_v37  ;;  %v1960_v48 = vshrl.u32 %v8238_v36, %v1948_v3  ;;  %v1703_v31 = vcvt.s32.f32 %v1696_v9  ;;  %v1786_v35 = vadd.s32 536870912, %v1785_v58 }
 0x232   : > { %v1952_v7 = vor.u32 %v1951_v18, %v1950_v27  ;;  %v1955_v16 = vor.u32 %v1954_v60, %v1953_v29  ;;  %v1958_v19 = vor.u32 %v1957_v38, %v1956_v22  ;;  %v1962_v46 = vshll.u32 %v8238_v36, %v1947_v37 }
 0x233   : > { %v1961_v44 = vor.u32 %v1960_v48, %v1959_v14  ;;  %v1963_v20 = vshrl.u32 %v8239_v15, %v1948_v3  ;;  %v1506_v40 = vadd.s32 3, %v1502_v24  ;;  %v1704_v2 = vmul.f32 %v1703_v31, %v1701_v55  ;;  %v6064_v11 = vpop.eup %4697 }
 0x234   : > { %v6061_v52 = vshrl.u32 %v1786_v35, 30  ;;  %v8166_v8 = vand.u32 2147483647, %v5555_v28  ;;  %8288 = vst [vmem:[#allocation33_spill] sm:$0xff] %v6064_v11  ;;  %v1498_v9 = vsel %vm1415_vm0, %v1497_v43, %v1496_v21  ;;  %v8289_v27 = vand.u32 2147483647, %v5314_v34 }
 0x235   : > { %v1708_v24 = vsel %vm1623_vm5, %v1707_v56, %v5949_v59  ;;  %v1964_v37 = vor.u32 %v1963_v20, %v1962_v46  ;;  %v1981_v55 = vshll.u32 %v1941_v51, 8  ;;  %vm1965_vm8 = vcmp.lt.s32.totalorder %v1946_v30, 1 }
 0x236   : > { %vm6070_vm7 = vcmp.le.f32.partialorder %v8289_v27, 0.7853982  ;;  %v1788_v29 = vshll.u32 %v6061_v52, 30  ;;  %vm1968_vm1 = vcmp.lt.s32.totalorder %v1946_v30, 4  ;;  %v4347_v60 = vadd.s32 4294967169, %v1833_v62 }
 0x237   : > { %v1949_v22 = vshrl.u32 %v8245_v12, %v1948_v3  ;;  %v1970_v21 = vsel %vm1968_vm1, %v1958_v19, 2102212464  ;;  %v1973_v43 = vsel %vm1965_vm8, %v1952_v7, %v1955_v16  ;;  %v1974_v38 = vsel %vm1968_vm1, %v1961_v44, 920167782 }
 0x238   : > { %v1705_v14 = vxor.u32 2147483648, %v1704_v2  ;;  %v6079_v48 = vsub.s32 %v1785_v58, %v1788_v29  ;;  %vm1966_vm11 = vcmp.lt.s32.totalorder %v1946_v30, 2  ;;  %vm1967_vm0 = vcmp.lt.s32.totalorder %v1946_v30, 3 }
 0x239   : > { %v1969_v31 = vsel %vm1965_vm8, %v1949_v22, %v1952_v7  ;;  %v1975_v35 = vsel %vm1967_vm0, %v1958_v19, %v1974_v38  ;;  %v1977_v59 = vsel %vm1965_vm8, %v1955_v16, %v1958_v19  ;;  %v1978_v56 = vsel %vm1968_vm1, %v1964_v37, 1326507024 }
 0x23a   : > { %vm1727_vm6 = vcmp.lt.s32.totalorder %v5381_v39, 0  ;;  %v1791_v51 = vsub.s32 0, %v6079_v48  ;;  %v1971_v46 = vsel %vm1967_vm0, %v1955_v16, %v1970_v21  ;;  %v1976_v62 = vsel %vm1966_vm11, %v1973_v43, %v1975_v35 }
 0x23b   : > { %v1979_v3 = vsel %vm1967_vm0, %v1961_v44, %v1978_v56  ;;  %v1501_v20 = vsel %vm6001_vm15, %v5223_v23, %v1498_v9  ;;  %v6088_v27 = vmul.u32.u64.low %v1981_v55, %v1976_v62  ;;  %v6089_v29 = vmul.u32.u64.high %v1981_v55, %v1976_v62, %v6088_v27 }
 0x23c   : > { %v1980_v58 = vsel %vm1966_vm11, %v1977_v59, %v1979_v3  ;;  %v1706_v7 = vsel %vm1623_vm5, %v1705_v14, %v1704_v2  ;;  %v4344_v19 = vmin.u32 %v1791_v51, %v6079_v48  ;;  %4699 = vsinq.f32 %v5959_v47 }
 0x23d   : > { %v6095_v37 = vmul.u32.u64.low %v1981_v55, %v1980_v58  ;;  %v6096_v16 = vmul.u32.u64.high %v1981_v55, %v1980_v58, %v6095_v37  ;;  %v6099_v44 = vand.u32 3, %v1506_v40  ;;  %v1972_v10 = vsel %vm1966_vm11, %v1969_v31, %v1971_v46 }
 0x23e   : > { %v1839_v9 = vadd.s32 1, %v4347_v60  ;;  %4701 = vcosq.f32 %v1501_v20  ;;  %v1710_v22 = vsel %vm6070_vm7, 0, %v1708_v24  ;;  %v1793_v21 = vclz %v4344_v19 }
 0x23f   : > { %v1836_v2 = vand.u32 8388607, %v8166_v8  ;;  %v6109_v43 = vsel %vm6070_vm7, %v5314_v34, %v1706_v7  ;;  %v1811_v47 = vsub.s32 4, %v6061_v52  ;;  %v1991_v40 = vadd.s32 1, %v6089_v29 }
 0x240   : > { %vm1840_vm9 = vcmp.gt.s32.totalorder %v1839_v9, 0  ;;  %v4345_v30 = vadd.s32 4294967294, %v1793_v21  ;;  %v1988_v60 = vmul.u32 %v1981_v55, %v1972_v10  ;;  %vm1990_vm12 = vc.u32 %v6096_v16, %v6088_v27 }
 0x241   : > { %v1841_v24 = vsel %vm1840_vm9, %v1839_v9, 0  ;;  %4703 = vsinq.f32 %v1501_v20  ;;  %v6115_v38 = vadd.s32 3, %v1710_v22  ;;  %v1992_v14 = vsel %vm1990_vm12, %v1991_v40, %v6089_v29 }
 0x242   : > { %v1843_v31 = vand.u32 31, %v1841_v24  ;;  %v8293_v18 = vand.u32 2147483647, %v5381_v39  ;;  %v1781_v59 = vadd.s32 %v6026_v17, %v6037_v0  ;;  %vm4346_vm4 = vcmp.lt.s32.totalorder %v4345_v30, 0 }
 0x243   : > { %8292 = vst [vmem:[#allocation34_spill] sm:$0xff] %v6115_v38  ;;  %v1993_v55 = vadd.s32 %v1992_v14, %v1988_v60  ;;  %4705 = vcosq.f32 %v6109_v43  ;;  %v1796_v51 = vsel %vm4346_vm4, 0, %v4345_v30  ;;  %v6131_v46 = vsel %vm1727_vm6, %v1811_v47, %v6061_v52 }
 0x244   : > { %vm6120_vm15 = vcmp.le.f32.partialorder %v8293_v18, 0.7853982  ;;  %v1844_v62 = vsub.s32 32, %v1843_v31  ;;  %v1797_v3 = vsub.s32 32, %v1796_v51  ;;  %v1801_v20 = vsub.s32 4294967266, %v1796_v51 }
 0x245   : > { %v1994_v58 = vadd.s32 536870912, %v1993_v55  ;;  %v1837_v29 = vor.u32 8388608, %v1836_v2  ;;  %v1846_v7 = vshll.u32 %v8245_v12, %v1843_v31  ;;  %v2040_v19 = vand.u32 2139095040, %v5652_v54 }
 0x246   : > { %v1847_v17 = vshrl.u32 %v8246_v45, %v1844_v62  ;;  %v1850_v0 = vshrl.u32 %v8247_v63, %v1844_v62  ;;  %v1799_v37 = vshrl.u32 %v1781_v59, %v1797_v3  ;;  %v1802_v10 = vadd.s32 127, %v1801_v20  ;;  %v6140_v22 = vpop.eup %4699 }
 0x247   : > { %v6137_v9 = vshrl.u32 %v1994_v58, 30  ;;  %v1853_v52 = vshrl.u32 %v8248_v50, %v1844_v62  ;;  %8296 = vst [vmem:[#allocation35_spill] sm:$0xff] %v6140_v22  ;;  %v1798_v21 = vshll.u32 %v6079_v48, %v1796_v51  ;;  %v1842_v47 = vshrl.u32 %v1841_v24, 5 }
 0x248   : > { %v1849_v2 = vshll.u32 %v8246_v45, %v1843_v31  ;;  %v1856_v40 = vshrl.u32 %v8238_v36, %v1844_v62  ;;  %v6145_v30 = vpop.eup %4701  ;;  %v1803_v60 = vshll.u32 %v1802_v10, 23  ;;  %v1848_v18 = vor.u32 %v1847_v17, %v1846_v7 }
 0x249   : > { %v1996_v14 = vshll.u32 %v6137_v9, 30  ;;  %v1852_v59 = vshll.u32 %v8247_v63, %v1843_v31  ;;  %v1800_v3 = vor.u32 %v1799_v37, %v1798_v21  ;;  %v1855_v20 = vshll.u32 %v8248_v50, %v1843_v31 }
 0x24a   : > { %v1858_v58 = vshll.u32 %v8238_v36, %v1843_v31  ;;  %v1859_v48 = vshrl.u32 %v8239_v15, %v1844_v62  ;;  %v1804_v24 = vor.u32 4788187, %v1803_v60  ;;  %v1851_v8 = vor.u32 %v1850_v0, %v1849_v2 }
 0x24b   : > { %v6152_v51 = vsub.s32 %v1993_v55, %v1996_v14  ;;  %v1854_v56 = vor.u32 %v1853_v52, %v1852_v59  ;;  %v6154_v34 = vpop.eup %4703  ;;  %v1814_v7 = vsel %vm6120_vm15, 0, %v6131_v46  ;;  %v1857_v17 = vor.u32 %v1856_v40, %v1855_v20 }
 0x24c   : > { %v1860_v10 = vor.u32 %v1859_v48, %v1858_v58  ;;  %v2041_v37 = vshrl.u32 %v2040_v19, 23  ;;  %v1805_v21 = vand.u32 2147483647, %v1804_v24  ;;  %v1845_v31 = vshrl.u32 %v8245_v12, %v1844_v62 }
 0x24d   : > { %v1999_v11 = vsub.s32 0, %v6152_v51  ;;  %v1877_v22 = vshll.u32 %v1837_v29, 8  ;;  %v6161_v60 = vpop.eup %4705  ;;  %v1807_v55 = vcvt.s32.f32 %v1800_v3  ;;  %vm1861_vm13 = vcmp.lt.s32.totalorder %v1842_v47, 1 }
 0x24e   : > { %8297 = vst [vmem:[#allocation36_spill] sm:$0xff] %v6161_v60  ;;  %vm1863_vm2 = vcmp.lt.s32.totalorder %v1842_v47, 3  ;;  %vm1864_vm10 = vcmp.lt.s32.totalorder %v1842_v47, 4  ;;  %vm1935_vm14 = vcmp.lt.s32.totalorder %v5478_v5, 0  ;;  %v1869_v52 = vsel %vm1861_vm13, %v1848_v18, %v1851_v8 }
 0x24f   : > { %v4352_v0 = vmin.u32 %v1999_v11, %v6152_v51  ;;  %v1866_v46 = vsel %vm1864_vm10, %v1854_v56, 2102212464  ;;  %v1873_v2 = vsel %vm1861_vm13, %v1851_v8, %v1854_v56  ;;  %v1808_v19 = vmul.f32 %v1807_v55, %v1805_v21 }
 0x250   : > { %v1870_v40 = vsel %vm1864_vm10, %v1857_v17, 920167782  ;;  %v1874_v14 = vsel %vm1864_vm10, %v1860_v10, 1326507024  ;;  %v4355_v59 = vadd.s32 4294967169, %v2041_v37  ;;  %vm1862_vm5 = vcmp.lt.s32.totalorder %v1842_v47, 2 }
 0x251   : > { %v2001_v20 = vclz %v4352_v0  ;;  %v1865_v62 = vsel %vm1861_vm13, %v1845_v31, %v1848_v18  ;;  %v1871_v29 = vsel %vm1863_vm2, %v1854_v56, %v1870_v40  ;;  %v1867_v3 = vsel %vm1863_vm2, %v1851_v8, %v1866_v46 }
 0x252   : > { %v1872_v58 = vsel %vm1862_vm5, %v1869_v52, %v1871_v29  ;;  %v1875_v48 = vsel %vm1863_vm2, %v1857_v17, %v1874_v14  ;;  %v2047_v24 = vadd.s32 1, %v4355_v59  ;;  %v2019_v11 = vsub.s32 4, %v6137_v9 }
 0x253   : > { %v4353_v60 = vadd.s32 4294967294, %v2001_v20  ;;  %v1876_v38 = vsel %vm1862_vm5, %v1873_v2, %v1875_v48  ;;  %v8298_v21 = vand.u32 2147483647, %v5652_v54  ;;  %v1809_v10 = vxor.u32 2147483648, %v1808_v19 }
 0x254   : > { %v6171_v37 = vmul.u32.u64.low %v1877_v22, %v1876_v38  ;;  %v6172_v0 = vmul.u32.u64.high %v1877_v22, %v1876_v38, %v6171_v37  ;;  %vm2048_vm3 = vcmp.gt.s32.totalorder %v2047_v24, 0  ;;  %v1868_v56 = vsel %vm1862_vm5, %v1865_v62, %v1867_v3 }
 0x255   : > { %v2044_v55 = vand.u32 8388607, %v8298_v21  ;;  %vm4354_vm7 = vcmp.lt.s32.totalorder %v4353_v60, 0  ;;  %v6174_v18 = vmul.u32.u64.low %v1877_v22, %v1872_v58  ;;  %v6175_v8 = vmul.u32.u64.high %v1877_v22, %v1872_v58, %v6174_v18 }
 0x256   : > { %4707 = vsinq.f32 %v6109_v43  ;;  %v6179_v47 = vadd.s32 3, %v1814_v7  ;;  %v2004_v17 = vsel %vm4354_vm7, 0, %v4353_v60  ;;  %v2049_v31 = vsel %vm2048_vm3, %v2047_v24, 0 }
 0x257   : > { %v8299_v46 = vand.u32 2147483647, %v5478_v5  ;;  %v1989_v38 = vadd.s32 %v6088_v27, %v6096_v16  ;;  %v2005_v2 = vsub.s32 32, %v2004_v17  ;;  %v2009_v40 = vsub.s32 4294967266, %v2004_v17 }
 0x258   : > { %v2045_v14 = vor.u32 8388608, %v2044_v55  ;;  %v6192_v43 = vsel %vm1935_vm14, %v2019_v11, %v6137_v9  ;;  %v1884_v7 = vmul.u32 %v1877_v22, %v1868_v56  ;;  %vm1886_vm1 = vc.u32 %v6172_v0, %v6174_v18 }
 0x259   : > { %vm6183_vm8 = vcmp.le.f32.partialorder %v8299_v46, 0.7853982  ;;  %v2051_v60 = vand.u32 31, %v2049_v31  ;;  %v1810_v59 = vsel %vm1727_vm6, %v1809_v10, %v1808_v19  ;;  %v2007_v20 = vshrl.u32 %v1989_v38, %v2005_v2 }
 0x25a   : > { %v2010_v62 = vadd.s32 127, %v2009_v40  ;;  %v1887_v27 = vadd.s32 1, %v6175_v8  ;;  %v2006_v16 = vshll.u32 %v6152_v51, %v2004_v17  ;;  %v6200_v29 = vshrl.u32 %v2049_v31, 5 }
 0x25b   : > { %v2052_v3 = vsub.s32 32, %v2051_v60  ;;  %v2054_v9 = vshll.u32 %v8245_v12, %v2051_v60  ;;  %v2057_v48 = vshll.u32 %v8246_v45, %v2051_v60  ;;  %v2060_v24 = vshll.u32 %v8247_v63, %v2051_v60 }
 0x25c   : > { %v2011_v58 = vshll.u32 %v2010_v62, 23  ;;  %v1888_v22 = vsel %vm1886_vm1, %v1887_v27, %v6175_v8  ;;  %v2008_v11 = vor.u32 %v2007_v20, %v2006_v16  ;;  %v2063_v37 = vshll.u32 %v8248_v50, %v2051_v60 }
 0x25d   : > { %v1889_v19 = vadd.s32 %v1888_v22, %v1884_v7  ;;  %v2055_v21 = vshrl.u32 %v8246_v45, %v2052_v3  ;;  %v2058_v55 = vshrl.u32 %v8247_v63, %v2052_v3  ;;  %v2061_v51 = vshrl.u32 %v8248_v50, %v2052_v3 }
 0x25e   : > { %v2012_v10 = vor.u32 4788187, %v2011_v58  ;;  %v2064_v56 = vshrl.u32 %v8238_v36, %v2052_v3  ;;  %v2066_v46 = vshll.u32 %v8238_v36, %v2051_v60  ;;  %v2067_v7 = vshrl.u32 %v8239_v15, %v2052_v3 }
 0x25f   : > { %v1890_v17 = vadd.s32 536870912, %v1889_v19  ;;  %v2056_v31 = vor.u32 %v2055_v21, %v2054_v9  ;;  %v2059_v8 = vor.u32 %v2058_v55, %v2057_v48  ;;  %v2062_v2 = vor.u32 %v2061_v51, %v2060_v24 }
 0x260   : > { %v2013_v38 = vand.u32 2147483647, %v2012_v10  ;;  %v2065_v40 = vor.u32 %v2064_v56, %v2063_v37  ;;  %vm677_vm11 = vcmp.eq.s32.totalorder %v5460_v53, 0  ;;  %v6214_v20 = vpop.eup %4707  ;;  %v2015_v62 = vcvt.s32.f32 %v2008_v11  ;;  %v8302_v56 = vld [vmem:[#allocation10_spill] sm:$0xff] }
 0x261   : > { %v2022_v27 = vsel %vm6183_vm8, 0, %v6192_v43  ;;  %v1891_v16 = vshrl.u32 %v1890_v17, 30  ;;  %v6219_v58 = vshll.u32 %v2045_v14, 8  ;;  %v6224_v60 = vsel %vm6120_vm15, %v5381_v39, %v1810_v59 }
 0x262   : > { %vm1831_vm0 = vcmp.lt.s32.totalorder %v5555_v28, 0  ;;  %v2053_v9 = vshrl.u32 %v8245_v12, %v2052_v3  ;;  %v2068_v22 = vor.u32 %v2067_v7, %v2066_v46  ;;  %vm2069_vm6 = vcmp.lt.s32.totalorder %v6200_v29, 1 }
 0x263   : > { %v2016_v48 = vmul.f32 %v2015_v62, %v2013_v38  ;;  %v1892_v24 = vshll.u32 %v1891_v16, 30  ;;  %vm2071_vm9 = vcmp.lt.s32.totalorder %v6200_v29, 3  ;;  %vm2072_vm12 = vcmp.lt.s32.totalorder %v6200_v29, 4 }
 0x264   : > { %v2074_v14 = vsel %vm2072_vm12, %v2062_v2, 2102212464  ;;  %v2077_v43 = vsel %vm2069_vm6, %v2056_v31, %v2059_v8  ;;  %v2078_v35 = vsel %vm2072_vm12, %v2065_v40, 920167782  ;;  %v2081_v59 = vsel %vm2069_vm6, %v2059_v8, %v2062_v2 }
 0x265   : > { %vm676_vm15 = vcmp.lt.s32.totalorder %v5460_v53, 2  ;;  %v6236_v3 = vsub.s32 %v1889_v19, %v1892_v24  ;;  %v2079_v11 = vsel %vm2071_vm9, %v2062_v2, %v2078_v35  ;;  %v2082_v21 = vsel %vm2072_vm12, %v2068_v22, 1326507024 }
 0x266   : > { %v678_v55 = vxor.u32 2147483648, %v5581_v49  ;;  %v1915_v10 = vsub.s32 4, %v1891_v16  ;;  %vm2070_vm4 = vcmp.lt.s32.totalorder %v6200_v29, 2  ;;  %v2073_v51 = vsel %vm2069_vm6, %v2053_v9, %v2056_v31 }
 0x267   : > { %v2083_v37 = vsel %vm2071_vm9, %v2065_v40, %v2082_v21  ;;  %vm673_vm13 = vweird.f32 %v8302_v56  ;;  %v1895_v19 = vsub.s32 0, %v6236_v3  ;;  %v2075_v17 = vsel %vm2071_vm9, %v2059_v8, %v2074_v14 }
 0x268   : > { %v2080_v46 = vsel %vm2070_vm4, %v2077_v43, %v2079_v11  ;;  %v2084_v38 = vsel %vm2070_vm4, %v2081_v59, %v2083_v37  ;;  %v2017_v2 = vxor.u32 2147483648, %v2016_v48  ;;  %v6250_v7 = vadd.s32 3, %v2022_v27 }
 0x269   : > { %v6253_v62 = vmul.u32.u64.low %v6219_v58, %v2084_v38  ;;  %v6254_v22 = vmul.u32.u64.high %v6219_v58, %v2084_v38, %v6253_v62  ;;  %4709 = vcosq.f32 %v6224_v60  ;;  %v1885_v31 = vadd.s32 %v6174_v18, %v6172_v0 }
 0x26a   : > { %v4348_v40 = vmin.u32 %v1895_v19, %v6236_v3  ;;  %v679_v29 = vsel %vm677_vm11, %v5572_v1, %v678_v55  ;;  %v2076_v8 = vsel %vm2070_vm4, %v2073_v51, %v2075_v17  ;;  %v681_v24 = vxor.u32 2147483648, %v5572_v1 }
 0x26b   : > { %v6264_v9 = vmul.u32.u64.low %v6219_v58, %v2080_v46  ;;  %v6265_v27 = vmul.u32.u64.high %v6219_v58, %v2080_v46, %v6264_v9  ;;  %v8303_v14 = vand.u32 2147483647, %v5555_v28  ;;  %v6277_v18 = vsel %vm1831_vm0, %v1915_v10, %v1891_v16  ;;  %v8306_v46 = vld [vmem:[#allocation21_spill] sm:$0xff] }
 0x26c   : > { %v1897_v0 = vclz %v4348_v40  ;;  %vm680_vm10 = vcmp.eq.s32.totalorder %v5460_v53, 2  ;;  %v1094_v35 = vxor.u32 2147483648, %v5953_v4  ;;  %v6283_v59 = vsel %vm1935_vm14, %v2017_v2, %v2016_v48 }
 0x26d   : > { %vm6271_vm2 = vcmp.le.f32.partialorder %v8303_v14, 0.7853982  ;;  %vm2094_vm5 = vc.u32 %v6254_v22, %v6264_v9  ;;  %v682_v1 = vsel %vm680_vm10, %v681_v24, %v5581_v49  ;;  %vm1093_vm3 = vcmp.eq.s32.totalorder %v5794_v57, 0 }
 0x26e   : > { %v4349_v11 = vadd.s32 4294967294, %v1897_v0  ;;  %v683_v16 = vsel %vm676_vm15, %v679_v29, %v682_v1  ;;  %v1095_v21 = vsel %vm1093_vm3, %v5944_v42, %v1094_v35  ;;  %v1097_v55 = vxor.u32 2147483648, %v5944_v42 }
 0x26f   : > { %v2092_v10 = vmul.u32 %v6219_v58, %v2076_v8  ;;  %v2095_v48 = vadd.s32 1, %v6265_v27  ;;  %vm1089_vm14 = vweird.f32 %v5078_v32  ;;  %vm1096_vm7 = vcmp.eq.s32.totalorder %v5794_v57, 2 }
 0x270   : > { %vm4350_vm1 = vcmp.lt.s32.totalorder %v4349_v11, 0  ;;  %v684_v49 = vsel %vm673_vm13, nan, %v683_v16  ;;  %vm1092_vm11 = vcmp.lt.s32.totalorder %v5794_v57, 2  ;;  %v1098_v53 = vsel %vm1096_vm7, %v1097_v55, %v5953_v4  ;;  %v8307_v57 = vld [vmem:[#allocation25_spill] sm:$0xff] }
 0x271   : > { %v1900_v51 = vsel %vm4350_vm1, 0, %v4349_v11  ;;  %v2096_v42 = vsel %vm2094_vm5, %v2095_v48, %v6265_v27  ;;  %v1099_v58 = vsel %vm1092_vm11, %v1095_v21, %v1098_v53  ;;  %v886_v37 = vxor.u32 2147483648, %v5677_v25  ;;  %v8311_v53 = vld [vmem:[#allocation12_spill] sm:$0xff] }
 0x272   : > { %v1901_v32 = vsub.s32 32, %v1900_v51  ;;  %v1905_v19 = vsub.s32 4294967266, %v1900_v51  ;;  %v2097_v17 = vadd.s32 %v2096_v42, %v2092_v10  ;;  %vm885_vm6 = vcmp.eq.s32.totalorder %v8306_v46, 0  ;;  %v8309_v10 = vld [vmem:[#allocation19_spill] sm:$0xff] }
 0x273   : > { %v1902_v56 = vshll.u32 %v6236_v3, %v1900_v51  ;;  %v1100_v38 = vsel %vm1089_vm14, nan, %v1099_v58  ;;  %vm888_vm9 = vcmp.eq.s32.totalorder %v8306_v46, 2  ;;  %v889_v4 = vxor.u32 2147483648, %v8307_v57  ;;  %v6310_v2 = vpop.eup %4709 }
 0x274   : > { %v1903_v62 = vshrl.u32 %v1885_v31, %v1901_v32  ;;  %v1906_v40 = vadd.s32 127, %v1905_v19  ;;  %v2098_v29 = vadd.s32 536870912, %v2097_v17  ;;  %v4439_v8 = vpack.c.bf16 %v1100_v38, %v684_v49  ;;  %v8308_v31 = vld [vmem:[#allocation11_spill] sm:$0xff]  ;;  %v8310_v49 = vld [vmem:[#allocation8_spill] sm:$0xff] }
 0x275   : > { %v1918_v27 = vsel %vm6271_vm2, 0, %v6277_v18  ;;  %v887_v24 = vsel %vm885_vm6, %v8307_v57, %v886_v37  ;;  %v890_v14 = vsel %vm888_vm9, %v889_v4, %v5677_v25  ;;  %v1302_v3 = vxor.u32 2147483648, %v5986_v13  ;;  %v8314_v57 = vld [vmem:[#allocation27_spill] sm:$0xff] }
 0x276   : > { %v1904_v0 = vor.u32 %v1903_v62, %v1902_v56  ;;  %v1907_v35 = vshll.u32 %v1906_v40, 23  ;;  %v6318_v1 = vshrl.u32 %v2098_v29, 30  ;;  %4440 = vmatprep.subr.bf16.mxu0 %v4439_v8  ;;  %vm1301_vm12 = vcmp.eq.s32.totalorder %v5796_v41, 0  ;;  %v8313_v56 = vld [vmem:[#allocation18_spill] sm:$0xff]  ;;  %v8315_v62 = vld [vmem:[#allocation23_spill] sm:$0xff] }
 0x277   : > { %vm881_vm15 = vweird.f32 %v8308_v31  ;;  %vm884_vm4 = vcmp.lt.s32.totalorder %v8306_v46, 2  ;;  %v1303_v11 = vsel %vm1301_vm12, %v5978_v6, %v1302_v3  ;;  %v1305_v18 = vxor.u32 2147483648, %v5978_v6  ;;  %v8312_v46 = vld [vmem:[#allocation16_spill] sm:$0xff]  ;;  %v8316_v29 = vld [vmem:[#allocation26_spill] sm:$0xff] }
 0x278   : > { %v1908_v16 = vor.u32 4788187, %v1907_v35  ;;  %v2100_v25 = vshll.u32 %v6318_v1, 30  ;;  %v891_v21 = vsel %vm884_vm4, %v887_v24, %v890_v14  ;;  %vm1304_vm13 = vcmp.eq.s32.totalorder %v5796_v41, 2  ;;  %v8317_v31 = vld [vmem:[#allocation22_spill] sm:$0xff] }
 0x279   : > { %vm1297_vm10 = vweird.f32 %v5080_v33  ;;  %vm1300_vm5 = vcmp.lt.s32.totalorder %v5796_v41, 2  ;;  %v1306_v55 = vsel %vm1304_vm13, %v1305_v18, %v5986_v13  ;;  %v574_v48 = vxor.u32 2147483648, %v8309_v10  ;;  %v8318_v18 = vld [vmem:[#allocation9_spill] sm:$0xff] }
 0x27a   : > { %vm569_vm3 = vweird.f32 %v8310_v49  ;;  %vm985_vm14 = vweird.f32 %v8311_v53  ;;  %v1909_v51 = vand.u32 2147483647, %v1908_v16  ;;  %v1911_v6 = vcvt.s32.f32 %v1904_v0 }
 0x27b   : > { %v6333_v42 = vsub.s32 %v2097_v17, %v2100_v25  ;;  %v1307_v58 = vsel %vm1300_vm5, %v1303_v11, %v1306_v55  ;;  %4711 = vsinq.f32 %v6224_v60  ;;  %v6340_v33 = vsel %vm6183_vm8, %v5478_v5, %v6283_v59 }
 0x27c   : > { %v892_v41 = vsel %vm881_vm15, nan, %v891_v21  ;;  %v1308_v13 = vsel %vm1297_vm10, nan, %v1307_v58  ;;  %v1912_v37 = vmul.f32 %v1911_v6, %v1909_v51  ;;  %vm573_vm7 = vcmp.eq.s32.totalorder %v8312_v46, 0  ;;  %v8320_v6 = vld [vmem:[#allocation17_spill] sm:$0xff] }
 0x27d   : > { %v2103_v32 = vsub.s32 0, %v6333_v42  ;;  %v4447_v19 = vpack.c.bf16 %v1308_v13, %v892_v41  ;;  %v1922_v17 = vadd.s32 3, %v1918_v27  ;;  %v575_v38 = vsel %vm573_vm7, %v8313_v56, %v574_v48 }
 0x27e   : > { %v577_v60 = vxor.u32 2147483648, %v8313_v56  ;;  %v990_v4 = vxor.u32 2147483648, %v8314_v57  ;;  %v1913_v52 = vxor.u32 2147483648, %v1912_v37  ;;  %vm576_vm8 = vcmp.eq.s32.totalorder %v8312_v46, 2 }
 0x27f   : > { %v4356_v59 = vmin.u32 %v2103_v32, %v6333_v42  ;;  %4448 = vmatprep.subr.bf16.mxu1 %v4447_v19  ;;  %vm989_vm1 = vcmp.eq.s32.totalorder %v8315_v62, 0  ;;  %vm572_vm11 = vcmp.lt.s32.totalorder %v8312_v46, 2  ;;  %v993_v27 = vxor.u32 2147483648, %v8316_v29  ;;  %v8321_v32 = vld [vmem:[#allocation24_spill] sm:$0xff] }
 0x280   : > { %v578_v40 = vsel %vm576_vm8, %v577_v60, %v8309_v10  ;;  %v991_v8 = vsel %vm989_vm1, %v8316_v29, %v990_v4  ;;  %v1914_v24 = vsel %vm1831_vm0, %v1913_v52, %v1912_v37  ;;  %vm992_vm6 = vcmp.eq.s32.totalorder %v8315_v62, 2  ;;  %v8319_v10 = vld [vmem:[#allocation20_spill] sm:$0xff] }
 0x281   : > { %v2105_v14 = vclz %v4356_v59  ;;  %v579_v3 = vsel %vm572_vm11, %v575_v38, %v578_v40  ;;  %v1917_v0 = vsel %vm6271_vm2, %v5555_v28, %v1914_v24  ;;  %vm988_vm9 = vcmp.lt.s32.totalorder %v8315_v62, 2  ;;  %v8322_v19 = vld [vmem:[#allocation28_spill] sm:$0xff] }
 0x282   : > { %v994_v35 = vsel %vm992_vm6, %v993_v27, %v8314_v57  ;;  %v782_v11 = vxor.u32 2147483648, %v8317_v31  ;;  %vm777_vm12 = vweird.f32 %v8318_v18  ;;  %vm1193_vm15 = vweird.f32 %v5076_v26 }
 0x283   : > { %4713 = vcosq.f32 %v1917_v0  ;;  %v2093_v16 = vadd.s32 %v6264_v9, %v6254_v22  ;;  %v4357_v25 = vadd.s32 4294967294, %v2105_v14  ;;  %v995_v21 = vsel %vm988_vm9, %v991_v8, %v994_v35 }
 0x284   : > { %4715 = vsinq.f32 %v1917_v0  ;;  %v580_v43 = vsel %vm569_vm3, nan, %v579_v3  ;;  %v996_v55 = vsel %vm985_vm14, nan, %v995_v21  ;;  %v785_v48 = vxor.u32 2147483648, %v8319_v10 }
 0x285   : > { %vm2039_vm0 = vcmp.lt.s32.totalorder %v5652_v54, 0  ;;  %vm4358_vm2 = vcmp.lt.s32.totalorder %v4357_v25, 0  ;;  %v4441_v51 = vpack.c.bf16 %v996_v55, %v580_v43  ;;  %vm781_vm4 = vcmp.eq.s32.totalorder %v8320_v6, 0  ;;  %v6377_v22 = vpop.eup %4711  ;;  %v8326_v55 = vld [vmem:[#allocation13_spill] sm:$0xff] }
 0x286   : > { %vm784_vm13 = vcmp.eq.s32.totalorder %v8320_v6, 2  ;;  %v2108_v9 = vsel %vm4358_vm2, 0, %v4357_v25  ;;  %v783_v58 = vsel %vm781_vm4, %v8319_v10, %v782_v11  ;;  %v1198_v53 = vxor.u32 2147483648, %v5836_v61 }
 0x287   : > { %v786_v49 = vsel %vm784_vm13, %v785_v48, %v8317_v31  ;;  %v2109_v41 = vsub.s32 32, %v2108_v9  ;;  %v2113_v13 = vsub.s32 4294967266, %v2108_v9  ;;  %v2123_v37 = vsub.s32 4, %v6318_v1  ;;  %4442 = vmatpush1.bf16.msra.mxu0 %v4441_v51 }
 0x288   : > { %vm1197_vm10 = vcmp.eq.s32.totalorder %v8321_v32, 0  ;;  %vm780_vm5 = vcmp.lt.s32.totalorder %v8320_v6, 2  ;;  %vm1200_vm3 = vcmp.eq.s32.totalorder %v8321_v32, 2  ;;  %v1201_v56 = vxor.u32 2147483648, %v8322_v19  ;;  %v8327_v6 = vld [vmem:[#allocation34_spill] sm:$0xff] }
 0x289   : > { %v1199_v46 = vsel %vm1197_vm10, %v8322_v19, %v1198_v53  ;;  %v2110_v38 = vshll.u32 %v6333_v42, %v2108_v9  ;;  %v2111_v60 = vshrl.u32 %v2093_v16, %v2109_v41  ;;  %v2114_v57 = vadd.s32 127, %v2113_v13  ;;  %v8328_v13 = vld [vmem:[#allocation32_spill] sm:$0xff]  ;;  %v8329_v19 = vld [vmem:[#allocation29_spill] sm:$0xff] }
 0x28a   : > { %v787_v4 = vsel %vm780_vm5, %v783_v58, %v786_v49  ;;  %vm1196_vm14 = vcmp.lt.s32.totalorder %v8321_v32, 2  ;;  %v1202_v52 = vsel %vm1200_vm3, %v1201_v56, %v5836_v61  ;;  %v1510_v59 = vxor.u32 2147483648, %v6154_v34 }
 0x28b   : > { %v1513_v62 = vxor.u32 2147483648, %v6145_v30  ;;  %v1923_v40 = vand.u32 3, %v1922_v17  ;;  %v2112_v29 = vor.u32 %v2111_v60, %v2110_v38  ;;  %v2115_v8 = vshll.u32 %v2114_v57, 23  ;;  %v8331_v60 = vld [vmem:[#allocation14_spill] sm:$0xff] }
 0x28c   : > { %v1203_v27 = vsel %vm1196_vm14, %v1199_v46, %v1202_v52  ;;  %v788_v24 = vsel %vm777_vm12, nan, %v787_v4  ;;  %vm1509_vm7 = vcmp.eq.s32.totalorder %v6099_v44, 0  ;;  %vm1512_vm8 = vcmp.eq.s32.totalorder %v6099_v44, 2 }
 0x28d   : > { %v1204_v42 = vsel %vm1193_vm15, nan, %v1203_v27  ;;  %v4714_v14 = vpop.eup %4713  ;;  %v2116_v61 = vor.u32 4788187, %v2115_v8  ;;  %v1511_v0 = vsel %vm1509_vm7, %v6145_v30, %v1510_v59  ;;  %v1514_v17 = vsel %vm1512_vm8, %v1513_v62, %v6154_v34  ;;  %v8332_v62 = vld [vmem:[#allocation35_spill] sm:$0xff]  ;;  %v8333_v27 = vld [vmem:[#allocation30_spill] sm:$0xff] }
 0x28e   : > { %v4449_v3 = vpack.c.bf16 %v1204_v42, %v788_v24  ;;  %v4716_v35 = vpop.eup %4715  ;;  %4717 = vsinq.f32 %v6340_v33  ;;  %v2124_v31 = vsel %vm2039_vm0, %v2123_v37, %v6318_v1  ;;  %vm1508_vm1 = vcmp.lt.s32.totalorder %v6099_v44, 2  ;;  %v8334_v24 = vld [vmem:[#allocation33_spill] sm:$0xff] }
 0x28f   : > { %v1929_v26 = vxor.u32 2147483648, %v4714_v14  ;;  %v2117_v11 = vand.u32 2147483647, %v2116_v61  ;;  %v2119_v18 = vcvt.s32.f32 %v2112_v29  ;;  %v1926_v16 = vxor.u32 2147483648, %v4716_v35 }
 0x290   : > { %4450 = vmatpush1.bf16.msra.mxu1 %v4449_v3  ;;  %vm1928_vm11 = vcmp.eq.s32.totalorder %v1923_v40, 2  ;;  %4719 = vcosq.f32 %v6340_v33  ;;  %v1515_v30 = vsel %vm1508_vm1, %v1511_v0, %v1514_v17  ;;  %vm1925_vm6 = vcmp.eq.s32.totalorder %v1923_v40, 0 }
 0x291   : > { %v1930_v34 = vsel %vm1928_vm11, %v1929_v26, %v4716_v35  ;;  %v8323_v25 = vand.u32 2147483647, %v5652_v54  ;;  %v2120_v1 = vmul.f32 %v2119_v18, %v2117_v11  ;;  %vm1924_vm12 = vcmp.lt.s32.totalorder %v1923_v40, 2  ;;  %v276_v11 = vld [vmem:[%s8104_s3] sm:$0xff] }
 0x292   : > { %v1927_v44 = vsel %vm1925_vm6, %v4714_v14, %v1926_v16  ;;  %vm1505_vm15 = vweird.f32 %v5223_v23  ;;  %vm1921_vm2 = vweird.f32 %v5555_v28  ;;  %vm1401_vm4 = vweird.f32 %v8326_v55  ;;  %v8335_v14 = vld [vmem:[#allocation36_spill] sm:$0xff] }
 0x293   : > { %vm6409_vm9 = vcmp.le.f32.partialorder %v8323_v25, 0.7853982  ;;  %v1931_v33 = vsel %vm1924_vm12, %v1927_v44, %v1930_v34  ;;  %vm1817_vm13 = vweird.f32 %v5381_v39  ;;  %v2121_v10 = vxor.u32 2147483648, %v2120_v1  ;;  %v278_v39 = vld [vmem:[%s8104_s3 + $0x10] sm:$0xff]  ;;  %v272_v25 = vld [vmem:[#allocation2] sm:$0xff] }
 0x294   : > { %v2126_v43 = vsel %vm6409_vm9, 0, %v2124_v31  ;;  %v1516_v48 = vsel %vm1505_vm15, nan, %v1515_v30  ;;  %v1932_v51 = vsel %vm1921_vm2, nan, %v1931_v33  ;;  %v6420_v9 = vand.u32 3, %v8327_v6 }
 0x295   : > { %v1819_v58 = vand.u32 3, %v6179_v47  ;;  %v2027_v49 = vand.u32 3, %v6250_v7  ;;  %v4443_v53 = vpack.c.bf16 %v1932_v51, %v1516_v48  ;;  %v2122_v23 = vsel %vm2039_vm0, %v2121_v10, %v2120_v1  ;;  %v8330_v47 = vld [vmem:[#allocation31_spill] sm:$0xff] }
 0x296   : > { %v2130_v28 = vadd.s32 3, %v2126_v43  ;;  %v1718_v41 = vxor.u32 2147483648, %v6214_v20  ;;  %v1406_v37 = vxor.u32 2147483648, %v8328_v13  ;;  %v2125_v32 = vsel %vm6409_vm9, %v5652_v54, %v2122_v23 }
 0x297   : > { %4444 = vmatprep.subr.bf16.mxu0 %v4443_v53  ;;  %vm1404_vm10 = vcmp.lt.s32.totalorder %v8329_v19, 2  ;;  %vm1405_vm5 = vcmp.eq.s32.totalorder %v8329_v19, 0  ;;  %v1409_v7 = vxor.u32 2147483648, %v8330_v47  ;;  %4721 = vcosq.f32 %v2125_v32  ;;  %v273_v53 = vld [vmem:[#allocation2 + $0x8] sm:$0xff] }
 0x298   : > { %v1407_v46 = vsel %vm1405_vm5, %v8330_v47, %v1406_v37  ;;  %vm1408_vm0 = vcmp.eq.s32.totalorder %v8329_v19, 2  ;;  %v1822_v56 = vxor.u32 2147483648, %v6377_v22  ;;  %v4718_v38 = vpop.eup %4717  ;;  %vm1609_vm3 = vweird.f32 %v8331_v60  ;;  %v8337_v37 = vld [vmem:[#allocation15_spill] sm:$0xff]  ;;  %v274_v47 = vld [vmem:[#allocation2 + $0x10] sm:$0xff] }
 0x299   : > { %4723 = vsinq.f32 %v2125_v32  ;;  %v1410_v57 = vsel %vm1408_vm0, %v1409_v7, %v8328_v13  ;;  %vm1821_vm14 = vcmp.eq.s32.totalorder %v1819_v58, 0  ;;  %v1825_v4 = vxor.u32 2147483648, %v6310_v2  ;;  %v281_v13 = vld [vmem:[%s8106_s5] sm:$0x7] }
 0x29a   : > { %v1411_v52 = vsel %vm1404_vm10, %v1407_v46, %v1410_v57  ;;  %v1823_v59 = vsel %vm1821_vm14, %v6310_v2, %v1822_v56  ;;  %vm1824_vm7 = vcmp.eq.s32.totalorder %v1819_v58, 2  ;;  %v1614_v40 = vxor.u32 2147483648, %v8332_v62  ;;  %v4720_v29 = vpop.eup %4719  ;;  %v275_v46 = vld [vmem:[#allocation2 + $0x18] sm:$0xff] }
 0x29b   : > { %vm1820_vm8 = vcmp.lt.s32.totalorder %v1819_v58, 2  ;;  %v1826_v8 = vsel %vm1824_vm7, %v1825_v4, %v6377_v22  ;;  %vm1613_vm1 = vcmp.eq.s32.totalorder %v8333_v27, 0  ;;  %v1617_v42 = vxor.u32 2147483648, %v8334_v24  ;;  %v279_v58 = vld [vmem:[%s8104_s3 + $0x18] sm:$0xff] }
 0x29c   : > { %v1721_v61 = vxor.u32 2147483648, %v8335_v14  ;;  %v1827_v3 = vsel %vm1820_vm8, %v1823_v59, %v1826_v8  ;;  %v1615_v0 = vsel %vm1613_vm1, %v8334_v24, %v1614_v40  ;;  %vm1616_vm11 = vcmp.eq.s32.totalorder %v8333_v27, 2 }
 0x29d   : > { %v1412_v2 = vsel %vm1401_vm4, nan, %v1411_v52  ;;  %v1828_v17 = vsel %vm1817_vm13, nan, %v1827_v3  ;;  %v1618_v35 = vsel %vm1616_vm11, %v1617_v42, %v8332_v62  ;;  %v2030_v22 = vxor.u32 2147483648, %v4718_v38 }
 0x29e   : > { %v4445_v31 = vpack.c.bf16 %v1828_v17, %v1412_v2  ;;  %vm1612_vm6 = vcmp.lt.s32.totalorder %v8333_v27, 2  ;;  %vm2029_vm9 = vcmp.eq.s32.totalorder %v2027_v49, 0  ;;  %v2033_v26 = vxor.u32 2147483648, %v4720_v29 }
 0x29f   : > { %v1619_v18 = vsel %vm1612_vm6, %v1615_v0, %v1618_v35  ;;  %v2031_v16 = vsel %vm2029_vm9, %v4720_v29, %v2030_v22  ;;  %vm2032_vm12 = vcmp.eq.s32.totalorder %v2027_v49, 2  ;;  %v2131_v30 = vand.u32 3, %v2130_v28 }
 0x2a0   : > { %4446 = vmatpush1.bf16.msra.mxu0 %v4445_v31  ;;  %vm2028_vm15 = vcmp.lt.s32.totalorder %v2027_v49, 2  ;;  %v2034_v34 = vsel %vm2032_vm12, %v2033_v26, %v4718_v38  ;;  %vm8206_vm2 = vcmask 261120   ;;  %v4903_v21 = vmov 0  }
 0x2a1   : > { %4659 = vset.pattern.permute.xlu0 %v4903_v21  ;;  %vm2025_vm4 = vweird.f32 %v5478_v5  ;;  %vm1717_vm13 = vcmp.eq.s32.totalorder %v6420_v9, 0  ;;  %vm1720_vm10 = vcmp.eq.s32.totalorder %v6420_v9, 2  ;;  %v2035_v1 = vsel %vm2028_vm15, %v2031_v16, %v2034_v34  ;;  %4660 = vset.pattern.permute.xlu1 %v4903_v21  ;;  %v4722_v44 = vpop.eup %4721  ;;  %v277_v5 = vld [vmem:[%s8104_s3 + $0x8] sm:$0xff] }
 0x2a2   : > { %2143 = vperm.xlu0 %4659, %v276_v11   ;;  %v1719_v43 = vsel %vm1717_vm13, %v8335_v14, %v1718_v41  ;;  %v1722_v33 = vsel %vm1720_vm10, %v1721_v61, %v6214_v20  ;;  %v1620_v55 = vsel %vm1609_vm3, nan, %v1619_v18  ;;  %v2036_v10 = vsel %vm2025_vm4, nan, %v2035_v1  ;;  %2153 = vperm.xlu1 %4660, %v278_v39  }
 0x2a3   : > { %v4724_v48 = vpop.eup %4723  ;;  %v2137_v51 = vxor.u32 2147483648, %v4722_v44  ;;  %v4453_v6 = vpack.c.bf16 %v2036_v10, %v1620_v55  ;;  %4359 = vmatmul.mubr.msk.f32.vlgmr.msra.gmra.mrb[8].mxu0 %vm8206_vm2, %v272_v25  ;;  %vm1716_vm5 = vcmp.lt.s32.totalorder %v6420_v9, 2  ;;  %vm2136_vm0 = vcmp.eq.s32.totalorder %v2131_v30, 2 }
 0x2a4   : > { %v2134_v20 = vxor.u32 2147483648, %v4724_v48  ;;  %v8336_v49 = vmov 0.0   ;;  %v1723_v23 = vsel %vm1716_vm5, %v1719_v43, %v1722_v33  ;;  %vm2133_vm3 = vcmp.eq.s32.totalorder %v2131_v30, 0 }
 0x2a5   : > { %2244 = vmatprep.mubr.f32.mxu0 %v8336_v49  ;;  %v2138_v28 = vsel %vm2136_vm0, %v2137_v51, %v4724_v48  ;;  %vm2132_vm14 = vcmp.lt.s32.totalorder %v2131_v30, 2  ;;  %vm1713_vm7 = vweird.f32 %v8337_v37  ;;  %vm2129_vm8 = vweird.f32 %v5652_v54 }
 0x2a6   : > { %2148 = vperm.xlu0 %4659, %v277_v5   ;;  %v2135_v41 = vsel %vm2133_vm3, %v4722_v44, %v2134_v20  ;;  %2158 = vperm.xlu1 %4660, %v279_v58   ;;  %v1724_v32 = vsel %vm1713_vm7, nan, %v1723_v23 }
 0x2a7   : > { %v2139_v9 = vsel %vm2132_vm14, %v2135_v41, %v2138_v28  ;;  %4360 = vmatmul.mubr.msk.f32.gmra.mrb[10].mxu0 %vm8206_vm2, %v273_v53 }
 0x2a8   : > { %v2140_v19 = vsel %vm2129_vm8, nan, %v2139_v9  ;;  %2250 = vmatprep.mubr.f32.mxu0 %v8336_v49 }
 0x2a9   : > { %v4451_v7 = vpack.c.bf16 %v2140_v19, %v1724_v32 }
 0x2aa   : > { %4018 = vperm.xlu0 %4659, %v281_v13  }
 0x2ab   : > { %4452 = vmatprep.subr.bf16.mxu1 %v4451_v7  ;;  %4361 = vmatmul.mubr.msk.f32.gmra.mrb[12].mxu0 %vm8206_vm2, %v274_v47 }
 0x2ac   : > { %4454 = vmatpush1.bf16.msra.mxu1 %v4453_v6  ;;  %2256 = vmatprep.mubr.f32.mxu0 %v8336_v49 }
 0x2af   : > { %4363 = vmatmul.mubr.msk.f32.vlgmr.msra.gmra.mrb[8].mxu1 %vm8206_vm2, %v272_v25  ;;  %4362 = vmatmul.mubr.msk.f32.gmra.mrb[14].mxu0 %vm8206_vm2, %v275_v46 }
 0x2b0   : > { %2333 = vmatprep.mubr.f32.mxu1 %v8336_v49  ;;  %4088 = vmatprep.mubr.f32.mxu0 %v8336_v49 }
 0x2b3   : > { %4364 = vmatmul.mubr.msk.f32.gmra.mrb[10].mxu1 %vm8206_vm2, %v273_v53 }
 0x2b4   : > { %2339 = vmatprep.mubr.f32.mxu1 %v8336_v49 }
 0x2b7   : > { %4365 = vmatmul.mubr.msk.f32.gmra.mrb[12].mxu1 %vm8206_vm2, %v274_v47 }
 0x2b8   : > { %2345 = vmatprep.mubr.f32.mxu1 %v8336_v49 }
 0x2bb   : > { %4366 = vmatmul.mubr.msk.f32.gmra.mrb[14].mxu1 %vm8206_vm2, %v275_v46 }
 0x2bc   : > { %4159 = vmatprep.mubr.f32.mxu1 %v8336_v49 }
 0x321   : > { %v6495_v54 = vpop.permute.xlu0 %2143 }
 0x325   : > { %v6511_v3 = vpop.permute.xlu0 %2148 }
 0x376   : > { %v2240_v56 = vpop.f32.mrb[8].mxu0 }
 0x377   : > { %v6498_v38 = vadd.f32 %v2240_v56, %v6495_v54  ;;  %v2242_v60 = vpop.f32.mrb[9].mxu0 }
 0x378   : > { %v6501_v57 = vadd.f32 %v2242_v60, %v6495_v54 }
 0x379   : > { %8338 = vst [vmem:[#allocation10_spill] sm:$0xff] %v6498_v38  ;;  %v2352_v4 = vand.u32 2147483647, %v6498_v38  ;;  %v2355_v52 = vand.u32 2139095040, %v6498_v38 }
 0x37a   : > { %v2459_v59 = vand.u32 2139095040, %v6501_v57  ;;  %v2246_v62 = vpop.f32.mrb[10].mxu0  ;;  %v8174_v8 = vand.u32 2147483647, %v6501_v57 }
 0x37b   : > { %v2356_v40 = vshrl.u32 %v2355_v52, 23  ;;  %v6506_v29 = vpop.f32.mrb[11].mxu0  ;;  %v2359_v42 = vand.u32 8388607, %v2352_v4  ;;  %v6518_v35 = vadd.f32 %v2246_v62, %v6511_v3 }
 0x37c   : > { %v2460_v27 = vshrl.u32 %v2459_v59, 23  ;;  %v6515_v0 = vand.u32 8388607, %v8174_v8 }
 0x37d   : > { %v4367_v24 = vadd.s32 4294967169, %v2356_v40  ;;  %v2360_v17 = vor.u32 8388608, %v2359_v42  ;;  %8339 = vst [vmem:[#allocation21_spill] sm:$0xff] %v6518_v35  ;;  %v2771_v21 = vand.u32 2139095040, %v6518_v35 }
 0x37e   : > { %v4371_v14 = vadd.s32 4294967169, %v2460_v27  ;;  %v2464_v39 = vor.u32 8388608, %v6515_v0  ;;  %v6543_v41 = vpop.f32.mrb[12].mxu0 }
 0x37f   : > { %v2362_v61 = vadd.s32 1, %v4367_v24  ;;  %v6523_v34 = vshll.u32 %v2360_v17, 8 }
 0x380   : > { %v2466_v2 = vadd.s32 1, %v4371_v14 }
 0x381   : > { %vm2363_vm1 = vcmp.gt.s32.totalorder %v2362_v61, 0 }
 0x382   : > { %v2364_v22 = vsel %vm2363_vm1, %v2362_v61, 0  ;;  %v2329_v31 = vpop.f32.mrb[8].mxu1  ;;  %vm2467_vm11 = vcmp.gt.s32.totalorder %v2466_v2, 0 }
 0x383   : > { %v2366_v26 = vand.u32 31, %v2364_v22  ;;  %v2468_v11 = vsel %vm2467_vm11, %v2466_v2, 0  ;;  %v6520_v18 = vpop.f32.mrb[9].mxu1  ;;  %v2365_v16 = vshrl.u32 %v2364_v22, 5  ;;  %v6526_v25 = vadd.f32 %v2329_v31, %v6495_v54 }
 0x384   : > { %v2470_v33 = vand.u32 31, %v2468_v11 }
 0x385   : > { %v2367_v30 = vsub.s32 32, %v2366_v26  ;;  %8340 = vst [vmem:[#allocation25_spill] sm:$0xff] %v6526_v25  ;;  %v2369_v1 = vshll.u32 %v8245_v12, %v2366_v26  ;;  %v2372_v44 = vshll.u32 %v8246_v45, %v2366_v26  ;;  %v2375_v43 = vshll.u32 %v8247_v63, %v2366_v26 }
 0x386   : > { %v6532_v55 = vpop.f32.mrb[10].mxu1  ;;  %v2378_v51 = vshll.u32 %v8248_v50, %v2366_v26  ;;  %v2381_v20 = vshll.u32 %v8238_v36, %v2366_v26  ;;  %vm2384_vm6 = vcmp.lt.s32.totalorder %v2365_v16, 1  ;;  %vm2387_vm9 = vcmp.lt.s32.totalorder %v2365_v16, 4 }
 0x387   : > { %v2370_v10 = vshrl.u32 %v8246_v45, %v2367_v30  ;;  %v2373_v5 = vshrl.u32 %v8247_v63, %v2367_v30  ;;  %v2376_v48 = vshrl.u32 %v8248_v50, %v2367_v30  ;;  %v6538_v6 = vpop.f32.mrb[11].mxu1  ;;  %v2379_v58 = vshrl.u32 %v8238_v36, %v2367_v30 }
 0x388   : > { %v2382_v49 = vshrl.u32 %v8239_v15, %v2367_v30  ;;  %v2560_v9 = vand.u32 2147483647, %v6526_v25  ;;  %v2563_v32 = vand.u32 2139095040, %v6526_v25  ;;  %v2368_v19 = vshrl.u32 %v8245_v12, %v2367_v30 }
 0x389   : > { %v2371_v53 = vor.u32 %v2370_v10, %v2369_v1  ;;  %v2374_v23 = vor.u32 %v2373_v5, %v2372_v44  ;;  %v2377_v28 = vor.u32 %v2376_v48, %v2375_v43  ;;  %v2380_v13 = vor.u32 %v2379_v58, %v2378_v51 }
 0x38a   : > { %v2383_v37 = vor.u32 %v2382_v49, %v2381_v20  ;;  %vm2385_vm12 = vcmp.lt.s32.totalorder %v2365_v16, 2  ;;  %vm2386_vm15 = vcmp.lt.s32.totalorder %v2365_v16, 3  ;;  %v2564_v40 = vshrl.u32 %v2563_v32, 23 }
 0x38b   : > { %v2389_v47 = vsel %vm2387_vm9, %v2377_v28, 2102212464  ;;  %v2392_v7 = vsel %vm2384_vm6, %v2371_v53, %v2374_v23  ;;  %v2396_v46 = vsel %vm2384_vm6, %v2374_v23, %v2377_v28  ;;  %v2393_v56 = vsel %vm2387_vm9, %v2380_v13, 920167782 }
 0x38c   : > { %v2397_v60 = vsel %vm2387_vm9, %v2383_v37, 1326507024  ;;  %v2388_v52 = vsel %vm2384_vm6, %v2368_v19, %v2371_v53  ;;  %v2394_v59 = vsel %vm2386_vm15, %v2377_v28, %v2393_v56  ;;  %v2390_v27 = vsel %vm2386_vm15, %v2374_v23, %v2389_v47 }
 0x38d   : > { %v2398_v62 = vsel %vm2386_vm15, %v2380_v13, %v2397_v60  ;;  %v2395_v24 = vsel %vm2385_vm12, %v2392_v7, %v2394_v59  ;;  %v2567_v14 = vand.u32 8388607, %v2560_v9  ;;  %v4375_v22 = vadd.s32 4294967169, %v2564_v40  ;;  %v6604_v59 = vpop.f32.mrb[12].mxu1 }
 0x38e   : > { %v2399_v42 = vsel %vm2385_vm12, %v2396_v46, %v2398_v62  ;;  %v6560_v2 = vmul.u32.u64.low %v6523_v34, %v2395_v24  ;;  %v6561_v17 = vmul.u32.u64.high %v6523_v34, %v2395_v24, %v6560_v2  ;;  %v6564_v31 = vsub.s32 32, %v2470_v33 }
 0x38f   : > { %v6556_v61 = vmul.u32.u64.low %v6523_v34, %v2399_v42  ;;  %v6557_v0 = vmul.u32.u64.high %v6523_v34, %v2399_v42, %v6556_v61  ;;  %v2391_v26 = vsel %vm2385_vm12, %v2388_v52, %v2390_v27  ;;  %v2570_v30 = vadd.s32 1, %v4375_v22 }
 0x390   : > { %v6567_v1 = vshrl.u32 %v2468_v11, 5  ;;  %v6569_v44 = vshll.u32 %v2464_v39, 8  ;;  %v6571_v43 = vshrl.u32 %v2771_v21, 23  ;;  %v2410_v10 = vadd.s32 1, %v6561_v17 }
 0x391   : > { %vm2409_vm4 = vc.u32 %v6557_v0, %v6560_v2  ;;  %v2568_v5 = vor.u32 8388608, %v2567_v14  ;;  %v2474_v48 = vshrl.u32 %v8246_v45, %v6564_v31  ;;  %v2407_v51 = vmul.u32 %v6523_v34, %v2391_v26 }
 0x392   : > { %vm2571_vm13 = vcmp.gt.s32.totalorder %v2570_v30, 0  ;;  %v2473_v16 = vshll.u32 %v8245_v12, %v2470_v33  ;;  %v2477_v11 = vshrl.u32 %v8247_v63, %v6564_v31  ;;  %v2411_v39 = vsel %vm2409_vm4, %v2410_v10, %v6561_v17 }
 0x393   : > { %v2572_v21 = vsel %vm2571_vm13, %v2570_v30, 0  ;;  %v2476_v58 = vshll.u32 %v8246_v45, %v2470_v33  ;;  %v2479_v20 = vshll.u32 %v8247_v63, %v2470_v33  ;;  %v2412_v49 = vadd.s32 %v2411_v39, %v2407_v51 }
 0x394   : > { %v2574_v53 = vand.u32 31, %v2572_v21  ;;  %v2482_v23 = vshll.u32 %v8248_v50, %v2470_v33  ;;  %v6587_v28 = vshll.u32 %v8238_v36, %v2470_v33  ;;  %v6589_v34 = vshll.u32 %v2568_v5, 8 }
 0x395   : > { %v6591_v13 = vor.u32 %v2474_v48, %v2473_v16  ;;  %v2480_v37 = vshrl.u32 %v8248_v50, %v6564_v31  ;;  %v2483_v32 = vshrl.u32 %v8238_v36, %v6564_v31  ;;  %v2413_v19 = vadd.s32 536870912, %v2412_v49 }
 0x396   : > { %v2575_v47 = vsub.s32 32, %v2574_v53  ;;  %v6597_v7 = vor.u32 %v2477_v11, %v2476_v58  ;;  %v2486_v46 = vshrl.u32 %v8239_v15, %v6564_v31  ;;  %v2573_v56 = vshrl.u32 %v2572_v21, 5 }
 0x397   : > { %v2577_v33 = vshll.u32 %v8245_v12, %v2574_v53  ;;  %v2580_v60 = vshll.u32 %v8246_v45, %v2574_v53  ;;  %v2583_v52 = vshll.u32 %v8247_v63, %v2574_v53  ;;  %v6606_v62 = vshrl.u32 %v2413_v19, 30 }
 0x398   : > { %v2578_v40 = vshrl.u32 %v8246_v45, %v2575_v47  ;;  %v2581_v27 = vshrl.u32 %v8247_v63, %v2575_v47  ;;  %v2586_v24 = vshll.u32 %v8248_v50, %v2574_v53  ;;  %v2584_v42 = vshrl.u32 %v8248_v50, %v2575_v47 }
 0x399   : > { %v2587_v14 = vshrl.u32 %v8238_v36, %v2575_v47  ;;  %v2589_v61 = vshll.u32 %v8238_v36, %v2574_v53  ;;  %v2590_v17 = vshrl.u32 %v8239_v15, %v2575_v47  ;;  %v2415_v22 = vshll.u32 %v6606_v62, 30 }
 0x39a   : > { %v2579_v26 = vor.u32 %v2578_v40, %v2577_v33  ;;  %v2582_v30 = vor.u32 %v2581_v27, %v2580_v60  ;;  %v2481_v10 = vor.u32 %v2480_v37, %v2479_v20  ;;  %v2585_v5 = vor.u32 %v2584_v42, %v2583_v52 }
 0x39b   : > { %v2588_v48 = vor.u32 %v2587_v14, %v2586_v24  ;;  %v2591_v51 = vor.u32 %v2590_v17, %v2589_v61  ;;  %vm2592_vm10 = vcmp.lt.s32.totalorder %v2573_v56, 1  ;;  %v6616_v16 = vsub.s32 %v2412_v49, %v2415_v22 }
 0x39c   : > { %v2576_v11 = vshrl.u32 %v8245_v12, %v2575_v47  ;;  %vm2593_vm5 = vcmp.lt.s32.totalorder %v2573_v56, 2  ;;  %vm2595_vm0 = vcmp.lt.s32.totalorder %v2573_v56, 4  ;;  %vm2594_vm3 = vcmp.lt.s32.totalorder %v2573_v56, 3 }
 0x39d   : > { %v2597_v39 = vsel %vm2595_vm0, %v2585_v5, 2102212464  ;;  %v2600_v21 = vsel %vm2592_vm10, %v2579_v26, %v2582_v30  ;;  %v2601_v58 = vsel %vm2595_vm0, %v2588_v48, 920167782  ;;  %v2418_v53 = vsub.s32 0, %v6616_v16 }
 0x39e   : > { %v2596_v19 = vsel %vm2592_vm10, %v2576_v11, %v2579_v26  ;;  %v2598_v33 = vsel %vm2594_vm3, %v2582_v30, %v2597_v39  ;;  %v2602_v60 = vsel %vm2594_vm3, %v2585_v5, %v2601_v58  ;;  %v2604_v37 = vsel %vm2592_vm10, %v2582_v30, %v2585_v5 }
 0x39f   : > { %v2603_v20 = vsel %vm2593_vm5, %v2600_v21, %v2602_v60  ;;  %v2605_v52 = vsel %vm2595_vm0, %v2591_v51, 1326507024  ;;  %v2484_v40 = vor.u32 %v2483_v32, %v2482_v23  ;;  %v4368_v49 = vmin.u32 %v2418_v53, %v6616_v16 }
 0x3a0   : > { %v2606_v27 = vsel %vm2594_vm3, %v2588_v48, %v2605_v52  ;;  %v6623_v47 = vmul.u32.u64.low %v6589_v34, %v2603_v20  ;;  %v6624_v24 = vmul.u32.u64.high %v6589_v34, %v2603_v20, %v6623_v47  ;;  %v2599_v42 = vsel %vm2593_vm5, %v2596_v19, %v2598_v33 }
 0x3a1   : > { %v2607_v14 = vsel %vm2593_vm5, %v2604_v37, %v2606_v27  ;;  %v2487_v61 = vor.u32 %v2486_v46, %v6587_v28  ;;  %vm2488_vm14 = vcmp.lt.s32.totalorder %v6567_v1, 1  ;;  %v2420_v17 = vclz %v4368_v49 }
 0x3a2   : > { %v6632_v22 = vmul.u32.u64.low %v6589_v34, %v2607_v14  ;;  %v6633_v23 = vmul.u32.u64.high %v6589_v34, %v2607_v14, %v6632_v22  ;;  %vm2491_vm7 = vcmp.lt.s32.totalorder %v6567_v1, 4  ;;  %v2472_v32 = vshrl.u32 %v8245_v12, %v6564_v31 }
 0x3a3   : > { %vm2490_vm8 = vcmp.lt.s32.totalorder %v6567_v1, 3  ;;  %v2496_v56 = vsel %vm2488_vm14, %v6591_v13, %v6597_v7  ;;  %v2497_v28 = vsel %vm2491_vm7, %v2484_v40, 920167782  ;;  %v4369_v46 = vadd.s32 4294967294, %v2420_v17 }
 0x3a4   : > { %v2618_v26 = vadd.s32 1, %v6624_v24  ;;  %v2498_v30 = vsel %vm2490_vm8, %v2481_v10, %v2497_v28  ;;  %v2500_v5 = vsel %vm2488_vm14, %v6597_v7, %v2481_v10  ;;  %v2615_v31 = vmul.u32 %v6589_v34, %v2599_v42 }
 0x3a5   : > { %vm2489_vm1 = vcmp.lt.s32.totalorder %v6567_v1, 2  ;;  %v2493_v48 = vsel %vm2491_vm7, %v2481_v10, 2102212464  ;;  %v2501_v51 = vsel %vm2491_vm7, %v2487_v61, 1326507024  ;;  %vm4370_vm11 = vcmp.lt.s32.totalorder %v4369_v46, 0 }
 0x3a6   : > { %vm2617_vm6 = vc.u32 %v6633_v23, %v6623_v47  ;;  %v2499_v11 = vsel %vm2489_vm1, %v2496_v56, %v2498_v30  ;;  %v2502_v39 = vsel %vm2490_vm8, %v2484_v40, %v2501_v51  ;;  %v2423_v21 = vsel %vm4370_vm11, 0, %v4369_v46 }
 0x3a7   : > { %v2619_v58 = vsel %vm2617_vm6, %v2618_v26, %v6624_v24  ;;  %v2503_v34 = vsel %vm2489_vm1, %v2500_v5, %v2502_v39  ;;  %v6662_v10 = vadd.f32 %v6520_v18, %v6495_v54  ;;  %v2428_v53 = vsub.s32 4294967266, %v2423_v21  ;;  %v6703_v5 = vpop.f32.mrb[13].mxu0 }
 0x3a8   : > { %v2620_v19 = vadd.s32 %v2619_v58, %v2615_v31  ;;  %v2492_v33 = vsel %vm2488_vm14, %v2472_v32, %v6591_v13  ;;  %v2494_v60 = vsel %vm2490_vm8, %v6597_v7, %v2493_v48  ;;  %v4383_v18 = vadd.s32 4294967169, %v6571_v43 }
 0x3a9   : > { %8341 = vst [vmem:[#allocation11_spill] sm:$0xff] %v6662_v10  ;;  %v6671_v20 = vmul.u32.u64.low %v6569_v44, %v2503_v34  ;;  %v6672_v37 = vmul.u32.u64.high %v6569_v44, %v2503_v34, %v6671_v20  ;;  %v6675_v52 = vmul.u32.u64.low %v6569_v44, %v2499_v11  ;;  %v6676_v40 = vmul.u32.u64.high %v6569_v44, %v2499_v11, %v6675_v52 }
 0x3aa   : > { %v2621_v54 = vadd.s32 536870912, %v2620_v19  ;;  %v2424_v49 = vsub.s32 32, %v2423_v21  ;;  %v2495_v27 = vsel %vm2489_vm1, %v2492_v33, %v2494_v60  ;;  %v2667_v13 = vand.u32 2139095040, %v6662_v10 }
 0x3ab   : > { %v8173_v24 = vand.u32 2147483647, %v6518_v35  ;;  %v2408_v7 = vadd.s32 %v6560_v2, %v6557_v0  ;;  %v2429_v14 = vadd.s32 127, %v2428_v53  ;;  %vm2513_vm9 = vc.u32 %v6672_v37, %v6675_v52 }
 0x3ac   : > { %v6685_v42 = vshrl.u32 %v2621_v54, 30  ;;  %v2514_v61 = vadd.s32 1, %v6676_v40  ;;  %v2668_v17 = vshrl.u32 %v2667_v13, 23  ;;  %v2511_v1 = vmul.u32 %v6569_v44, %v2495_v27 }
 0x3ad   : > { %v2778_v22 = vadd.s32 1, %v4383_v18  ;;  %v6693_v32 = vadd.f32 %v6506_v29, %v6511_v3  ;;  %v2426_v56 = vshrl.u32 %v2408_v7, %v2424_v49  ;;  %v6698_v28 = vand.u32 8388607, %v8173_v24 }
 0x3ae   : > { %v2623_v43 = vshll.u32 %v6685_v42, 30  ;;  %v2515_v0 = vsel %vm2513_vm9, %v2514_v61, %v6676_v40  ;;  %v4379_v2 = vadd.s32 4294967169, %v2668_v17  ;;  %v8172_v30 = vand.u32 2147483647, %v6662_v10 }
 0x3af   : > { %v2516_v26 = vadd.s32 %v2515_v0, %v2511_v1  ;;  %v2425_v44 = vshll.u32 %v6616_v16, %v2423_v21  ;;  %v2430_v31 = vshll.u32 %v2429_v14, 23  ;;  %vm2779_vm12 = vcmp.gt.s32.totalorder %v2778_v22, 0 }
 0x3b0   : > { %v6700_v46 = vsub.s32 %v2620_v19, %v2623_v43  ;;  %v2674_v29 = vadd.s32 1, %v4379_v2  ;;  %v8171_v11 = vand.u32 2147483647, %v6693_v32  ;;  %v2776_v58 = vor.u32 8388608, %v6698_v28 }
 0x3b1   : > { %v2517_v51 = vadd.s32 536870912, %v2516_v26  ;;  %v2427_v39 = vor.u32 %v2426_v56, %v2425_v44  ;;  %v2671_v19 = vand.u32 8388607, %v8172_v30  ;;  %v2431_v21 = vor.u32 4788187, %v2430_v31 }
 0x3b2   : > { %v2626_v48 = vsub.s32 0, %v6700_v46  ;;  %vm2675_vm15 = vcmp.gt.s32.totalorder %v2674_v29, 0  ;;  %v2780_v60 = vsel %vm2779_vm12, %v2778_v22, 0  ;;  %v2875_v20 = vand.u32 2139095040, %v6693_v32 }
 0x3b3   : > { %v6710_v53 = vshrl.u32 %v2517_v51, 30  ;;  %v2676_v16 = vsel %vm2675_vm15, %v2674_v29, 0  ;;  %v6719_v49 = vand.u32 8388607, %v8171_v11  ;;  %v2434_v27 = vcvt.s32.f32 %v2427_v39 }
 0x3b4   : > { %v4376_v34 = vmin.u32 %v2626_v48, %v6700_v46  ;;  %v2678_v33 = vand.u32 31, %v2676_v16  ;;  %v2616_v13 = vadd.s32 %v6623_v47, %v6633_v23  ;;  %v6724_v7 = vadd.s32 %v6675_v52, %v6672_v37 }
 0x3b5   : > { %v2519_v18 = vshll.u32 %v6710_v53, 30  ;;  %v2672_v43 = vor.u32 8388608, %v2671_v19  ;;  %v6728_v1 = vshrl.u32 %v2780_v60, 5  ;;  %v2432_v22 = vand.u32 2147483647, %v2431_v21 }
 0x3b6   : > { %v2628_v54 = vclz %v4376_v34  ;;  %v2679_v14 = vsub.s32 32, %v2678_v33  ;;  %v6730_v56 = vshrl.u32 %v2676_v16, 5  ;;  %v6733_v2 = vand.u32 31, %v2780_v60 }
 0x3b7   : > { %v6726_v17 = vsub.s32 %v2516_v26, %v2519_v18  ;;  %v2681_v26 = vshll.u32 %v8245_v12, %v2678_v33  ;;  %v2690_v44 = vshll.u32 %v8248_v50, %v2678_v33  ;;  %v2684_v51 = vshll.u32 %v8246_v45, %v2678_v33 }
 0x3b8   : > { %v4377_v61 = vadd.s32 4294967294, %v2628_v54  ;;  %v2682_v0 = vshrl.u32 %v8246_v45, %v2679_v14  ;;  %v2685_v23 = vshrl.u32 %v8247_v63, %v2679_v14  ;;  %v2688_v37 = vshrl.u32 %v8248_v50, %v2679_v14 }
 0x3b9   : > { %v2522_v47 = vsub.s32 0, %v6726_v17  ;;  %v2691_v31 = vshrl.u32 %v8238_v36, %v2679_v14  ;;  %v2687_v39 = vshll.u32 %v8247_v63, %v2678_v33  ;;  %v2693_v16 = vshll.u32 %v8238_v36, %v2678_v33 }
 0x3ba   : > { %vm4378_vm4 = vcmp.lt.s32.totalorder %v4377_v61, 0  ;;  %v2683_v34 = vor.u32 %v2682_v0, %v2681_v26  ;;  %v2694_v21 = vshrl.u32 %v8239_v15, %v2679_v14  ;;  %v2686_v18 = vor.u32 %v2685_v23, %v2684_v51 }
 0x3bb   : > { %v2631_v52 = vsel %vm4378_vm4, 0, %v4377_v61  ;;  %v4372_v48 = vmin.u32 %v2522_v47, %v6726_v17  ;;  %v2692_v19 = vor.u32 %v2691_v31, %v2690_v44  ;;  %v2689_v61 = vor.u32 %v2688_v37, %v2687_v39 }
 0x3bc   : > { %v2636_v29 = vsub.s32 4294967266, %v2631_v52  ;;  %v6746_v11 = vmul.f32 %v2434_v27, %v2432_v22  ;;  %v2695_v30 = vor.u32 %v2694_v21, %v2693_v16  ;;  %v6748_v24 = vshll.u32 %v2672_v43, 8 }
 0x3bd   : > { %v2524_v54 = vclz %v4372_v48  ;;  %v2783_v47 = vsub.s32 32, %v6733_v2  ;;  %v2632_v8 = vsub.s32 32, %v2631_v52  ;;  %vm2699_vm13 = vcmp.lt.s32.totalorder %v6730_v56, 4 }
 0x3be   : > { %v2637_v60 = vadd.s32 127, %v2636_v29  ;;  %v2785_v33 = vshll.u32 %v8245_v12, %v6733_v2  ;;  %v2680_v26 = vshrl.u32 %v8245_v12, %v2679_v14  ;;  %vm2696_vm10 = vcmp.lt.s32.totalorder %v6730_v56, 1 }
 0x3bf   : > { %v4373_v40 = vadd.s32 4294967294, %v2524_v54  ;;  %v2705_v23 = vsel %vm2699_vm13, %v2692_v19, 920167782  ;;  %vm2698_vm0 = vcmp.lt.s32.totalorder %v6730_v56, 3  ;;  %v2701_v27 = vsel %vm2699_vm13, %v2689_v61, 2102212464 }
 0x3c0   : > { %v2638_v0 = vshll.u32 %v2637_v60, 23  ;;  %v2704_v43 = vsel %vm2696_vm10, %v2683_v34, %v2686_v18  ;;  %v2706_v37 = vsel %vm2698_vm0, %v2689_v61, %v2705_v23  ;;  %v2708_v44 = vsel %vm2696_vm10, %v2686_v18, %v2689_v61 }
 0x3c1   : > { %vm4374_vm5 = vcmp.lt.s32.totalorder %v4373_v40, 0  ;;  %v2709_v31 = vsel %vm2699_vm13, %v2695_v30, 1326507024  ;;  %v2633_v29 = vshll.u32 %v6700_v46, %v2631_v52  ;;  %v2634_v48 = vshrl.u32 %v2616_v13, %v2632_v8 }
 0x3c2   : > { %v2527_v22 = vsel %vm4374_vm5, 0, %v4373_v40  ;;  %vm2697_vm3 = vcmp.lt.s32.totalorder %v6730_v56, 2  ;;  %v2639_v14 = vor.u32 4788187, %v2638_v0  ;;  %v2700_v39 = vsel %vm2696_vm10, %v2680_v26, %v2683_v34  ;;  %v6765_v40 = vpop.f32.mrb[13].mxu1 }
 0x3c3   : > { %v2532_v51 = vsub.s32 4294967266, %v2527_v22  ;;  %v2707_v16 = vsel %vm2697_vm3, %v2704_v43, %v2706_v37  ;;  %v2710_v21 = vsel %vm2698_vm0, %v2692_v19, %v2709_v31  ;;  %v2528_v60 = vsub.s32 32, %v2527_v22 }
 0x3c4   : > { %v2702_v30 = vsel %vm2698_vm0, %v2686_v18, %v2701_v27  ;;  %v2711_v8 = vsel %vm2697_vm3, %v2708_v44, %v2710_v21  ;;  %v6776_v52 = vmul.u32.u64.low %v6748_v24, %v2707_v16  ;;  %v6777_v34 = vmul.u32.u64.high %v6748_v24, %v2707_v16, %v6776_v52 }
 0x3c5   : > { %v2533_v54 = vadd.s32 127, %v2532_v51  ;;  %v6772_v46 = vmul.u32.u64.low %v6748_v24, %v2711_v8  ;;  %v6773_v13 = vmul.u32.u64.high %v6748_v24, %v2711_v8, %v6772_v46  ;;  %v2786_v61 = vshrl.u32 %v8246_v45, %v2783_v47 }
 0x3c6   : > { %v2788_v0 = vshll.u32 %v8246_v45, %v6733_v2  ;;  %v2789_v18 = vshrl.u32 %v8247_v63, %v2783_v47  ;;  %v2635_v26 = vor.u32 %v2634_v48, %v2633_v29  ;;  %v2703_v23 = vsel %vm2697_vm3, %v2700_v39, %v2702_v30 }
 0x3c7   : > { %v2792_v27 = vshrl.u32 %v8248_v50, %v2783_v47  ;;  %v2795_v43 = vshrl.u32 %v8238_v36, %v2783_v47  ;;  %v2640_v37 = vand.u32 2147483647, %v2639_v14  ;;  %v2529_v44 = vshll.u32 %v6726_v17, %v2527_v22 }
 0x3c8   : > { %v2534_v31 = vshll.u32 %v2533_v54, 23  ;;  %v2794_v51 = vshll.u32 %v8248_v50, %v6733_v2  ;;  %v2530_v16 = vshrl.u32 %v6724_v7, %v2528_v60  ;;  %vm2721_vm14 = vc.u32 %v6773_v13, %v6776_v52 }
 0x3c9   : > { %v2722_v29 = vadd.s32 1, %v6777_v34  ;;  %v2791_v56 = vshll.u32 %v8247_v63, %v6733_v2  ;;  %v2719_v48 = vmul.u32 %v6748_v24, %v2703_v23  ;;  %v2787_v39 = vor.u32 %v2786_v61, %v2785_v33 }
 0x3ca   : > { %v2790_v14 = vor.u32 %v2789_v18, %v2788_v0  ;;  %v2796_v21 = vor.u32 %v2795_v43, %v2794_v51  ;;  %v2797_v54 = vshll.u32 %v8238_v36, %v6733_v2  ;;  %v2798_v7 = vshrl.u32 %v8239_v15, %v2783_v47 }
 0x3cb   : > { %v2723_v17 = vsel %vm2721_vm14, %v2722_v29, %v6777_v34  ;;  %v2793_v22 = vor.u32 %v2792_v27, %v2791_v56  ;;  %vm2354_vm7 = vcmp.lt.s32.totalorder %v6498_v38, 0  ;;  %v2642_v60 = vcvt.s32.f32 %v2635_v26 }
 0x3cc   : > { %v2535_v30 = vor.u32 4788187, %v2534_v31  ;;  %v2724_v8 = vadd.s32 %v2723_v17, %v2719_v48  ;;  %v2784_v46 = vshrl.u32 %v8245_v12, %v2783_v47  ;;  %v2531_v19 = vor.u32 %v2530_v16, %v2529_v44  ;;  %v7071_v48 = vpop.permute.xlu1 %2153 }
 0x3cd   : > { %v2799_v24 = vor.u32 %v2798_v7, %v2797_v54  ;;  %vm2800_vm8 = vcmp.lt.s32.totalorder %v6728_v1, 1  ;;  %vm2803_vm1 = vcmp.lt.s32.totalorder %v6728_v1, 4  ;;  %vm2802_vm11 = vcmp.lt.s32.totalorder %v6728_v1, 3 }
 0x3ce   : > { %v2725_v33 = vadd.s32 536870912, %v2724_v8  ;;  %v2808_v2 = vsel %vm2800_vm8, %v2787_v39, %v2790_v14  ;;  %v2809_v34 = vsel %vm2803_vm1, %v2796_v21, 920167782  ;;  %vm6812_vm6 = vcmp.le.f32.partialorder %v2352_v4, 0.7853982 }
 0x3cf   : > { %vm2562_vm9 = vcmp.lt.s32.totalorder %v6526_v25, 0  ;;  %v2643_v47 = vmul.f32 %v2642_v60, %v2640_v37  ;;  %v2810_v0 = vsel %vm2802_vm11, %v2793_v22, %v2809_v34  ;;  %v2812_v18 = vsel %vm2800_vm8, %v2790_v14, %v2793_v22 }
 0x3d0   : > { %v2813_v26 = vsel %vm2803_vm1, %v2799_v24, 1326507024  ;;  %v2536_v23 = vand.u32 2147483647, %v2535_v30  ;;  %v6821_v27 = vshrl.u32 %v2725_v33, 30  ;;  %vm2801_vm12 = vcmp.lt.s32.totalorder %v6728_v1, 2 }
 0x3d1   : > { %v2805_v43 = vsel %vm2803_vm1, %v2793_v22, 2102212464  ;;  %v2811_v4 = vsel %vm2801_vm12, %v2808_v2, %v2810_v0  ;;  %v2814_v44 = vsel %vm2802_vm11, %v2796_v21, %v2813_v26  ;;  %v2816_v37 = vshll.u32 %v2776_v58, 8 }
 0x3d2   : > { %v6832_v31 = vadd.f32 %v6532_v55, %v6511_v3  ;;  %v2538_v51 = vcvt.s32.f32 %v2531_v19  ;;  %v2727_v16 = vshll.u32 %v6821_v27, 30  ;;  %v2815_v29 = vsel %vm2801_vm12, %v2812_v18, %v2814_v44 }
 0x3d3   : > { %v2876_v56 = vshrl.u32 %v2875_v20, 23  ;;  %vm6841_vm15 = vcmp.le.f32.partialorder %v2560_v9, 0.7853982  ;;  %v2804_v28 = vsel %vm2800_vm8, %v2784_v46, %v2787_v39  ;;  %v2806_v55 = vsel %vm2802_vm11, %v2790_v14, %v2805_v43 }
 0x3d4   : > { %8344 = vst [vmem:[#allocation19_spill] sm:$0xff] %v6832_v31  ;;  %v6849_v58 = vmul.u32.u64.low %v2816_v37, %v2815_v29  ;;  %v6850_v19 = vmul.u32.u64.high %v2816_v37, %v2815_v29, %v6849_v58  ;;  %v2644_v21 = vxor.u32 2147483648, %v2643_v47  ;;  %vm2458_vm4 = vcmp.lt.s32.totalorder %v6501_v57, 0 }
 0x3d5   : > { %v6853_v17 = vsub.s32 %v2724_v8, %v2727_v16  ;;  %v6855_v20 = vmul.u32.u64.low %v2816_v37, %v2811_v4  ;;  %v6856_v22 = vmul.u32.u64.high %v2816_v37, %v2811_v4, %v6855_v20  ;;  %v8347_v9 = vxor.u32 2147483648, %v6746_v11 }
 0x3d6   : > { %v2539_v54 = vmul.f32 %v2538_v51, %v2536_v23  ;;  %v2979_v14 = vand.u32 2139095040, %v6832_v31  ;;  %v4387_v7 = vadd.s32 4294967169, %v2876_v56  ;;  %v8348_v60 = vsub.s32 4, %v6606_v62  ;;  %v6896_v56 = vpop.f32.mrb[14].mxu0 }
 0x3d7   : > { %v2437_v39 = vsel %vm2354_vm7, %v8347_v9, %v6746_v11  ;;  %v2730_v8 = vsub.s32 0, %v6853_v17  ;;  %v2807_v46 = vsel %vm2801_vm12, %v2804_v28, %v2806_v55  ;;  %v8175_v24 = vand.u32 2147483647, %v6832_v31 }
 0x3d8   : > { %v6869_v30 = vsel %vm2354_vm7, %v8348_v60, %v6606_v62  ;;  %v2646_v11 = vsub.s32 4, %v6685_v42  ;;  %v8349_v33 = vand.u32 2147483647, %v6501_v57  ;;  %vm2825_vm10 = vc.u32 %v6850_v19, %v6855_v20 }
 0x3d9   : > { %v2980_v34 = vshrl.u32 %v2979_v14, 23  ;;  %v2882_v62 = vadd.s32 1, %v4387_v7  ;;  %v2440_v0 = vsel %vm6812_vm6, %v6498_v38, %v2437_v39  ;;  %v2645_v1 = vsel %vm2562_vm9, %v2644_v21, %v2643_v47 }
 0x3da   : > { %vm6878_vm13 = vcmp.le.f32.partialorder %v8349_v33, 0.7853982  ;;  %v4380_v18 = vmin.u32 %v2730_v8, %v6853_v17  ;;  %v2826_v26 = vadd.s32 1, %v6856_v22  ;;  %v2540_v23 = vxor.u32 2147483648, %v2539_v54 }
 0x3db   : > { %v2823_v43 = vmul.u32 %v2816_v37, %v2807_v46  ;;  %v4391_v4 = vadd.s32 4294967169, %v2980_v34  ;;  %vm2883_vm5 = vcmp.gt.s32.totalorder %v2882_v62, 0  ;;  %v2983_v29 = vand.u32 8388607, %v8175_v24 }
 0x3dc   : > { %v2732_v51 = vclz %v4380_v18  ;;  %v2827_v16 = vsel %vm2825_vm10, %v2826_v26, %v6856_v22  ;;  %4725 = vcosq.f32 %v2440_v0  ;;  %v6901_v47 = vsel %vm2562_vm9, %v2646_v11, %v6685_v42 }
 0x3dd   : > { %v2828_v37 = vadd.s32 %v2827_v16, %v2823_v43  ;;  %v2986_v28 = vadd.s32 1, %v4391_v4  ;;  %4727 = vsinq.f32 %v2440_v0  ;;  %v6906_v55 = vsel %vm6841_vm15, %v6526_v25, %v2645_v1 }
 0x3de   : > { %v4381_v58 = vadd.s32 4294967294, %v2732_v51  ;;  %v2884_v21 = vsel %vm2883_vm5, %v2882_v62, 0  ;;  %v2541_v22 = vsel %vm2458_vm4, %v2540_v23, %v2539_v54  ;;  %v2880_v39 = vor.u32 8388608, %v6719_v49 }
 0x3df   : > { %v2829_v9 = vadd.s32 536870912, %v2828_v37  ;;  %vm2987_vm0 = vcmp.gt.s32.totalorder %v2986_v28, 0  ;;  %v2984_v42 = vor.u32 8388608, %v2983_v29  ;;  %v6913_v7 = vadd.f32 %v6538_v6, %v6511_v3 }
 0x3e0   : > { %vm4382_vm3 = vcmp.lt.s32.totalorder %v4381_v58, 0  ;;  %v2988_v14 = vsel %vm2987_vm0, %v2986_v28, 0  ;;  %v6917_v11 = vand.u32 31, %v2884_v21  ;;  %v6922_v54 = vsel %vm6878_vm13, %v6501_v57, %v2541_v22 }
 0x3e1   : > { %8352 = vst [vmem:[#allocation8_spill] sm:$0xff] %v6913_v7  ;;  %v2735_v60 = vsel %vm4382_vm3, 0, %v4381_v58  ;;  %v6915_v8 = vshrl.u32 %v2829_v9, 30  ;;  %v2990_v46 = vand.u32 31, %v2988_v14  ;;  %v2720_v49 = vadd.s32 %v6776_v52, %v6773_v13 }
 0x3e2   : > { %v2740_v33 = vsub.s32 4294967266, %v2735_v60  ;;  %v6927_v34 = vadd.s32 %v6855_v20, %v6850_v19  ;;  %v2736_v3 = vsub.s32 32, %v2735_v60  ;;  %v6930_v0 = vshll.u32 %v2880_v39, 8 }
 0x3e3   : > { %v2831_v6 = vshll.u32 %v6915_v8, 30  ;;  %v2991_v62 = vsub.s32 32, %v2990_v46  ;;  %v6932_v18 = vshll.u32 %v2984_v42, 8  ;;  %v6934_v26 = vshrl.u32 %v2884_v21, 5 }
 0x3e4   : > { %v2741_v1 = vadd.s32 127, %v2740_v33  ;;  %v6941_v52 = vsub.s32 32, %v6917_v11  ;;  %v6945_v19 = vshll.u32 %v8245_v12, %v6917_v11  ;;  %v2993_v4 = vshll.u32 %v8245_v12, %v2990_v46 }
 0x3e5   : > { %v6937_v43 = vsub.s32 %v2828_v37, %v2831_v6  ;;  %v2994_v13 = vshrl.u32 %v8246_v45, %v2991_v62  ;;  %v2996_v51 = vshll.u32 %v8246_v45, %v2990_v46  ;;  %v2997_v16 = vshrl.u32 %v8247_v63, %v2991_v62 }
 0x3e6   : > { %v2742_v20 = vshll.u32 %v2741_v1, 23  ;;  %v6950_v29 = vpop.eup %4725  ;;  %v2738_v37 = vshrl.u32 %v2720_v49, %v2736_v3  ;;  %v2999_v58 = vshll.u32 %v8247_v63, %v2990_v46  ;;  %v3000_v21 = vshrl.u32 %v8248_v50, %v2991_v62 }
 0x3e7   : > { %8353 = vst [vmem:[#allocation12_spill] sm:$0xff] %v6950_v29  ;;  %v2834_v28 = vsub.s32 0, %v6937_v43  ;;  %v6955_v22 = vpop.eup %4727  ;;  %v2737_v9 = vshll.u32 %v6853_v17, %v2735_v60  ;;  %v2989_v39 = vshrl.u32 %v2988_v14, 5  ;;  %v2995_v42 = vor.u32 %v2994_v13, %v2993_v4 }
 0x3e8   : > { %8354 = vst [vmem:[#allocation16_spill] sm:$0xff] %v6955_v22  ;;  %v2998_v33 = vor.u32 %v2997_v16, %v2996_v51  ;;  %v3001_v1 = vor.u32 %v3000_v21, %v2999_v58  ;;  %v3002_v24 = vshll.u32 %v8248_v50, %v2990_v46  ;;  %v3003_v49 = vshrl.u32 %v8238_v36, %v2991_v62  ;;  %v6970_v58 = vpop.f32.mrb[14].mxu1 }
 0x3e9   : > { %v4384_v6 = vmin.u32 %v2834_v28, %v6937_v43  ;;  %v2743_v3 = vor.u32 4788187, %v2742_v20  ;;  %v3005_v44 = vshll.u32 %v8238_v36, %v2990_v46  ;;  %v3006_v23 = vshrl.u32 %v8239_v15, %v2991_v62 }
 0x3ea   : > { %v2892_v25 = vshll.u32 %v8246_v45, %v6917_v11  ;;  %v2739_v38 = vor.u32 %v2738_v37, %v2737_v9  ;;  %v3004_v14 = vor.u32 %v3003_v49, %v3002_v24  ;;  %v2895_v60 = vshll.u32 %v8247_v63, %v6917_v11 }
 0x3eb   : > { %v2836_v17 = vclz %v4384_v6  ;;  %v3007_v13 = vor.u32 %v3006_v23, %v3005_v44  ;;  %vm3008_vm14 = vcmp.lt.s32.totalorder %v2989_v39, 1  ;;  %vm3010_vm7 = vcmp.lt.s32.totalorder %v2989_v39, 3 }
 0x3ec   : > { %vm3011_vm8 = vcmp.lt.s32.totalorder %v2989_v39, 4  ;;  %v3016_v20 = vsel %vm3008_vm14, %v2995_v42, %v2998_v33  ;;  %v2744_v16 = vand.u32 2147483647, %v2743_v3  ;;  %v2992_v28 = vshrl.u32 %v8245_v12, %v2991_v62 }
 0x3ed   : > { %v4385_v4 = vadd.s32 4294967294, %v2836_v17  ;;  %v3013_v51 = vsel %vm3011_vm8, %v3001_v1, 2102212464  ;;  %v3017_v46 = vsel %vm3011_vm8, %v3004_v14, 920167782  ;;  %vm3009_vm1 = vcmp.lt.s32.totalorder %v2989_v39, 2 }
 0x3ee   : > { %v3018_v37 = vsel %vm3010_vm7, %v3001_v1, %v3017_v46  ;;  %v3020_v44 = vsel %vm3008_vm14, %v2998_v33, %v3001_v1  ;;  %v3021_v23 = vsel %vm3011_vm8, %v3007_v13, 1326507024  ;;  %v3012_v9 = vsel %vm3008_vm14, %v2992_v28, %v2995_v42 }
 0x3ef   : > { %vm4386_vm11 = vcmp.lt.s32.totalorder %v4385_v4, 0  ;;  %v3019_v24 = vsel %vm3009_vm1, %v3016_v20, %v3018_v37  ;;  %v3014_v6 = vsel %vm3010_vm7, %v2998_v33, %v3013_v51  ;;  %v3022_v49 = vsel %vm3010_vm7, %v3004_v14, %v3021_v23 }
 0x3f0   : > { %v2839_v21 = vsel %vm4386_vm11, 0, %v4385_v4  ;;  %v2746_v3 = vcvt.s32.f32 %v2739_v38  ;;  %v2888_v46 = vshrl.u32 %v8245_v12, %v6941_v52  ;;  %v3023_v29 = vsel %vm3009_vm1, %v3020_v44, %v3022_v49 }
 0x3f1   : > { %v2840_v62 = vsub.s32 32, %v2839_v21  ;;  %v2844_v17 = vsub.s32 4294967266, %v2839_v21  ;;  %v6981_v20 = vmul.u32.u64.low %v6932_v18, %v3019_v24  ;;  %v6982_v37 = vmul.u32.u64.high %v6932_v18, %v3019_v24, %v6981_v20 }
 0x3f2   : > { %v2890_v42 = vshrl.u32 %v8246_v45, %v6941_v52  ;;  %v6987_v1 = vmul.f32 %v2746_v3, %v2744_v16  ;;  %v2854_v38 = vsub.s32 4, %v6915_v8  ;;  %v3015_v14 = vsel %vm3009_vm1, %v3012_v9, %v3014_v6 }
 0x3f3   : > { %v2845_v33 = vadd.s32 127, %v2844_v17  ;;  %v6992_v13 = vmul.u32.u64.low %v6932_v18, %v3023_v29  ;;  %v6993_v4 = vmul.u32.u64.high %v6932_v18, %v3023_v29, %v6992_v13  ;;  %v2893_v51 = vshrl.u32 %v8247_v63, %v6941_v52 }
 0x3f4   : > { %v2896_v28 = vshrl.u32 %v8248_v50, %v6941_v52  ;;  %v2842_v24 = vshrl.u32 %v6927_v34, %v2840_v62  ;;  %v2898_v16 = vshll.u32 %v8248_v50, %v6917_v11  ;;  %v2899_v39 = vshrl.u32 %v8238_v36, %v6941_v52 }
 0x3f5   : > { %v2846_v44 = vshll.u32 %v2845_v33, 23  ;;  %v2841_v23 = vshll.u32 %v6937_v43, %v2839_v21  ;;  %v3034_v29 = vadd.s32 1, %v6982_v37  ;;  %v2891_v9 = vor.u32 %v2890_v42, %v6945_v19 }
 0x3f6   : > { %v2894_v6 = vor.u32 %v2893_v51, %v2892_v25  ;;  %v2897_v49 = vor.u32 %v2896_v28, %v2895_v60  ;;  %v2900_v3 = vor.u32 %v2899_v39, %v2898_v16  ;;  %v2901_v17 = vshll.u32 %v8238_v36, %v6917_v11 }
 0x3f7   : > { %v2902_v34 = vshrl.u32 %v8239_v15, %v6941_v52  ;;  %v2748_v62 = vxor.u32 2147483648, %v6987_v1  ;;  %vm2770_vm9 = vcmp.lt.s32.totalorder %v6518_v35, 0  ;;  %v2847_v33 = vor.u32 4788187, %v2846_v44 }
 0x3f8   : > { %v3031_v43 = vmul.u32 %v6932_v18, %v3015_v14  ;;  %vm3033_vm12 = vc.u32 %v6993_v4, %v6981_v20  ;;  %vm2666_vm10 = vcmp.lt.s32.totalorder %v6662_v10, 0  ;;  %v2843_v25 = vor.u32 %v2842_v24, %v2841_v23 }
 0x3f9   : > { %v3035_v19 = vsel %vm3033_vm12, %v3034_v29, %v6982_v37  ;;  %v2903_v60 = vor.u32 %v2902_v34, %v2901_v17  ;;  %vm2904_vm5 = vcmp.lt.s32.totalorder %v6934_v26, 1  ;;  %vm2905_vm0 = vcmp.lt.s32.totalorder %v6934_v26, 2 }
 0x3fa   : > { %v3036_v11 = vadd.s32 %v3035_v19, %v3031_v43  ;;  %vm2907_vm3 = vcmp.lt.s32.totalorder %v6934_v26, 4  ;;  %v2912_v52 = vsel %vm2904_vm5, %v2891_v9, %v2894_v6  ;;  %v8355_v21 = vand.u32 2147483647, %v6518_v35 }
 0x3fb   : > { %vm2906_vm7 = vcmp.lt.s32.totalorder %v6934_v26, 3  ;;  %v2909_v42 = vsel %vm2907_vm3, %v2897_v49, 2102212464  ;;  %v2913_v14 = vsel %vm2907_vm3, %v2900_v3, 920167782  ;;  %v2916_v37 = vsel %vm2904_vm5, %v2894_v6, %v2897_v49 }
 0x3fc   : > { %vm7023_vm14 = vcmp.le.f32.partialorder %v8355_v21, 0.7853982  ;;  %v8358_v13 = vand.u32 2147483647, %v6662_v10  ;;  %v8359_v51 = vmov 0  ;;  %v3037_v24 = vadd.s32 536870912, %v3036_v11 }
 0x3fd   : > { %v2848_v28 = vand.u32 2147483647, %v2847_v33  ;;  %v2914_v44 = vsel %vm2906_vm7, %v2897_v49, %v2913_v14  ;;  %v2917_v16 = vsel %vm2907_vm3, %v2903_v60, 1326507024  ;;  %v2908_v39 = vsel %vm2904_vm5, %v2888_v46, %v2891_v9 }
 0x3fe   : > { %vm7030_vm8 = vcmp.le.f32.partialorder %v8358_v13, 0.7853982  ;;  %v2910_v23 = vsel %vm2906_vm7, %v2894_v6, %v2909_v42  ;;  %v2915_v29 = vsel %vm2905_vm0, %v2912_v52, %v2914_v44  ;;  %v2918_v17 = vsel %vm2906_vm7, %v2900_v3, %v2917_v16 }
 0x3ff   : > { %v8360_v51 = vsel %vm7030_vm8, 4294967295, %v8359_v51  ;;  %v7036_v34 = vshrl.u32 %v3037_v24, 30  ;;  %v2919_v43 = vsel %vm2905_vm0, %v2916_v37, %v2918_v17  ;;  %v2850_v13 = vcvt.s32.f32 %v2843_v25  ;;  %v7069_v24 = vpop.f32.mrb[15].mxu0 }
 0x400   : > { %8361 = vst [vmem:[#allocation18_spill] sm:$0xff] %v8360_v51  ;;  %v7041_v19 = vmul.u32.u64.low %v6930_v0, %v2915_v29  ;;  %v7042_v21 = vmul.u32.u64.high %v6930_v0, %v2915_v29, %v7041_v19  ;;  %v7045_v33 = vmul.u32.u64.low %v6930_v0, %v2919_v43  ;;  %v7046_v49 = vmul.u32.u64.high %v6930_v0, %v2919_v43, %v7045_v33 }
 0x401   : > { %v8180_v46 = vand.u32 2147483647, %v6913_v7  ;;  %4729 = vcosq.f32 %v6906_v55  ;;  %v3039_v9 = vshll.u32 %v7036_v34, 30  ;;  %v2911_v6 = vsel %vm2905_vm0, %v2908_v39, %v2910_v23 }
 0x402   : > { %v8362_v3 = vand.u32 2139095040, %v6913_v7  ;;  %v2649_v25 = vsel %vm6841_vm15, 0, %v6901_v47  ;;  %4731 = vsinq.f32 %v6906_v55  ;;  %v2851_v52 = vmul.f32 %v2850_v13, %v2848_v28 }
 0x403   : > { %v2855_v42 = vsel %vm2770_vm9, %v2854_v38, %v6915_v8  ;;  %4733 = vcosq.f32 %v6922_v54  ;;  %v2749_v26 = vsel %vm2666_vm10, %v2748_v62, %v6987_v1  ;;  %v7066_v14 = vsub.s32 %v3036_v11, %v3039_v9 }
 0x404   : > { %v3084_v60 = vshrl.u32 %v8362_v3, 23  ;;  %v2930_v37 = vadd.s32 1, %v7042_v21  ;;  %v2927_v47 = vmul.u32 %v6930_v0, %v2911_v6  ;;  %vm2929_vm15 = vc.u32 %v7046_v49, %v7041_v19 }
 0x405   : > { %v3087_v8 = vand.u32 8388607, %v8180_v46  ;;  %v2857_v38 = vsel %vm7023_vm14, 0, %v2855_v42  ;;  %v3042_v1 = vsub.s32 0, %v7066_v14  ;;  %v7083_v11 = vadd.f32 %v6543_v41, %v7071_v48 }
 0x406   : > { %v4395_v55 = vadd.s32 4294967169, %v3084_v60  ;;  %v2931_v62 = vsel %vm2929_vm15, %v2930_v37, %v7042_v21  ;;  %v7088_v0 = vsel %vm7030_vm8, %v6662_v10, %v2749_v26  ;;  %v2852_v28 = vxor.u32 2147483648, %v2851_v52 }
 0x407   : > { %8363 = vst [vmem:[#allocation27_spill] sm:$0xff] %v7083_v11  ;;  %v2932_v44 = vadd.s32 %v2931_v62, %v2927_v47  ;;  %v8364_v39 = vsel %vm6812_vm6, 0, %v6869_v30  ;;  %v7096_v29 = vadd.s32 3, %v2649_v25  ;;  %4735 = vsinq.f32 %v6922_v54 }
 0x408   : > { %v3090_v16 = vadd.s32 1, %v4395_v55  ;;  %v7094_v23 = vadd.s32 3, %v8364_v39  ;;  %v4392_v41 = vmin.u32 %v3042_v1, %v7066_v14  ;;  %v7100_v17 = vadd.s32 3, %v2857_v38 }
 0x409   : > { %8366 = vst [vmem:[#allocation26_spill] sm:$0xff] %v7096_v29  ;;  %v2933_v43 = vadd.s32 536870912, %v2932_v44  ;;  %v3088_v21 = vor.u32 8388608, %v3087_v8  ;;  %4737 = vcosq.f32 %v7088_v0  ;;  %v3187_v61 = vand.u32 2139095040, %v7083_v11 }
 0x40a   : > { %8365 = vst [vmem:[#allocation23_spill] sm:$0xff] %v7094_v23  ;;  %8367 = vst [vmem:[#allocation22_spill] sm:$0xff] %v7100_v17  ;;  %vm3091_vm1 = vcmp.gt.s32.totalorder %v3090_v16, 0  ;;  %v3044_v13 = vclz %v4392_v41  ;;  %v7106_v30 = vsel %vm2770_vm9, %v2852_v28, %v2851_v52  ;;  %v3032_v54 = vadd.s32 %v6981_v20, %v6993_v4 }
 0x40b   : > { %v3092_v33 = vsel %vm3091_vm1, %v3090_v16, 0  ;;  %v7110_v9 = vshrl.u32 %v2933_v43, 30  ;;  %v7112_v3 = vpop.eup %4729  ;;  %v7116_v42 = vadd.s32 %v7041_v19, %v7046_v49  ;;  %v7120_v26 = vadd.f32 %v6604_v59, %v7071_v48 }
 0x40c   : > { %v3094_v6 = vand.u32 31, %v3092_v33  ;;  %8368 = vst [vmem:[#allocation9_spill] sm:$0xff] %v7112_v3  ;;  %v4393_v60 = vadd.s32 4294967294, %v3044_v13  ;;  %v7122_v52 = vpop.eup %4731  ;;  %v7125_v4 = vshll.u32 %v3088_v21, 8  ;;  %v7130_v8 = vshrl.u32 %v3092_v33, 5 }
 0x40d   : > { %8369 = vst [vmem:[#allocation20_spill] sm:$0xff] %v7120_v26  ;;  %8370 = vst [vmem:[#allocation17_spill] sm:$0xff] %v7122_v52  ;;  %v2935_v37 = vshll.u32 %v7110_v9, 30  ;;  %v7128_v55 = vpop.eup %4733  ;;  %v3188_v49 = vshrl.u32 %v3187_v61, 23  ;;  %v8372_v23 = vand.u32 2147483647, %v7083_v11  ;;  %4739 = vsinq.f32 %v7088_v0 }
 0x40e   : > { %v3095_v20 = vsub.s32 32, %v3094_v6  ;;  %vm4394_vm6 = vcmp.lt.s32.totalorder %v4393_v60, 0  ;;  %v3097_v19 = vshll.u32 %v8245_v12, %v3094_v6  ;;  %v3100_v62 = vshll.u32 %v8246_v45, %v3094_v6 }
 0x40f   : > { %v3047_v38 = vsel %vm4394_vm6, 0, %v4393_v60  ;;  %v7133_v59 = vsub.s32 %v2932_v44, %v2935_v37  ;;  %v3103_v41 = vshll.u32 %v8247_v63, %v3094_v6  ;;  %v3106_v13 = vshll.u32 %v8248_v50, %v3094_v6 }
 0x410   : > { %v3098_v1 = vshrl.u32 %v8246_v45, %v3095_v20  ;;  %v3048_v28 = vsub.s32 32, %v3047_v38  ;;  %v3052_v16 = vsub.s32 4294967266, %v3047_v38  ;;  %v3101_v39 = vshrl.u32 %v8247_v63, %v3095_v20 }
 0x411   : > { %v2938_v43 = vsub.s32 0, %v7133_v59  ;;  %v3104_v21 = vshrl.u32 %v8248_v50, %v3095_v20  ;;  %v3107_v33 = vshrl.u32 %v8238_v36, %v3095_v20  ;;  %v7143_v44 = vpop.eup %4735  ;;  %v3109_v37 = vshll.u32 %v8238_v36, %v3094_v6 }
 0x412   : > { %v3053_v61 = vadd.s32 127, %v3052_v16  ;;  %v3099_v60 = vor.u32 %v3098_v1, %v3097_v19  ;;  %v3110_v46 = vshrl.u32 %v8239_v15, %v3095_v20  ;;  %v3102_v47 = vor.u32 %v3101_v39, %v3100_v62 }
 0x413   : > { %v4388_v25 = vmin.u32 %v2938_v43, %v7133_v59  ;;  %v3105_v3 = vor.u32 %v3104_v21, %v3103_v41  ;;  %v3108_v52 = vor.u32 %v3107_v33, %v3106_v13  ;;  %v7148_v29 = vpop.eup %4737  ;;  %v3050_v17 = vshrl.u32 %v3032_v54, %v3048_v28 }
 0x414   : > { %8371 = vst [vmem:[#allocation24_spill] sm:$0xff] %v7148_v29  ;;  %v3111_v22 = vor.u32 %v3110_v46, %v3109_v37  ;;  %v7152_v51 = vand.u32 8388607, %v8372_v23  ;;  %v8187_v16 = vand.u32 2147483647, %v7120_v26  ;;  %v3054_v19 = vshll.u32 %v3053_v61, 23 }
 0x415   : > { %v2940_v1 = vclz %v4388_v25  ;;  %v3096_v6 = vshrl.u32 %v8245_v12, %v3095_v20  ;;  %v4399_v10 = vadd.s32 4294967169, %v3188_v49  ;;  %vm2978_vm11 = vcmp.lt.s32.totalorder %v6832_v31, 0 }
 0x416   : > { %v3049_v62 = vshll.u32 %v7066_v14, %v3047_v38  ;;  %vm3112_vm9 = vcmp.lt.s32.totalorder %v7130_v8, 1  ;;  %vm3114_vm12 = vcmp.lt.s32.totalorder %v7130_v8, 3  ;;  %vm3115_vm5 = vcmp.lt.s32.totalorder %v7130_v8, 4 }
 0x417   : > { %v4389_v46 = vadd.s32 4294967294, %v2940_v1  ;;  %v3120_v23 = vsel %vm3112_vm9, %v3099_v60, %v3102_v47  ;;  %v3121_v54 = vsel %vm3115_vm5, %v3108_v52, 920167782  ;;  %v3124_v25 = vsel %vm3112_vm9, %v3102_v47, %v3105_v3 }
 0x418   : > { %v3051_v20 = vor.u32 %v3050_v17, %v3049_v62  ;;  %v3117_v49 = vsel %vm3115_vm5, %v3105_v3, 2102212464  ;;  %v3122_v28 = vsel %vm3114_vm12, %v3105_v3, %v3121_v54  ;;  %v3125_v14 = vsel %vm3115_vm5, %v3111_v22, 1326507024 }
 0x419   : > { %v3055_v38 = vor.u32 4788187, %v3054_v19  ;;  %vm4390_vm0 = vcmp.lt.s32.totalorder %v4389_v46, 0  ;;  %vm3113_vm3 = vcmp.lt.s32.totalorder %v7130_v8, 2  ;;  %v3126_v39 = vsel %vm3114_vm12, %v3108_v52, %v3125_v14 }
 0x41a   : > { %v2943_v41 = vsel %vm4390_vm0, 0, %v4389_v46  ;;  %v3123_v43 = vsel %vm3113_vm3, %v3120_v23, %v3122_v28  ;;  %v3127_v21 = vsel %vm3113_vm3, %v3124_v25, %v3126_v39  ;;  %v3194_v17 = vadd.s32 1, %v4399_v10  ;;  %v7197_v46 = vpop.f32.mrb[15].mxu1 }
 0x41b   : > { %v2944_v13 = vsub.s32 32, %v2943_v41  ;;  %v2948_v33 = vsub.s32 4294967266, %v2943_v41  ;;  %v3116_v22 = vsel %vm3112_vm9, %v3096_v6, %v3099_v60  ;;  %v3118_v3 = vsel %vm3114_vm12, %v3102_v47, %v3117_v49 }
 0x41c   : > { %v2945_v61 = vshll.u32 %v7133_v59, %v2943_v41  ;;  %v7180_v52 = vmul.u32.u64.low %v7125_v4, %v3127_v21  ;;  %v7181_v37 = vmul.u32.u64.high %v7125_v4, %v3127_v21, %v7180_v52  ;;  %vm3195_vm7 = vcmp.gt.s32.totalorder %v3194_v17, 0 }
 0x41d   : > { %v2946_v19 = vshrl.u32 %v7116_v42, %v2944_v13  ;;  %v2949_v1 = vadd.s32 127, %v2948_v33  ;;  %v7185_v10 = vmul.u32.u64.low %v7125_v4, %v3123_v43  ;;  %v7186_v62 = vmul.u32.u64.high %v7125_v4, %v3123_v43, %v7185_v10 }
 0x41e   : > { %v7193_v47 = vsel %vm7023_vm14, %v6518_v35, %v7106_v30  ;;  %v3056_v59 = vand.u32 2147483647, %v3055_v38  ;;  %v3119_v60 = vsel %vm3113_vm3, %v3116_v22, %v3118_v3  ;;  %v3196_v6 = vsel %vm3195_vm7, %v3194_v17, 0 }
 0x41f   : > { %v8373_v42 = vsub.s32 4, %v7036_v34  ;;  %v2947_v54 = vor.u32 %v2946_v19, %v2945_v61  ;;  %v2950_v25 = vshll.u32 %v2949_v1, 23  ;;  %v3192_v18 = vor.u32 8388608, %v7152_v51 }
 0x420   : > { %v3058_v30 = vcvt.s32.f32 %v3051_v20  ;;  %vm3137_vm14 = vc.u32 %v7181_v37, %v7185_v10  ;;  %v3198_v8 = vand.u32 31, %v3196_v6  ;;  %v3395_v49 = vand.u32 2139095040, %v7120_v26 }
 0x421   : > { %v7204_v23 = vsel %vm2978_vm11, %v8373_v42, %v7036_v34  ;;  %v2951_v28 = vor.u32 4788187, %v2950_v25  ;;  %v3135_v14 = vmul.u32 %v7125_v4, %v3119_v60  ;;  %v3138_v38 = vadd.s32 1, %v7186_v62 }
 0x422   : > { %v7214_v34 = vand.u32 8388607, %v8187_v16  ;;  %v3059_v39 = vmul.f32 %v3058_v30, %v3056_v59  ;;  %v2954_v41 = vcvt.s32.f32 %v2947_v54  ;;  %v3197_v43 = vshrl.u32 %v3196_v6, 5 }
 0x423   : > { %v3199_v51 = vsub.s32 32, %v3198_v8  ;;  %v2952_v20 = vand.u32 2147483647, %v2951_v28  ;;  %v3139_v21 = vsel %vm3137_vm14, %v3138_v38, %v7186_v62  ;;  %v3201_v17 = vshll.u32 %v8245_v12, %v3198_v8 }
 0x424   : > { %v3204_v13 = vshll.u32 %v8246_v45, %v3198_v8  ;;  %v3140_v33 = vadd.s32 %v3139_v21, %v3135_v14  ;;  %v3207_v3 = vshll.u32 %v8247_v63, %v3198_v8  ;;  %v3210_v52 = vshll.u32 %v8248_v50, %v3198_v8 }
 0x425   : > { %v3202_v4 = vshrl.u32 %v8246_v45, %v3199_v51  ;;  %v3205_v22 = vshrl.u32 %v8247_v63, %v3199_v51  ;;  %v3208_v61 = vshrl.u32 %v8248_v50, %v3199_v51  ;;  %v3211_v19 = vshrl.u32 %v8238_v36, %v3199_v51 }
 0x426   : > { %v3214_v1 = vshrl.u32 %v8239_v15, %v3199_v51  ;;  %vm2874_vm15 = vcmp.lt.s32.totalorder %v6693_v32, 0  ;;  %v3141_v62 = vadd.s32 536870912, %v3140_v33  ;;  %v3213_v6 = vshll.u32 %v8238_v36, %v3198_v8 }
 0x427   : > { %v3203_v59 = vor.u32 %v3202_v4, %v3201_v17  ;;  %v3206_v60 = vor.u32 %v3205_v22, %v3204_v13  ;;  %v2955_v42 = vmul.f32 %v2954_v41, %v2952_v20  ;;  %v3209_v54 = vor.u32 %v3208_v61, %v3207_v3  ;;  %v8425_v13 = vld [vmem:[#allocation11_spill] sm:$0xff] }
 0x428   : > { %v3212_v25 = vor.u32 %v3211_v19, %v3210_v52  ;;  %v3232_v30 = vshll.u32 %v3192_v18, 8  ;;  %v8374_v28 = vand.u32 2147483647, %v6832_v31  ;;  %v3060_v38 = vxor.u32 2147483648, %v3059_v39 }
 0x429   : > { %v7234_v21 = vshrl.u32 %v3141_v62, 30  ;;  %v3215_v16 = vor.u32 %v3214_v1, %v3213_v6  ;;  %vm3216_vm6 = vcmp.lt.s32.totalorder %v3197_v43, 1  ;;  %v8378_v17 = vand.u32 2147483647, %v6693_v32 }
 0x42a   : > { %vm7230_vm1 = vcmp.le.f32.partialorder %v8374_v28, 0.7853982  ;;  %v3200_v8 = vshrl.u32 %v8245_v12, %v3199_v51  ;;  %vm3219_vm12 = vcmp.lt.s32.totalorder %v3197_v43, 4  ;;  %v3224_v18 = vsel %vm3216_vm6, %v3203_v59, %v3206_v60 }
 0x42b   : > { %8377 = vst [vmem:[#allocation28_spill] sm:$0xff] %v7234_v21  ;;  %vm7238_vm9 = vcmp.le.f32.partialorder %v8378_v17, 0.7853982  ;;  %v3396_v41 = vshrl.u32 %v3395_v49, 23  ;;  %v3143_v20 = vshll.u32 %v7234_v21, 30  ;;  %vm3218_vm5 = vcmp.lt.s32.totalorder %v3197_v43, 3 }
 0x42c   : > { %v3221_v4 = vsel %vm3219_vm12, %v3209_v54, 2102212464  ;;  %v3225_v22 = vsel %vm3219_vm12, %v3212_v25, 920167782  ;;  %v2956_v3 = vxor.u32 2147483648, %v2955_v42  ;;  %vm3217_vm0 = vcmp.lt.s32.totalorder %v3197_v43, 2 }
 0x42d   : > { %v3226_v61 = vsel %vm3218_vm5, %v3209_v54, %v3225_v22  ;;  %v3228_v52 = vsel %vm3216_vm6, %v3206_v60, %v3209_v54  ;;  %v7244_v19 = vsub.s32 %v3140_v33, %v3143_v20  ;;  %v3220_v1 = vsel %vm3216_vm6, %v3200_v8, %v3203_v59 }
 0x42e   : > { %v3227_v62 = vsel %vm3217_vm0, %v3224_v18, %v3226_v61  ;;  %v3229_v6 = vsel %vm3219_vm12, %v3215_v16, 1326507024  ;;  %v3222_v28 = vsel %vm3218_vm5, %v3206_v60, %v3221_v4  ;;  %v3061_v49 = vsel %vm2978_vm11, %v3060_v38, %v3059_v39 }
 0x42f   : > { %v3230_v51 = vsel %vm3218_vm5, %v3212_v25, %v3229_v6  ;;  %v7247_v17 = vmul.u32.u64.low %v3232_v30, %v3227_v62  ;;  %v7248_v35 = vmul.u32.u64.high %v3232_v30, %v3227_v62, %v7247_v17  ;;  %v3146_v21 = vsub.s32 0, %v7244_v19 }
 0x430   : > { %v3231_v22 = vsel %vm3217_vm0, %v3228_v52, %v3230_v51  ;;  %v4407_v54 = vadd.s32 4294967169, %v3396_v41  ;;  %v2957_v33 = vsel %vm2874_vm15, %v2956_v3, %v2955_v42  ;;  %4741 = vcosq.f32 %v7193_v47 }
 0x431   : > { %v7258_v16 = vmul.u32.u64.low %v3232_v30, %v3231_v22  ;;  %v7259_v59 = vmul.u32.u64.high %v3232_v30, %v3231_v22, %v7258_v16  ;;  %v4396_v60 = vmin.u32 %v3146_v21, %v7244_v19  ;;  %v3223_v25 = vsel %vm3217_vm0, %v3220_v1, %v3222_v28 }
 0x432   : > { %v3402_v39 = vadd.s32 1, %v4407_v54  ;;  %4743 = vsinq.f32 %v7193_v47  ;;  %v3064_v38 = vsel %vm7230_vm1, %v6832_v31, %v3061_v49  ;;  %v3065_v0 = vsel %vm7230_vm1, 0, %v7204_v23 }
 0x433   : > { %v3242_v42 = vadd.s32 1, %v7248_v35  ;;  %v7275_v8 = vsel %vm7238_vm9, %v6693_v32, %v2957_v33  ;;  %v3148_v43 = vclz %v4396_v60  ;;  %v3400_v21 = vor.u32 8388608, %v7214_v34 }
 0x434   : > { %vm3403_vm11 = vcmp.gt.s32.totalorder %v3402_v39, 0  ;;  %v3239_v47 = vmul.u32 %v3232_v30, %v3223_v25  ;;  %vm3241_vm3 = vc.u32 %v7259_v59, %v7247_v17  ;;  %v7282_v14 = vadd.f32 %v6703_v5, %v7071_v48 }
 0x435   : > { %v3404_v18 = vsel %vm3403_vm11, %v3402_v39, 0  ;;  %4745 = vcosq.f32 %v3064_v38  ;;  %v4397_v23 = vadd.s32 4294967294, %v3148_v43  ;;  %v3243_v41 = vsel %vm3241_vm3, %v3242_v42, %v7248_v35 }
 0x436   : > { %v3406_v20 = vand.u32 31, %v3404_v18  ;;  %4747 = vsinq.f32 %v3064_v38  ;;  %v7285_v4 = vadd.s32 3, %v3065_v0  ;;  %v3136_v34 = vadd.s32 %v7185_v10, %v7181_v37  ;;  %v7297_v37 = vpop.eup %4739 }
 0x437   : > { %v3244_v30 = vadd.s32 %v3243_v41, %v3239_v47  ;;  %4749 = vcosq.f32 %v7275_v8  ;;  %vm4398_vm7 = vcmp.lt.s32.totalorder %v4397_v23, 0  ;;  %v7290_v61 = vshll.u32 %v3400_v21, 8  ;;  %8382 = vst [vmem:[#allocation34_spill] sm:$0xff] %v7297_v37 }
 0x438   : > { %8381 = vst [vmem:[#allocation13_spill] sm:$0xff] %v7285_v4  ;;  %v3407_v3 = vsub.s32 32, %v3406_v20  ;;  %v3151_v5 = vsel %vm4398_vm7, 0, %v4397_v23  ;;  %v3291_v35 = vand.u32 2139095040, %v7282_v14  ;;  %v7294_v28 = vshrl.u32 %v3404_v18, 5 }
 0x439   : > { %v3245_v52 = vadd.s32 536870912, %v3244_v30  ;;  %v3152_v62 = vsub.s32 32, %v3151_v5  ;;  %v3156_v6 = vsub.s32 4294967266, %v3151_v5  ;;  %v3409_v51 = vshll.u32 %v8245_v12, %v3406_v20 }
 0x43a   : > { %v3410_v49 = vshrl.u32 %v8246_v45, %v3407_v3  ;;  %v3413_v22 = vshrl.u32 %v8247_v63, %v3407_v3  ;;  %v3416_v54 = vshrl.u32 %v8248_v50, %v3407_v3  ;;  %v7304_v33 = vpop.eup %4741  ;;  %v3412_v25 = vshll.u32 %v8246_v45, %v3406_v20 }
 0x43b   : > { %v7299_v10 = vshrl.u32 %v3245_v52, 30  ;;  %8383 = vst [vmem:[#allocation32_spill] sm:$0xff] %v7304_v33  ;;  %v3154_v16 = vshrl.u32 %v3136_v34, %v3152_v62  ;;  %v3157_v60 = vadd.s32 127, %v3156_v6  ;;  %v3419_v39 = vshrl.u32 %v8238_v36, %v3407_v3 }
 0x43c   : > { %v7308_v38 = vpop.eup %4743  ;;  %v3153_v0 = vshll.u32 %v7244_v19, %v3151_v5  ;;  %v3415_v43 = vshll.u32 %v8247_v63, %v3406_v20  ;;  %v3418_v21 = vshll.u32 %v8248_v50, %v3406_v20  ;;  %v3411_v18 = vor.u32 %v3410_v49, %v3409_v51 }
 0x43d   : > { %8384 = vst [vmem:[#allocation29_spill] sm:$0xff] %v7308_v38  ;;  %v3247_v42 = vshll.u32 %v7299_v10, 30  ;;  %v3158_v47 = vshll.u32 %v3157_v60, 23  ;;  %v3414_v23 = vor.u32 %v3413_v22, %v3412_v25  ;;  %v3421_v41 = vshll.u32 %v8238_v36, %v3406_v20 }
 0x43e   : > { %v3417_v52 = vor.u32 %v3416_v54, %v3415_v43  ;;  %v3420_v62 = vor.u32 %v3419_v39, %v3418_v21  ;;  %v3422_v6 = vshrl.u32 %v8239_v15, %v3407_v3  ;;  %v3155_v19 = vor.u32 %v3154_v16, %v3153_v0 }
 0x43f   : > { %v7315_v34 = vsub.s32 %v3244_v30, %v3247_v42  ;;  %v7318_v1 = vpop.eup %4745  ;;  %v3159_v5 = vor.u32 4788187, %v3158_v47  ;;  %v3408_v31 = vshrl.u32 %v8245_v12, %v3407_v3  ;;  %v3292_v4 = vshrl.u32 %v3291_v35, 23 }
 0x440   : > { %8385 = vst [vmem:[#allocation31_spill] sm:$0xff] %v7318_v1  ;;  %v7321_v33 = vpop.eup %4747  ;;  %v3270_v49 = vsub.s32 4, %v7299_v10  ;;  %v3423_v20 = vor.u32 %v3422_v6, %v3421_v41  ;;  %vm3424_vm14 = vcmp.lt.s32.totalorder %v7294_v28, 1  ;;  %vm3186_vm1 = vcmp.lt.s32.totalorder %v7083_v11, 0 }
 0x441   : > { %8386 = vst [vmem:[#allocation14_spill] sm:$0xff] %v7321_v33  ;;  %v3250_v51 = vsub.s32 0, %v7315_v34  ;;  %v7326_v30 = vpop.eup %4749  ;;  %v3160_v22 = vand.u32 2147483647, %v3159_v5  ;;  %vm3426_vm6 = vcmp.lt.s32.totalorder %v7294_v28, 3  ;;  %vm3427_vm12 = vcmp.lt.s32.totalorder %v7294_v28, 4 }
 0x442   : > { %v3432_v3 = vsel %vm3424_vm14, %v3411_v18, %v3414_v23  ;;  %v3429_v54 = vsel %vm3427_vm12, %v3417_v52, 2102212464  ;;  %v3433_v16 = vsel %vm3427_vm12, %v3420_v62, 920167782  ;;  %v3436_v60 = vsel %vm3424_vm14, %v3414_v23, %v3417_v52 }
 0x443   : > { %v4400_v35 = vmin.u32 %v3250_v51, %v7315_v34  ;;  %v3162_v25 = vcvt.s32.f32 %v3155_v19  ;;  %vm3425_vm5 = vcmp.lt.s32.totalorder %v7294_v28, 2  ;;  %v3434_v39 = vsel %vm3426_vm6, %v3417_v52, %v3433_v16 }
 0x444   : > { %v3437_v0 = vsel %vm3427_vm12, %v3423_v20, 1326507024  ;;  %v8387_v42 = vand.u32 2147483647, %v7083_v11  ;;  %v3428_v47 = vsel %vm3424_vm14, %v3408_v31, %v3411_v18  ;;  %v3435_v41 = vsel %vm3425_vm5, %v3432_v3, %v3434_v39 }
 0x445   : > { %v3252_v21 = vclz %v4400_v35  ;;  %v3438_v6 = vsel %vm3426_vm6, %v3420_v62, %v3437_v0  ;;  %vm8208_vm11 = vcmp.lt.s32.totalorder %v6913_v7, 0  ;;  %v3430_v52 = vsel %vm3426_vm6, %v3414_v23, %v3429_v54  ;;  %v7365_v62 = vpop.permute.xlu1 %2158 }
 0x446   : > { %vm7341_vm0 = vcmp.le.f32.partialorder %v8387_v42, 0.7853982  ;;  %v3439_v19 = vsel %vm3425_vm5, %v3436_v60, %v3438_v6  ;;  %v7357_v5 = vmul.u32.u64.low %v7290_v61, %v3435_v41  ;;  %v7358_v51 = vmul.u32.u64.high %v7290_v61, %v3435_v41, %v7357_v5 }
 0x447   : > { %v3163_v31 = vmul.f32 %v3162_v25, %v3160_v22  ;;  %v4401_v18 = vadd.s32 4294967294, %v3252_v21  ;;  %v7362_v20 = vmul.u32.u64.low %v7290_v61, %v3439_v19  ;;  %v7363_v3 = vmul.u32.u64.high %v7290_v61, %v3439_v19, %v7362_v20 }
 0x448   : > { %4751 = vsinq.f32 %v7275_v8  ;;  %v4403_v35 = vadd.s32 4294967169, %v3292_v4  ;;  %v7370_v23 = vadd.f32 %v6765_v40, %v7071_v48  ;;  %v7374_v54 = vadd.f32 %v6896_v56, %v7365_v62 }
 0x449   : > { %v3240_v22 = vadd.s32 %v7247_v17, %v7259_v59  ;;  %vm4402_vm3 = vcmp.lt.s32.totalorder %v4401_v18, 0  ;;  %v3431_v16 = vsel %vm3425_vm5, %v3428_v47, %v3430_v52  ;;  %v7382_v60 = vadd.f32 %v6970_v58, %v7365_v62 }
 0x44a   : > { %v3255_v8 = vsel %vm4402_vm3, 0, %v4401_v18  ;;  %v3450_v4 = vadd.s32 1, %v7358_v51  ;;  %v8390_v40 = vand.u32 2147483647, %v7282_v14  ;;  %v3298_v56 = vadd.s32 1, %v4403_v35 }
 0x44b   : > { %v8391_v25 = vand.u32 2147483647, %v6913_v7  ;;  %v8392_v17 = vmov 0  ;;  %v3164_v59 = vxor.u32 2147483648, %v3163_v31  ;;  %v3256_v28 = vsub.s32 32, %v3255_v8 }
 0x44c   : > { %v7387_v48 = vand.u32 8388607, %v8390_v40  ;;  %v3260_v39 = vsub.s32 4294967266, %v3255_v8  ;;  %v7398_v58 = vsel %vm3186_vm1, %v3270_v49, %v7299_v10  ;;  %v3257_v0 = vshll.u32 %v7315_v34, %v3255_v8 }
 0x44d   : > { %vm7391_vm7 = vcmp.le.f32.partialorder %v8391_v25, 0.7853982  ;;  %v3447_v42 = vmul.u32 %v7290_v61, %v3431_v16  ;;  %vm3449_vm14 = vc.u32 %v7363_v3, %v7357_v5  ;;  %vm3299_vm6 = vcmp.gt.s32.totalorder %v3298_v56, 0 }
 0x44e   : > { %v8393_v17 = vsel %vm7391_vm7, 4294967295, %v8392_v17  ;;  %v3258_v21 = vshrl.u32 %v3240_v22, %v3256_v28  ;;  %v3261_v47 = vadd.s32 127, %v3260_v39  ;;  %v3451_v41 = vsel %vm3449_vm14, %v3450_v4, %v7358_v51 }
 0x44f   : > { %8394 = vst [vmem:[#allocation35_spill] sm:$0xff] %v8393_v17  ;;  %v3300_v6 = vsel %vm3299_vm6, %v3298_v56, 0  ;;  %v3452_v19 = vadd.s32 %v3451_v41, %v3447_v42  ;;  %v3165_v61 = vsel %vm8208_vm11, %v3164_v59, %v3163_v31  ;;  %v3296_v20 = vor.u32 8388608, %v7387_v48 }
 0x450   : > { %v3302_v10 = vand.u32 31, %v3300_v6  ;;  %v3259_v34 = vor.u32 %v3258_v21, %v3257_v0  ;;  %v3262_v18 = vshll.u32 %v3261_v47, 23  ;;  %v3301_v22 = vshrl.u32 %v3300_v6, 5 }
 0x451   : > { %v3453_v35 = vadd.s32 536870912, %v3452_v19  ;;  %v3499_v51 = vand.u32 2139095040, %v7370_v23  ;;  %v7426_v47 = vsel %vm7391_vm7, %v6913_v7, %v3165_v61  ;;  %v8395_v33 = vand.u32 2147483647, %v7370_v23 }
 0x452   : > { %v3303_v16 = vsub.s32 32, %v3302_v10  ;;  %v3263_v8 = vor.u32 4788187, %v3262_v18  ;;  %v3266_v4 = vcvt.s32.f32 %v3259_v34  ;;  %v3305_v40 = vshll.u32 %v8245_v12, %v3302_v10  ;;  %v7415_v25 = vpop.eup %4751 }
 0x453   : > { %v3308_v56 = vshll.u32 %v8246_v45, %v3302_v10  ;;  %v3454_v28 = vshrl.u32 %v3453_v35, 30  ;;  %v3311_v48 = vshll.u32 %v8247_v63, %v3302_v10  ;;  %v3314_v42 = vshll.u32 %v8248_v50, %v3302_v10 }
 0x454   : > { %v3306_v31 = vshrl.u32 %v8246_v45, %v3303_v16  ;;  %v3309_v59 = vshrl.u32 %v8247_v63, %v3303_v16  ;;  %v3264_v39 = vand.u32 2147483647, %v3263_v8  ;;  %v3312_v0 = vshrl.u32 %v8248_v50, %v3303_v16 }
 0x455   : > { %v3315_v21 = vshrl.u32 %v8238_v36, %v3303_v16  ;;  %v3455_v41 = vshll.u32 %v3454_v28, 30  ;;  %v3318_v49 = vshrl.u32 %v8239_v15, %v3303_v16  ;;  %v3317_v1 = vshll.u32 %v8238_v36, %v3302_v10 }
 0x456   : > { %v3307_v6 = vor.u32 %v3306_v31, %v3305_v40  ;;  %v3310_v34 = vor.u32 %v3309_v59, %v3308_v56  ;;  %v3267_v18 = vmul.f32 %v3266_v4, %v3264_v39  ;;  %v3313_v35 = vor.u32 %v3312_v0, %v3311_v48 }
 0x457   : > { %v3316_v52 = vor.u32 %v3315_v21, %v3314_v42  ;;  %v7429_v8 = vsub.s32 %v3452_v19, %v3455_v41  ;;  %v3503_v38 = vand.u32 8388607, %v8395_v33  ;;  %4753 = vcosq.f32 %v7426_v47 }
 0x458   : > { %vm3394_vm12 = vcmp.lt.s32.totalorder %v7120_v26, 0  ;;  %v3304_v61 = vshrl.u32 %v8245_v12, %v3303_v16  ;;  %vm3320_vm5 = vcmp.lt.s32.totalorder %v3301_v22, 1  ;;  %v3500_v4 = vshrl.u32 %v3499_v51, 23 }
 0x459   : > { %v3268_v40 = vxor.u32 2147483648, %v3267_v18  ;;  %v3458_v56 = vsub.s32 0, %v7429_v8  ;;  %v3319_v19 = vor.u32 %v3318_v49, %v3317_v1  ;;  %vm3323_vm3 = vcmp.lt.s32.totalorder %v3301_v22, 4 }
 0x45a   : > { %vm3322_vm14 = vcmp.lt.s32.totalorder %v3301_v22, 3  ;;  %v3325_v10 = vsel %vm3323_vm3, %v3313_v35, 2102212464  ;;  %v3328_v33 = vsel %vm3320_vm5, %v3307_v6, %v3310_v34  ;;  %v3329_v31 = vsel %vm3323_vm3, %v3316_v52, 920167782 }
 0x45b   : > { %v4408_v59 = vmin.u32 %v3458_v56, %v7429_v8  ;;  %vm3321_vm6 = vcmp.lt.s32.totalorder %v3301_v22, 2  ;;  %v3330_v48 = vsel %vm3322_vm14, %v3313_v35, %v3329_v31  ;;  %v3336_v16 = vshll.u32 %v3296_v20, 8 }
 0x45c   : > { %v3324_v51 = vsel %vm3320_vm5, %v3304_v61, %v3307_v6  ;;  %v3326_v39 = vsel %vm3322_vm14, %v3310_v34, %v3325_v10  ;;  %v3331_v1 = vsel %vm3321_vm6, %v3328_v33, %v3330_v48  ;;  %v3332_v49 = vsel %vm3320_vm5, %v3310_v34, %v3313_v35 }
 0x45d   : > { %v3269_v0 = vsel %vm3186_vm1, %v3268_v40, %v3267_v18  ;;  %v3460_v42 = vclz %v4408_v59  ;;  %v3478_v21 = vsub.s32 4, %v3454_v28  ;;  %v3333_v41 = vsel %vm3323_vm3, %v3319_v19, 1326507024 }
 0x45e   : > { %v3334_v56 = vsel %vm3322_vm14, %v3316_v52, %v3333_v41  ;;  %v7452_v29 = vmul.u32.u64.low %v3336_v16, %v3331_v1  ;;  %v7453_v31 = vmul.u32.u64.high %v3336_v16, %v3331_v1, %v7452_v29  ;;  %v4411_v20 = vadd.s32 4294967169, %v3500_v4 }
 0x45f   : > { %v4409_v6 = vadd.s32 4294967294, %v3460_v42  ;;  %v3327_v61 = vsel %vm3321_vm6, %v3324_v51, %v3326_v39  ;;  %v3335_v10 = vsel %vm3321_vm6, %v3332_v49, %v3334_v56  ;;  %v3504_v34 = vor.u32 8388608, %v3503_v38 }
 0x460   : > { %v7458_v35 = vmul.u32.u64.low %v3336_v16, %v3335_v10  ;;  %v7459_v33 = vmul.u32.u64.high %v3336_v16, %v3335_v10, %v7458_v35  ;;  %v3506_v18 = vadd.s32 1, %v4411_v20  ;;  %v3603_v40 = vand.u32 2139095040, %v7374_v54 }
 0x461   : > { %v7465_v52 = vsel %vm7341_vm0, %v7083_v11, %v3269_v0  ;;  %v3448_v4 = vadd.s32 %v7357_v5, %v7363_v3  ;;  %vm4410_vm1 = vcmp.lt.s32.totalorder %v4409_v6, 0  ;;  %v7471_v22 = vsel %vm3394_vm12, %v3478_v21, %v3454_v28  ;;  %v7473_v38 = vpop.eup %4753 }
 0x462   : > { %8396 = vst [vmem:[#allocation30_spill] sm:$0xff] %v7473_v38  ;;  %v3463_v19 = vsel %vm4410_vm1, 0, %v4409_v6  ;;  %v3343_v59 = vmul.u32 %v3336_v16, %v3327_v61  ;;  %v3346_v48 = vadd.s32 1, %v7453_v31  ;;  %vm3507_vm5 = vcmp.gt.s32.totalorder %v3506_v18, 0 }
 0x463   : > { %v3464_v51 = vsub.s32 32, %v3463_v19  ;;  %v3468_v39 = vsub.s32 4294967266, %v3463_v19  ;;  %v3508_v1 = vsel %vm3507_vm5, %v3506_v18, 0  ;;  %v7476_v49 = vshll.u32 %v3504_v34, 8 }
 0x464   : > { %vm3345_vm3 = vc.u32 %v7459_v33, %v7452_v29  ;;  %v3510_v5 = vand.u32 31, %v3508_v1  ;;  %v3604_v3 = vshrl.u32 %v3603_v40, 23  ;;  %v8397_v28 = vand.u32 2147483647, %v7374_v54 }
 0x465   : > { %v3465_v42 = vshll.u32 %v7429_v8, %v3463_v19  ;;  %v3466_v16 = vshrl.u32 %v3448_v4, %v3464_v51  ;;  %v3469_v21 = vadd.s32 127, %v3468_v39  ;;  %v3347_v41 = vsel %vm3345_vm3, %v3346_v48, %v7453_v31 }
 0x466   : > { %v7482_v0 = vand.u32 8388607, %v8397_v28  ;;  %v3348_v56 = vadd.s32 %v3347_v41, %v3343_v59  ;;  %v3509_v20 = vshrl.u32 %v3508_v1, 5  ;;  %v3511_v6 = vsub.s32 32, %v3510_v5 }
 0x467   : > { %v3513_v61 = vshll.u32 %v8245_v12, %v3510_v5  ;;  %v3467_v10 = vor.u32 %v3466_v16, %v3465_v42  ;;  %v3470_v34 = vshll.u32 %v3469_v21, 23  ;;  %v3516_v35 = vshll.u32 %v8246_v45, %v3510_v5 }
 0x468   : > { %v3519_v18 = vshll.u32 %v8247_v63, %v3510_v5  ;;  %v3349_v40 = vadd.s32 536870912, %v3348_v56  ;;  %v3514_v28 = vshrl.u32 %v8246_v45, %v3511_v6  ;;  %v3517_v8 = vshrl.u32 %v8247_v63, %v3511_v6 }
 0x469   : > { %v3522_v4 = vshll.u32 %v8248_v50, %v3510_v5  ;;  %v3471_v19 = vor.u32 4788187, %v3470_v34  ;;  %v3474_v31 = vcvt.s32.f32 %v3467_v10  ;;  %v3520_v59 = vshrl.u32 %v8248_v50, %v3511_v6 }
 0x46a   : > { %v3523_v48 = vshrl.u32 %v8238_v36, %v3511_v6  ;;  %v8398_v51 = vand.u32 2147483647, %v7120_v26  ;;  %v7500_v1 = vshrl.u32 %v3349_v40, 30  ;;  %v3515_v42 = vor.u32 %v3514_v28, %v3513_v61 }
 0x46b   : > { %v3518_v16 = vor.u32 %v3517_v8, %v3516_v35  ;;  %v3525_v21 = vshll.u32 %v8238_v36, %v3510_v5  ;;  %v3472_v41 = vand.u32 2147483647, %v3471_v19  ;;  %v3521_v11 = vor.u32 %v3520_v59, %v3519_v18 }
 0x46c   : > { %vm7496_vm14 = vcmp.le.f32.partialorder %v8398_v51, 0.7853982  ;;  %v3524_v34 = vor.u32 %v3523_v48, %v3522_v4  ;;  %v3526_v10 = vshrl.u32 %v8239_v15, %v3511_v6  ;;  %v3351_v38 = vshll.u32 %v7500_v1, 30 }
 0x46d   : > { %v3512_v17 = vshrl.u32 %v8245_v12, %v3511_v6  ;;  %vm3528_vm6 = vcmp.lt.s32.totalorder %v3509_v20, 1  ;;  %v4415_v51 = vadd.s32 4294967169, %v3604_v3  ;;  %v3475_v7 = vmul.f32 %v3474_v31, %v3472_v41 }
 0x46e   : > { %v3527_v37 = vor.u32 %v3526_v10, %v3525_v21  ;;  %vm3530_vm1 = vcmp.lt.s32.totalorder %v3509_v20, 3  ;;  %vm3531_vm5 = vcmp.lt.s32.totalorder %v3509_v20, 4  ;;  %v7506_v40 = vsub.s32 %v3348_v56, %v3351_v38 }
 0x46f   : > { %v3533_v61 = vsel %vm3531_vm5, %v3521_v11, 2102212464  ;;  %v3536_v35 = vsel %vm3528_vm6, %v3515_v42, %v3518_v16  ;;  %v3537_v5 = vsel %vm3531_vm5, %v3524_v34, 920167782  ;;  %vm3529_vm3 = vcmp.lt.s32.totalorder %v3509_v20, 2 }
 0x470   : > { %v3532_v18 = vsel %vm3528_vm6, %v3512_v17, %v3515_v42  ;;  %v3538_v28 = vsel %vm3530_vm1, %v3521_v11, %v3537_v5  ;;  %v3540_v8 = vsel %vm3528_vm6, %v3518_v16, %v3521_v11  ;;  %v3476_v4 = vxor.u32 2147483648, %v3475_v7 }
 0x471   : > { %v3354_v19 = vsub.s32 0, %v7506_v40  ;;  %v3539_v6 = vsel %vm3529_vm3, %v3536_v35, %v3538_v28  ;;  %v3541_v59 = vsel %vm3531_vm5, %v3527_v37, 1326507024  ;;  %v3534_v3 = vsel %vm3530_vm1, %v3518_v16, %v3533_v61 }
 0x472   : > { %v3542_v31 = vsel %vm3530_vm1, %v3524_v34, %v3541_v59  ;;  %v7511_v48 = vmul.u32.u64.low %v7476_v49, %v3539_v6  ;;  %v7512_v21 = vmul.u32.u64.high %v7476_v49, %v3539_v6, %v7511_v48  ;;  %4755 = vsinq.f32 %v7426_v47 }
 0x473   : > { %v8401_v17 = vsel %vm7341_vm0, 0, %v7398_v58  ;;  %v4404_v38 = vmin.u32 %v3354_v19, %v7506_v40  ;;  %v3543_v56 = vsel %vm3529_vm3, %v3540_v8, %v3542_v31  ;;  %4757 = vcosq.f32 %v7465_v52 }
 0x474   : > { %v7520_v11 = vadd.s32 3, %v8401_v17  ;;  %v7529_v42 = vmul.u32.u64.low %v7476_v49, %v3543_v56  ;;  %v7530_v16 = vmul.u32.u64.high %v7476_v49, %v3543_v56, %v7529_v42  ;;  %v3535_v43 = vsel %vm3529_vm3, %v3532_v18, %v3534_v3 }
 0x475   : > { %v3356_v47 = vclz %v4404_v38  ;;  %v3610_v58 = vadd.s32 1, %v4415_v51  ;;  %v8204_v41 = vand.u32 2147483647, %v7382_v60  ;;  %v3477_v34 = vsel %vm3394_vm12, %v3476_v4, %v3475_v7 }
 0x476   : > { %8402 = vst [vmem:[#allocation33_spill] sm:$0xff] %v7520_v11  ;;  %v3554_v10 = vadd.s32 1, %v7512_v21  ;;  %v3608_v61 = vor.u32 8388608, %v7482_v0  ;;  %v3811_v35 = vand.u32 2139095040, %v7382_v60  ;;  %4759 = vsinq.f32 %v7465_v52 }
 0x477   : > { %v3344_v5 = vadd.s32 %v7452_v29, %v7459_v33  ;;  %v4405_v28 = vadd.s32 4294967294, %v3356_v47  ;;  %vm3611_vm0 = vcmp.gt.s32.totalorder %v3610_v58, 0  ;;  %v3551_v20 = vmul.u32 %v7476_v49, %v3535_v43 }
 0x478   : > { %vm3553_vm6 = vc.u32 %v7530_v16, %v7511_v48  ;;  %v3612_v51 = vsel %vm3611_vm0, %v3610_v58, 0  ;;  %v3812_v7 = vshrl.u32 %v3811_v35, 23  ;;  %v7548_v0 = vsel %vm7496_vm14, %v7120_v26, %v3477_v34 }
 0x479   : > { %vm4406_vm12 = vcmp.lt.s32.totalorder %v4405_v28, 0  ;;  %v3555_v52 = vsel %vm3553_vm6, %v3554_v10, %v7512_v21  ;;  %v3614_v18 = vand.u32 31, %v3612_v51  ;;  %v7551_v33 = vshll.u32 %v3608_v61, 8 }
 0x47a   : > { %v3359_v8 = vsel %vm4406_vm12, 0, %v4405_v28  ;;  %v3556_v29 = vadd.s32 %v3555_v52, %v3551_v20  ;;  %v7555_v49 = vand.u32 8388607, %v8204_v41  ;;  %v7557_v6 = vshrl.u32 %v3612_v51, 5 }
 0x47b   : > { %v3360_v4 = vsub.s32 32, %v3359_v8  ;;  %v3364_v19 = vsub.s32 4294967266, %v3359_v8  ;;  %v3615_v59 = vsub.s32 32, %v3614_v18  ;;  %v3361_v3 = vshll.u32 %v7506_v40, %v3359_v8 }
 0x47c   : > { %v3557_v31 = vadd.s32 536870912, %v3556_v29  ;;  %v3617_v17 = vshll.u32 %v8245_v12, %v3614_v18  ;;  %v4423_v21 = vadd.s32 4294967169, %v3812_v7  ;;  %v7561_v38 = vpop.eup %4755  ;;  %v3620_v43 = vshll.u32 %v8246_v45, %v3614_v18 }
 0x47d   : > { %v3362_v56 = vshrl.u32 %v3344_v5, %v3360_v4  ;;  %v3365_v42 = vadd.s32 127, %v3364_v19  ;;  %v3618_v47 = vshrl.u32 %v8246_v45, %v3615_v59  ;;  %v7565_v58 = vpop.eup %4757  ;;  %v3621_v10 = vshrl.u32 %v8247_v63, %v3615_v59 }
 0x47e   : > { %8403 = vst [vmem:[#allocation36_spill] sm:$0xff] %v7565_v58  ;;  %v7567_v34 = vshrl.u32 %v3557_v31, 30  ;;  %v3623_v40 = vshll.u32 %v8247_v63, %v3614_v18  ;;  %v3624_v61 = vshrl.u32 %v8248_v50, %v3615_v59  ;;  %v3626_v20 = vshll.u32 %v8248_v50, %v3614_v18 }
 0x47f   : > { %v3363_v35 = vor.u32 %v3362_v56, %v3361_v3  ;;  %v3366_v28 = vshll.u32 %v3365_v42, 23  ;;  %v3627_v5 = vshrl.u32 %v8238_v36, %v3615_v59  ;;  %v3619_v7 = vor.u32 %v3618_v47, %v3617_v17 }
 0x480   : > { %v3559_v51 = vshll.u32 %v7567_v34, 30  ;;  %v3622_v52 = vor.u32 %v3621_v10, %v3620_v43  ;;  %v3625_v8 = vor.u32 %v3624_v61, %v3623_v40  ;;  %v7575_v4 = vpop.eup %4759  ;;  %v3629_v41 = vshll.u32 %v8238_v36, %v3614_v18 }
 0x481   : > { %8404 = vst [vmem:[#allocation15_spill] sm:$0xff] %v7575_v4  ;;  %v3367_v19 = vor.u32 4788187, %v3366_v28  ;;  %v3628_v31 = vor.u32 %v3627_v5, %v3626_v20  ;;  %v3630_v37 = vshrl.u32 %v8239_v15, %v3615_v59  ;;  %v3370_v26 = vcvt.s32.f32 %v3363_v35 }
 0x482   : > { %v7579_v3 = vsub.s32 %v3556_v29, %v3559_v51  ;;  %v3616_v56 = vshrl.u32 %v8245_v12, %v3615_v59  ;;  %vm3632_vm1 = vcmp.lt.s32.totalorder %v7557_v6, 1  ;;  %vm8207_vm5 = vcmp.lt.s32.totalorder %v7282_v14, 0 }
 0x483   : > { %v3368_v17 = vand.u32 2147483647, %v3367_v19  ;;  %v3631_v42 = vor.u32 %v3630_v37, %v3629_v41  ;;  %vm3634_vm3 = vcmp.lt.s32.totalorder %v7557_v6, 3  ;;  %vm3635_vm0 = vcmp.lt.s32.totalorder %v7557_v6, 4 }
 0x484   : > { %v3562_v47 = vsub.s32 0, %v7579_v3  ;;  %v3637_v18 = vsel %vm3635_vm0, %v3625_v8, 2102212464  ;;  %v3640_v43 = vsel %vm3632_vm1, %v3619_v7, %v3622_v52  ;;  %v3641_v29 = vsel %vm3635_vm0, %v3628_v31, 920167782 }
 0x485   : > { %v3371_v10 = vmul.f32 %v3370_v26, %v3368_v17  ;;  %vm3633_vm6 = vcmp.lt.s32.totalorder %v7557_v6, 2  ;;  %v3642_v59 = vsel %vm3634_vm3, %v3625_v8, %v3641_v29  ;;  %v3644_v37 = vsel %vm3632_vm1, %v3622_v52, %v3625_v8 }
 0x486   : > { %v8405_v41 = vand.u32 2147483647, %v7282_v14  ;;  %v4412_v61 = vmin.u32 %v3562_v47, %v7579_v3  ;;  %v3636_v35 = vsel %vm3632_vm1, %v3616_v56, %v3619_v7  ;;  %v3643_v26 = vsel %vm3633_vm6, %v3640_v43, %v3642_v59 }
 0x487   : > { %v3645_v28 = vsel %vm3635_vm0, %v3631_v42, 1326507024  ;;  %v3638_v20 = vsel %vm3634_vm3, %v3622_v52, %v3637_v18  ;;  %v7610_v51 = vmul.u32.u64.low %v7551_v33, %v3643_v26  ;;  %v7611_v8 = vmul.u32.u64.high %v7551_v33, %v3643_v26, %v7610_v51 }
 0x488   : > { %vm7596_vm12 = vcmp.le.f32.partialorder %v8405_v41, 0.7853982  ;;  %v3646_v5 = vsel %vm3634_vm3, %v3628_v31, %v3645_v28  ;;  %v3372_v19 = vxor.u32 2147483648, %v3371_v10  ;;  %v3564_v17 = vclz %v4412_v61 }
 0x489   : > { %v3647_v7 = vsel %vm3633_vm6, %v3644_v37, %v3646_v5  ;;  %v3818_v56 = vadd.s32 1, %v4423_v21  ;;  %4761 = vcosq.f32 %v7548_v0  ;;  %v8408_v52 = vsel %vm7496_vm14, 0, %v7471_v22 }
 0x48a   : > { %v7621_v42 = vadd.s32 3, %v8408_v52  ;;  %v7624_v31 = vmul.u32.u64.low %v7551_v33, %v3647_v7  ;;  %v7625_v47 = vmul.u32.u64.high %v7551_v33, %v3647_v7, %v7624_v31  ;;  %v4413_v18 = vadd.s32 4294967294, %v3564_v17 }
 0x48b   : > { %v3639_v43 = vsel %vm3633_vm6, %v3636_v35, %v3638_v20  ;;  %v3816_v29 = vor.u32 8388608, %v7555_v49  ;;  %vm3819_vm1 = vcmp.gt.s32.totalorder %v3818_v56, 0  ;;  %4763 = vsinq.f32 %v7548_v0 }
 0x48c   : > { %8409 = vst [vmem:[#allocation37_spill] sm:$0xff] %v7621_v42  ;;  %v3658_v21 = vadd.s32 1, %v7611_v8  ;;  %v3820_v39 = vsel %vm3819_vm1, %v3818_v56, 0  ;;  %v7634_v22 = vadd.f32 %v7069_v24, %v7365_v62  ;;  %v3373_v59 = vsel %vm8207_vm5, %v3372_v19, %v3371_v10 }
 0x48d   : > { %vm4414_vm14 = vcmp.lt.s32.totalorder %v4413_v18, 0  ;;  %v3822_v37 = vand.u32 31, %v3820_v39  ;;  %v7640_v6 = vadd.f32 %v7197_v46, %v7365_v62  ;;  %v3552_v49 = vadd.s32 %v7511_v48, %v7530_v16 }
 0x48e   : > { %v3567_v0 = vsel %vm4414_vm14, 0, %v4413_v18  ;;  %v3655_v41 = vmul.u32 %v7551_v33, %v3639_v43  ;;  %vm3657_vm3 = vc.u32 %v7625_v47, %v7610_v51  ;;  %v7648_v10 = vshll.u32 %v3816_v29, 8 }
 0x48f   : > { %v3568_v24 = vsub.s32 32, %v3567_v0  ;;  %v3572_v61 = vsub.s32 4294967266, %v3567_v0  ;;  %v3659_v35 = vsel %vm3657_vm3, %v3658_v21, %v7611_v8  ;;  %v7653_v46 = vsel %vm7596_vm12, %v7282_v14, %v3373_v59 }
 0x490   : > { %v3569_v62 = vshll.u32 %v7579_v3, %v3567_v0  ;;  %v3660_v48 = vadd.s32 %v3659_v35, %v3655_v41  ;;  %v3823_v16 = vsub.s32 32, %v3822_v37  ;;  %vm3602_vm0 = vcmp.lt.s32.totalorder %v7374_v54, 0 }
 0x491   : > { %v3570_v26 = vshrl.u32 %v3552_v49, %v3568_v24  ;;  %v3573_v33 = vadd.s32 127, %v3572_v61  ;;  %v3825_v28 = vshll.u32 %v8245_v12, %v3822_v37  ;;  %v3828_v20 = vshll.u32 %v8246_v45, %v3822_v37 }
 0x492   : > { %v3661_v5 = vadd.s32 536870912, %v3660_v48  ;;  %v3826_v8 = vshrl.u32 %v8246_v45, %v3823_v16  ;;  %v3829_v19 = vshrl.u32 %v8247_v63, %v3823_v16  ;;  %v3831_v17 = vshll.u32 %v8247_v63, %v3822_v37 }
 0x493   : > { %v3571_v7 = vor.u32 %v3570_v26, %v3569_v62  ;;  %v3574_v56 = vshll.u32 %v3573_v33, 23  ;;  %v3832_v3 = vshrl.u32 %v8248_v50, %v3823_v16  ;;  %v3835_v52 = vshrl.u32 %v8238_v36, %v3823_v16  ;;  %v7664_v31 = vpop.eup %4761 }
 0x494   : > { %8410 = vst [vmem:[#allocation38_spill] sm:$0xff] %v7664_v31  ;;  %v3662_v18 = vshrl.u32 %v3661_v5, 30  ;;  %v3821_v43 = vshrl.u32 %v3820_v39, 5  ;;  %v3827_v29 = vor.u32 %v3826_v8, %v3825_v28  ;;  %v3834_v21 = vshll.u32 %v8248_v50, %v3822_v37 }
 0x495   : > { %v3575_v59 = vor.u32 4788187, %v3574_v56  ;;  %v8411_v49 = vand.u32 2147483647, %v7374_v54  ;;  %v3830_v41 = vor.u32 %v3829_v19, %v3828_v20  ;;  %v3833_v24 = vor.u32 %v3832_v3, %v3831_v17  ;;  %v7674_v35 = vpop.eup %4763 }
 0x496   : > { %v3837_v61 = vshll.u32 %v8238_v36, %v3822_v37  ;;  %8414 = vst [vmem:[#allocation39_spill] sm:$0xff] %v7674_v35  ;;  %vm8214_vm1 = vcmp.lt.s32.totalorder %v7370_v23, 0  ;;  %v3663_v62 = vshll.u32 %v3662_v18, 30  ;;  %v3686_v39 = vsub.s32 4, %v3662_v18 }
 0x497   : > { %vm7669_vm6 = vcmp.le.f32.partialorder %v8411_v49, 0.7853982  ;;  %v3836_v26 = vor.u32 %v3835_v52, %v3834_v21  ;;  %v3838_v33 = vshrl.u32 %v8239_v15, %v3823_v16  ;;  %v3576_v28 = vand.u32 2147483647, %v3575_v59 }
 0x498   : > { %v3578_v5 = vcvt.s32.f32 %v3571_v7  ;;  %v3824_v8 = vshrl.u32 %v8245_v12, %v3823_v16  ;;  %v7680_v49 = vsub.s32 %v3660_v48, %v3663_v62  ;;  %vm3840_vm14 = vcmp.lt.s32.totalorder %v3821_v43, 1 }
 0x499   : > { %v3839_v20 = vor.u32 %v3838_v33, %v3837_v61  ;;  %vm3843_vm3 = vcmp.lt.s32.totalorder %v3821_v43, 4  ;;  %vm3841_vm2 = vcmp.lt.s32.totalorder %v3821_v43, 2  ;;  %v3848_v17 = vsel %vm3840_vm14, %v3827_v29, %v3830_v41 }
 0x49a   : > { %v3579_v37 = vmul.f32 %v3578_v5, %v3576_v28  ;;  %v3845_v19 = vsel %vm3843_vm3, %v3833_v24, 2102212464  ;;  %v8415_v3 = vand.u32 2147483647, %v7370_v23  ;;  %v3666_v16 = vsub.s32 0, %v7680_v49 }
 0x49b   : > { %v3687_v48 = vsel %vm3602_vm0, %v3686_v39, %v3662_v18  ;;  %vm3842_vm11 = vcmp.lt.s32.totalorder %v3821_v43, 3  ;;  %v3849_v7 = vsel %vm3843_vm3, %v3836_v26, 920167782  ;;  %v3844_v59 = vsel %vm3840_vm14, %v3824_v8, %v3827_v29 }
 0x49c   : > { %vm7685_vm5 = vcmp.le.f32.partialorder %v8415_v3, 0.7853982  ;;  %v3580_v21 = vxor.u32 2147483648, %v3579_v37  ;;  %v3850_v61 = vsel %vm3842_vm11, %v3833_v24, %v3849_v7  ;;  %v3852_v62 = vsel %vm3840_vm14, %v3830_v41, %v3833_v24 }
 0x49d   : > { %v4416_v33 = vmin.u32 %v3666_v16, %v7680_v49  ;;  %v3846_v28 = vsel %vm3842_vm11, %v3830_v41, %v3845_v19  ;;  %v3851_v5 = vsel %vm3841_vm2, %v3848_v17, %v3850_v61  ;;  %v3853_v3 = vsel %vm3843_vm3, %v3839_v20, 1326507024 }
 0x49e   : > { %4765 = vcosq.f32 %v7653_v46  ;;  %v3854_v56 = vsel %vm3842_vm11, %v3836_v26, %v3853_v3  ;;  %v7698_v31 = vmul.u32.u64.low %v7648_v10, %v3851_v5  ;;  %v7699_v18 = vmul.u32.u64.high %v7648_v10, %v3851_v5, %v7698_v31 }
 0x49f   : > { %v3668_v39 = vclz %v4416_v33  ;;  %v3689_v29 = vsel %vm7669_vm6, 0, %v3687_v48  ;;  %v3855_v24 = vsel %vm3841_vm2, %v3852_v62, %v3854_v56  ;;  %v3707_v8 = vand.u32 2139095040, %v7634_v22 }
 0x4a0   : > { %v3581_v41 = vsel %vm8214_vm1, %v3580_v21, %v3579_v37  ;;  %v3847_v20 = vsel %vm3841_vm2, %v3844_v59, %v3846_v28  ;;  %v7709_v19 = vmul.u32.u64.low %v7648_v10, %v3855_v24  ;;  %v7710_v26 = vmul.u32.u64.high %v7648_v10, %v3855_v24, %v7709_v19 }
 0x4a1   : > { %v4417_v17 = vadd.s32 4294967294, %v3668_v39  ;;  %v3708_v16 = vshrl.u32 %v3707_v8, 23  ;;  %v8418_v7 = vand.u32 2147483647, %v7634_v22  ;;  %v8210_v48 = vand.u32 2147483647, %v7640_v6 }
 0x4a2   : > { %4767 = vsinq.f32 %v7653_v46  ;;  %v3656_v56 = vadd.s32 %v7610_v51, %v7625_v47  ;;  %v3866_v37 = vadd.s32 1, %v7699_v18  ;;  %v3915_v43 = vand.u32 2139095040, %v7640_v6 }
 0x4a3   : > { %v3711_v61 = vand.u32 8388607, %v8418_v7  ;;  %vm4418_vm2 = vcmp.lt.s32.totalorder %v4417_v17, 0  ;;  %v7720_v21 = vadd.s32 3, %v3689_v29  ;;  %v4419_v59 = vadd.s32 4294967169, %v3708_v16 }
 0x4a4   : > { %v3919_v62 = vand.u32 8388607, %v8210_v48  ;;  %v3584_v33 = vsel %vm7685_vm5, %v7370_v23, %v3581_v41  ;;  %v3671_v28 = vsel %vm4418_vm2, 0, %v4417_v17  ;;  %v3863_v46 = vmul.u32 %v7648_v10, %v3847_v20 }
 0x4a5   : > { %8419 = vst [vmem:[#allocation40_spill] sm:$0xff] %v7720_v21  ;;  %vm3865_vm11 = vc.u32 %v7710_v26, %v7698_v31  ;;  %v3672_v51 = vsub.s32 32, %v3671_v28  ;;  %v3676_v47 = vsub.s32 4294967266, %v3671_v28  ;;  %v3712_v3 = vor.u32 8388608, %v3711_v61 }
 0x4a6   : > { %v3867_v5 = vsel %vm3865_vm11, %v3866_v37, %v7699_v18  ;;  %v3673_v39 = vshll.u32 %v7680_v49, %v3671_v28  ;;  %v3714_v24 = vadd.s32 1, %v4419_v59  ;;  %v3916_v8 = vshrl.u32 %v3915_v43, 23 }
 0x4a7   : > { %v3868_v29 = vadd.s32 %v3867_v5, %v3863_v46  ;;  %v3674_v19 = vshrl.u32 %v3656_v56, %v3672_v51  ;;  %v3677_v16 = vadd.s32 127, %v3676_v47  ;;  %vm3810_vm14 = vcmp.lt.s32.totalorder %v7382_v60, 0 }
 0x4a8   : > { %v3920_v41 = vor.u32 8388608, %v3919_v62  ;;  %v2542_v17 = vsub.s32 4, %v6710_v53  ;;  %v7733_v10 = vpop.eup %4765  ;;  %4769 = vcosq.f32 %v3584_v33  ;;  %vm3715_vm3 = vcmp.gt.s32.totalorder %v3714_v24, 0 }
 0x4a9   : > { %v3869_v20 = vadd.s32 536870912, %v3868_v29  ;;  %v4427_v7 = vadd.s32 4294967169, %v3916_v8  ;;  %4771 = vsinq.f32 %v3584_v33  ;;  %v3675_v18 = vor.u32 %v3674_v19, %v3673_v39 }
 0x4aa   : > { %v3678_v61 = vshll.u32 %v3677_v16, 23  ;;  %v3716_v49 = vsel %vm3715_vm3, %v3714_v24, 0  ;;  %v8420_v37 = vand.u32 2147483647, %v7382_v60  ;;  %v7742_v43 = vadd.s32 %v7698_v31, %v7710_v26 }
 0x4ab   : > { %v3870_v59 = vshrl.u32 %v3869_v20, 30  ;;  %v3718_v62 = vand.u32 31, %v3716_v49  ;;  %v7747_v28 = vsel %vm2458_vm4, %v2542_v17, %v6710_v53  ;;  %v7749_v46 = vshrl.u32 %v3716_v49, 5 }
 0x4ac   : > { %vm7737_vm2 = vcmp.le.f32.partialorder %v8420_v37, 0.7853982  ;;  %v3679_v33 = vor.u32 4788187, %v3678_v61  ;;  %v7751_v51 = vshll.u32 %v3712_v3, 8  ;;  %v7753_v47 = vshll.u32 %v3920_v41, 8  ;;  %v7755_v5 = vpop.eup %4767 }
 0x4ad   : > { %v3871_v39 = vshll.u32 %v3870_v59, 30  ;;  %v3894_v24 = vsub.s32 4, %v3870_v59  ;;  %v3719_v31 = vsub.s32 32, %v3718_v62  ;;  %v3922_v26 = vadd.s32 1, %v4427_v7 }
 0x4ae   : > { %v3680_v8 = vand.u32 2147483647, %v3679_v33  ;;  %v3682_v19 = vcvt.s32.f32 %v3675_v18  ;;  %v3721_v3 = vshll.u32 %v8245_v12, %v3718_v62  ;;  %v3724_v20 = vshll.u32 %v8246_v45, %v3718_v62 }
 0x4af   : > { %v7761_v17 = vsub.s32 %v3868_v29, %v3871_v39  ;;  %v3722_v41 = vshrl.u32 %v8246_v45, %v3719_v31  ;;  %v3725_v49 = vshrl.u32 %v8247_v63, %v3719_v31  ;;  %v3727_v7 = vshll.u32 %v8247_v63, %v3718_v62 }
 0x4b0   : > { %v3683_v61 = vmul.f32 %v3682_v19, %v3680_v8  ;;  %v3728_v18 = vshrl.u32 %v8248_v50, %v3719_v31  ;;  %v3895_v33 = vsel %vm3810_vm14, %v3894_v24, %v3870_v59  ;;  %v3730_v29 = vshll.u32 %v8248_v50, %v3718_v62 }
 0x4b1   : > { %v3874_v37 = vsub.s32 0, %v7761_v17  ;;  %v3731_v39 = vshrl.u32 %v8238_v36, %v3719_v31  ;;  %v3723_v16 = vor.u32 %v3722_v41, %v3721_v3  ;;  %v3726_v53 = vor.u32 %v3725_v49, %v3724_v20 }
 0x4b2   : > { %v3684_v48 = vxor.u32 2147483648, %v3683_v61  ;;  %v3729_v35 = vor.u32 %v3728_v18, %v3727_v7  ;;  %v7774_v8 = vpop.eup %4769  ;;  %v3733_v21 = vshll.u32 %v8238_v36, %v3718_v62  ;;  %v3734_v58 = vshrl.u32 %v8239_v15, %v3719_v31 }
 0x4b3   : > { %v4424_v19 = vmin.u32 %v3874_v37, %v7761_v17  ;;  %v3732_v42 = vor.u32 %v3731_v39, %v3730_v29  ;;  %v7779_v4 = vpop.eup %4771  ;;  %v3897_v24 = vsel %vm7737_vm2, 0, %v3895_v33  ;;  %v3720_v3 = vshrl.u32 %v8245_v12, %v3719_v31 }
 0x4b4   : > { %v3685_v59 = vsel %vm3602_vm0, %v3684_v48, %v3683_v61  ;;  %vm3736_vm4 = vcmp.lt.s32.totalorder %v7749_v46, 1  ;;  %v3735_v20 = vor.u32 %v3734_v58, %v3733_v21  ;;  %vm3737_vm11 = vcmp.lt.s32.totalorder %v7749_v46, 2 }
 0x4b5   : > { %v3876_v41 = vclz %v4424_v19  ;;  %vm3739_vm3 = vcmp.lt.s32.totalorder %v7749_v46, 4  ;;  %vm3738_vm1 = vcmp.lt.s32.totalorder %v7749_v46, 3  ;;  %v3744_v49 = vsel %vm3736_vm4, %v3723_v16, %v3726_v53 }
 0x4b6   : > { %v3741_v62 = vsel %vm3739_vm3, %v3729_v35, 2102212464  ;;  %v3745_v7 = vsel %vm3739_vm3, %v3732_v42, 920167782  ;;  %v7793_v48 = vsel %vm7669_vm6, %v7374_v54, %v3685_v59  ;;  %v3740_v31 = vsel %vm3736_vm4, %v3720_v3, %v3723_v16 }
 0x4b7   : > { %v4425_v61 = vadd.s32 4294967294, %v3876_v41  ;;  %v3746_v18 = vsel %vm3738_vm1, %v3729_v35, %v3745_v7  ;;  %v3742_v37 = vsel %vm3738_vm1, %v3726_v53, %v3741_v62  ;;  %v3748_v21 = vsel %vm3736_vm4, %v3726_v53, %v3729_v35 }
 0x4b8   : > { %v3747_v58 = vsel %vm3737_vm11, %v3744_v49, %v3746_v18  ;;  %v3749_v33 = vsel %vm3739_vm3, %v3735_v20, 1326507024  ;;  %v7802_v0 = vadd.s32 3, %v3897_v24  ;;  %vm3923_vm6 = vcmp.gt.s32.totalorder %v3922_v26, 0 }
 0x4b9   : > { %vm4426_vm0 = vcmp.lt.s32.totalorder %v4425_v61, 0  ;;  %v3750_v29 = vsel %vm3738_vm1, %v3732_v42, %v3749_v33  ;;  %v7798_v39 = vmul.u32.u64.low %v7751_v51, %v3747_v58  ;;  %v7799_v19 = vmul.u32.u64.high %v7751_v51, %v3747_v58, %v7798_v39 }
 0x4ba   : > { %v3879_v11 = vsel %vm4426_vm0, 0, %v4425_v61  ;;  %v3751_v16 = vsel %vm3737_vm11, %v3748_v21, %v3750_v29  ;;  %v3743_v35 = vsel %vm3737_vm11, %v3740_v31, %v3742_v37  ;;  %v3924_v53 = vsel %vm3923_vm6, %v3922_v26, 0 }
 0x4bb   : > { %v3880_v59 = vsub.s32 32, %v3879_v11  ;;  %v3884_v3 = vsub.s32 4294967266, %v3879_v11  ;;  %4773 = vcosq.f32 %v7793_v48  ;;  %v3926_v20 = vand.u32 31, %v3924_v53 }
 0x4bc   : > { %v7810_v42 = vmul.u32.u64.low %v7751_v51, %v3751_v16  ;;  %v7811_v41 = vmul.u32.u64.high %v7751_v51, %v3751_v16, %v7810_v42  ;;  %v3881_v24 = vshll.u32 %v7761_v17, %v3879_v11  ;;  %v3762_v7 = vadd.s32 1, %v7799_v19 }
 0x4bd   : > { %v3882_v62 = vshrl.u32 %v7742_v43, %v3880_v59  ;;  %v3885_v49 = vadd.s32 127, %v3884_v3  ;;  %v3759_v61 = vmul.u32 %v7751_v51, %v3743_v35  ;;  %v3925_v18 = vshrl.u32 %v3924_v53, 5 }
 0x4be   : > { %v3927_v46 = vsub.s32 32, %v3926_v20  ;;  %v8423_v26 = vsel %vm6878_vm13, 0, %v7747_v28  ;;  %v3929_v21 = vshll.u32 %v8245_v12, %v3926_v20  ;;  %v3932_v11 = vshll.u32 %v8246_v45, %v3926_v20 }
 0x4bf   : > { %v2549_v31 = vadd.s32 3, %v8423_v26  ;;  %v3883_v37 = vor.u32 %v3882_v62, %v3881_v24  ;;  %v3886_v58 = vshll.u32 %v3885_v49, 23  ;;  %vm3761_vm1 = vc.u32 %v7811_v41, %v7798_v39 }
 0x4c0   : > { %v3930_v43 = vshrl.u32 %v8246_v45, %v3927_v46  ;;  %v3935_v51 = vshll.u32 %v8247_v63, %v3926_v20  ;;  %v3938_v17 = vshll.u32 %v8248_v50, %v3926_v20  ;;  %v3763_v2 = vsel %vm3761_vm1, %v3762_v7, %v7799_v19 }
 0x4c1   : > { %v3887_v33 = vor.u32 4788187, %v3886_v58  ;;  %v3933_v28 = vshrl.u32 %v8247_v63, %v3927_v46  ;;  %v3941_v29 = vshll.u32 %v8238_v36, %v3926_v20  ;;  %v3764_v16 = vadd.s32 %v3763_v2, %v3759_v61 }
 0x4c2   : > { %v3931_v59 = vor.u32 %v3930_v43, %v3929_v21  ;;  %v3936_v3 = vshrl.u32 %v8248_v50, %v3927_v46  ;;  %v3939_v35 = vshrl.u32 %v8238_v36, %v3927_v46  ;;  %v3890_v42 = vcvt.s32.f32 %v3883_v37 }
 0x4c3   : > { %v3888_v53 = vand.u32 2147483647, %v3887_v33  ;;  %v3934_v45 = vor.u32 %v3933_v28, %v3932_v11  ;;  %v3942_v24 = vshrl.u32 %v8239_v15, %v3927_v46  ;;  %v3765_v62 = vadd.s32 536870912, %v3764_v16 }
 0x4c4   : > { %v3928_v49 = vshrl.u32 %v8245_v12, %v3927_v46  ;;  %v3937_v26 = vor.u32 %v3936_v3, %v3935_v51  ;;  %v3940_v19 = vor.u32 %v3939_v35, %v3938_v17  ;;  %vm3944_vm13 = vcmp.lt.s32.totalorder %v3925_v18, 1 }
 0x4c5   : > { %v3891_v7 = vmul.f32 %v3890_v42, %v3888_v53  ;;  %v3943_v63 = vor.u32 %v3942_v24, %v3941_v29  ;;  %vm3947_vm4 = vcmp.lt.s32.totalorder %v3925_v18, 4  ;;  %v7835_v20 = vpop.eup %4773  ;;  %v7837_v61 = vshrl.u32 %v3765_v62, 30 }
 0x4c6   : > { %vm3945_vm11 = vcmp.lt.s32.totalorder %v3925_v18, 2  ;;  %v3949_v36 = vsel %vm3947_vm4, %v3937_v26, 2102212464  ;;  %v3952_v50 = vsel %vm3944_vm13, %v3931_v59, %v3934_v45  ;;  %vm3946_vm3 = vcmp.lt.s32.totalorder %v3925_v18, 3 }
 0x4c7   : > { %v3892_v37 = vxor.u32 2147483648, %v3891_v7  ;;  %v3953_v58 = vsel %vm3947_vm4, %v3940_v19, 920167782  ;;  %v3956_v15 = vsel %vm3944_vm13, %v3934_v45, %v3937_v26  ;;  %v3767_v21 = vshll.u32 %v7837_v61, 30 }
 0x4c8   : > { %v3948_v12 = vsel %vm3944_vm13, %v3928_v49, %v3931_v59  ;;  %v3954_v46 = vsel %vm3946_vm3, %v3937_v26, %v3953_v58  ;;  %v3957_v11 = vsel %vm3947_vm4, %v3943_v63, 1326507024  ;;  %v3950_v51 = vsel %vm3946_vm3, %v3934_v45, %v3949_v36 }
 0x4c9   : > { %v3893_v43 = vsel %vm3810_vm14, %v3892_v37, %v3891_v7  ;;  %v3955_v17 = vsel %vm3945_vm11, %v3952_v50, %v3954_v46  ;;  %v3958_v33 = vsel %vm3946_vm3, %v3940_v19, %v3957_v11  ;;  %4775 = vsinq.f32 %v7793_v48 }
 0x4ca   : > { %v7844_v2 = vsub.s32 %v3764_v16, %v3767_v21  ;;  %v3959_v28 = vsel %vm3945_vm11, %v3956_v15, %v3958_v33  ;;  %v2550_v29 = vand.u32 3, %v2549_v31  ;;  %v3896_v59 = vsel %vm7737_vm2, %v7382_v60, %v3893_v43  ;;  %v8426_v21 = vld [vmem:[#allocation34_spill] sm:$0xff]  ;;  %v8429_v33 = vld [vmem:[#allocation28_spill] sm:$0xff] }
 0x4cb   : > { %v7851_v3 = vmul.u32.u64.low %v7753_v47, %v3959_v28  ;;  %v7852_v35 = vmul.u32.u64.high %v7753_v47, %v3959_v28, %v7851_v3  ;;  %v2556_v53 = vxor.u32 2147483648, %v7128_v55  ;;  %v3951_v45 = vsel %vm3945_vm11, %v3948_v12, %v3950_v51  ;;  %v8428_v51 = vld [vmem:[#allocation24_spill] sm:$0xff] }
 0x4cc   : > { %v3770_v42 = vsub.s32 0, %v7844_v2  ;;  %v7858_v48 = vmul.u32.u64.low %v7753_v47, %v3955_v17  ;;  %v7859_v16 = vmul.u32.u64.high %v7753_v47, %v3955_v17, %v7858_v48  ;;  %v3760_v31 = vadd.s32 %v7798_v39, %v7811_v41 }
 0x4cd   : > { %vm2552_vm14 = vcmp.eq.s32.totalorder %v2550_v29, 0  ;;  %vm2555_vm2 = vcmp.eq.s32.totalorder %v2550_v29, 2  ;;  %v2958_v56 = vsub.s32 4, %v7110_v9  ;;  %4777 = vcosq.f32 %v3896_v59 }
 0x4ce   : > { %v4420_v24 = vmin.u32 %v3770_v42, %v7844_v2  ;;  %v8424_v62 = vxor.u32 2147483648, %v7143_v44  ;;  %v2557_v49 = vsel %vm2555_vm2, %v2556_v53, %v7143_v44  ;;  %4779 = vsinq.f32 %v3896_v59 }
 0x4cf   : > { %v3967_v26 = vmul.u32 %v7753_v47, %v3951_v45  ;;  %vm3969_vm0 = vc.u32 %v7852_v35, %v7858_v48  ;;  %v2959_v39 = vsel %vm2874_vm15, %v2958_v56, %v7110_v9  ;;  %v3970_v19 = vadd.s32 1, %v7859_v16  ;;  %v8430_v56 = vld [vmem:[#allocation8_spill] sm:$0xff] }
 0x4d0   : > { %v2554_v18 = vsel %vm2552_vm14, %v7128_v55, %v8424_v62  ;;  %v3772_v41 = vclz %v4420_v24  ;;  %vm2551_vm6 = vcmp.lt.s32.totalorder %v2550_v29, 2  ;;  %v2961_v7 = vsel %vm7238_vm9, 0, %v2959_v39 }
 0x4d1   : > { %vm2548_vm1 = vweird.f32 %v6501_v57  ;;  %v2558_v55 = vsel %vm2551_vm6, %v2554_v18, %v2557_v49  ;;  %vm2964_vm13 = vweird.f32 %v6693_v32  ;;  %v2965_v44 = vadd.s32 3, %v2961_v7 }
 0x4d2   : > { %v2750_v47 = vsub.s32 4, %v6821_v27  ;;  %v4421_v63 = vadd.s32 4294967294, %v3772_v41  ;;  %v3971_v36 = vsel %vm3969_vm0, %v3970_v19, %v7859_v16  ;;  %v2969_v9 = vxor.u32 2147483648, %v7415_v25 }
 0x4d3   : > { %v2972_v50 = vxor.u32 2147483648, %v7326_v30  ;;  %v3972_v37 = vadd.s32 %v3971_v36, %v3967_v26  ;;  %v2966_v58 = vand.u32 3, %v2965_v44  ;;  %v2761_v12 = vxor.u32 2147483648, %v8426_v21  ;;  %v7889_v46 = vpop.eup %4775 }
 0x4d4   : > { %v2751_v15 = vsel %vm2666_vm10, %v2750_v47, %v6821_v27  ;;  %vm4422_vm15 = vcmp.lt.s32.totalorder %v4421_v63, 0  ;;  %v2764_v17 = vxor.u32 2147483648, %v8428_v51  ;;  %v3166_v28 = vsub.s32 4, %v8429_v33 }
 0x4d5   : > { %v2753_v43 = vsel %vm7030_vm8, 0, %v2751_v15  ;;  %v3775_v29 = vsel %vm4422_vm15, 0, %v4421_v63  ;;  %v3973_v59 = vadd.s32 536870912, %v3972_v37  ;;  %vm2967_vm9 = vcmp.lt.s32.totalorder %v2966_v58, 2 }
 0x4d6   : > { %vm2968_vm4 = vcmp.eq.s32.totalorder %v2966_v58, 0  ;;  %v3776_v3 = vsub.s32 32, %v3775_v29  ;;  %v3777_v53 = vshll.u32 %v7844_v2, %v3775_v29  ;;  %v3780_v27 = vsub.s32 4294967266, %v3775_v29 }
 0x4d7   : > { %v2970_v42 = vsel %vm2968_vm4, %v7326_v30, %v2969_v9  ;;  %v7897_v45 = vshrl.u32 %v3973_v59, 30  ;;  %vm2971_vm10 = vcmp.eq.s32.totalorder %v2966_v58, 2  ;;  %v2757_v16 = vadd.s32 3, %v2753_v43  ;;  %v7902_v62 = vpop.eup %4777  ;;  %v8436_v43 = vld [vmem:[#allocation30_spill] sm:$0xff] }
 0x4d8   : > { %vm8431_vm8 = vcmp.lt.s32.totalorder %v8430_v56, 0  ;;  %v3778_v18 = vshrl.u32 %v3760_v31, %v3776_v3  ;;  %v3781_v49 = vadd.s32 127, %v3780_v27  ;;  %v2973_v26 = vsel %vm2971_vm10, %v2972_v50, %v7415_v25  ;;  %v7907_v41 = vpop.eup %4779  ;;  %v8437_v3 = vld [vmem:[#allocation23_spill] sm:$0xff] }
 0x4d9   : > { %v3167_v24 = vsel %vm8431_vm8, %v3166_v28, %v8429_v33  ;;  %v3975_v30 = vshll.u32 %v7897_v45, 30  ;;  %v2974_v19 = vsel %vm2967_vm9, %v2970_v42, %v2973_v26  ;;  %v2758_v7 = vand.u32 3, %v2757_v16  ;;  %v8438_v16 = vld [vmem:[#allocation16_spill] sm:$0xff] }
 0x4da   : > { %v3169_v2 = vsel %vm7391_vm7, 0, %v3167_v24  ;;  %v3779_v47 = vor.u32 %v3778_v18, %v3777_v53  ;;  %v3782_v63 = vshll.u32 %v3781_v49, 23  ;;  %v2559_v36 = vsel %vm2548_vm1, nan, %v2558_v55  ;;  %v8439_v26 = vld [vmem:[#allocation12_spill] sm:$0xff] }
 0x4db   : > { %v3173_v44 = vadd.s32 3, %v3169_v2  ;;  %v2975_v31 = vsel %vm2964_vm13, nan, %v2974_v19  ;;  %vm3706_vm11 = vcmp.lt.s32.totalorder %v7634_v22, 0  ;;  %v7916_v25 = vsub.s32 %v3972_v37, %v3975_v30 }
 0x4dc   : > { %v4455_v9 = vpack.c.bf16 %v2975_v31, %v2559_v36  ;;  %vm2760_vm7 = vcmp.eq.s32.totalorder %v2758_v7, 0  ;;  %v3177_v50 = vxor.u32 2147483648, %v7561_v38  ;;  %v8433_v58 = vand.u32 2147483647, %v7634_v22  ;;  %v8441_v36 = vld [vmem:[#allocation29_spill] sm:$0xff] }
 0x4dd   : > { %v3783_v11 = vor.u32 4788187, %v3782_v63  ;;  %vm2759_vm14 = vcmp.lt.s32.totalorder %v2758_v7, 2  ;;  %v2762_v57 = vsel %vm2760_vm7, %v8428_v51, %v2761_v12  ;;  %vm2763_vm2 = vcmp.eq.s32.totalorder %v2758_v7, 2 }
 0x4de   : > { %vm7921_vm3 = vcmp.le.f32.partialorder %v8433_v58, 0.7853982  ;;  %v3978_v32 = vsub.s32 0, %v7916_v25  ;;  %4456 = vmatprep.subr.bf16.mxu0 %v4455_v9  ;;  %v2765_v55 = vsel %vm2763_vm2, %v2764_v17, %v8426_v21  ;;  %v3174_v37 = vand.u32 3, %v3173_v44  ;;  %v8440_v44 = vld [vmem:[#allocation22_spill] sm:$0xff] }
 0x4df   : > { %v3180_v33 = vxor.u32 2147483648, %v8436_v43  ;;  %v3784_v28 = vand.u32 2147483647, %v3783_v11  ;;  %v3786_v29 = vcvt.s32.f32 %v3779_v47  ;;  %v2766_v59 = vsel %vm2759_vm14, %v2762_v57, %v2765_v55  ;;  %v8443_v55 = vld [vmem:[#allocation32_spill] sm:$0xff] }
 0x4e0   : > { %v2446_v53 = vand.u32 3, %v8437_v3  ;;  %v4428_v27 = vmin.u32 %v3978_v32, %v7916_v25  ;;  %vm2756_vm0 = vweird.f32 %v8425_v13  ;;  %vm3172_vm6 = vweird.f32 %v8430_v56 }
 0x4e1   : > { %vm3176_vm1 = vcmp.eq.s32.totalorder %v3174_v37, 0  ;;  %v3787_v12 = vmul.f32 %v3786_v29, %v3784_v28  ;;  %v2767_v51 = vsel %vm2756_vm0, nan, %v2766_v59  ;;  %vm3179_vm13 = vcmp.eq.s32.totalorder %v3174_v37, 2  ;;  %v8445_v59 = vld [vmem:[#allocation17_spill] sm:$0xff] }
 0x4e2   : > { %v3178_v42 = vsel %vm3176_vm1, %v8436_v43, %v3177_v50  ;;  %v3980_v21 = vclz %v4428_v27  ;;  %vm3175_vm15 = vcmp.lt.s32.totalorder %v3174_v37, 2  ;;  %v3181_v17 = vsel %vm3179_vm13, %v3180_v33, %v7561_v38  ;;  %v8442_v50 = vld [vmem:[#allocation10_spill] sm:$0xff] }
 0x4e3   : > { %v2449_v24 = vxor.u32 2147483648, %v8438_v16  ;;  %v3788_v18 = vxor.u32 2147483648, %v3787_v12  ;;  %v3182_v49 = vsel %vm3175_vm15, %v3178_v42, %v3181_v17  ;;  %vm2448_vm9 = vcmp.eq.s32.totalorder %v2446_v53, 0  ;;  %v8444_v33 = vld [vmem:[#allocation26_spill] sm:$0xff] }
 0x4e4   : > { %v2452_v39 = vxor.u32 2147483648, %v8439_v26  ;;  %v4429_v13 = vadd.s32 4294967294, %v3980_v21  ;;  %v3183_v2 = vsel %vm3172_vm6, nan, %v3182_v49  ;;  %vm2451_vm4 = vcmp.eq.s32.totalorder %v2446_v53, 2 }
 0x4e5   : > { %v2450_v56 = vsel %vm2448_vm9, %v8439_v26, %v2449_v24  ;;  %v3789_v30 = vsel %vm3706_vm11, %v3788_v18, %v3787_v12  ;;  %v4463_v19 = vpack.c.bf16 %v3183_v2, %v2767_v51  ;;  %v2862_v38 = vand.u32 3, %v8440_v44 }
 0x4e6   : > { %v2453_v7 = vsel %vm2451_vm4, %v2452_v39, %v8438_v16  ;;  %v3792_v47 = vsel %vm7921_vm3, %v7634_v22, %v3789_v30  ;;  %v3968_v63 = vadd.s32 %v7858_v48, %v7852_v35  ;;  %vm4430_vm10 = vcmp.lt.s32.totalorder %v4429_v13, 0  ;;  %v8448_v16 = vld [vmem:[#allocation13_spill] sm:$0xff]  ;;  %v8452_v30 = vld [vmem:[#allocation14_spill] sm:$0xff] }
 0x4e7   : > { %v2865_v31 = vxor.u32 2147483648, %v8441_v36  ;;  %4781 = vcosq.f32 %v3792_v47  ;;  %v3983_v9 = vsel %vm4430_vm10, 0, %v4429_v13  ;;  %4464 = vmatprep.subr.bf16.mxu1 %v4463_v19  ;;  %vm2444_vm8 = vweird.f32 %v8442_v50 }
 0x4e8   : > { %vm2447_vm7 = vcmp.lt.s32.totalorder %v2446_v53, 2  ;;  %4783 = vsinq.f32 %v3792_v47  ;;  %v3984_v58 = vsub.s32 32, %v3983_v9  ;;  %v3988_v11 = vsub.s32 4294967266, %v3983_v9  ;;  %v8446_v53 = vld [vmem:[#allocation9_spill] sm:$0xff] }
 0x4e9   : > { %v2454_v57 = vsel %vm2447_vm7, %v2450_v56, %v2453_v7  ;;  %v3985_v32 = vshll.u32 %v7916_v25, %v3983_v9  ;;  %vm2864_vm14 = vcmp.eq.s32.totalorder %v2862_v38, 0  ;;  %vm2867_vm2 = vcmp.eq.s32.totalorder %v2862_v38, 2  ;;  %v8447_v25 = vld [vmem:[#allocation21_spill] sm:$0xff] }
 0x4ea   : > { %v2868_v37 = vxor.u32 2147483648, %v8443_v55  ;;  %v3986_v35 = vshrl.u32 %v3968_v63, %v3984_v58  ;;  %v3989_v48 = vadd.s32 127, %v3988_v11  ;;  %v2866_v43 = vsel %vm2864_vm14, %v8443_v55, %v2865_v31  ;;  %v8455_v11 = vld [vmem:[#allocation19_spill] sm:$0xff] }
 0x4eb   : > { %v2654_v28 = vand.u32 3, %v8444_v33  ;;  %vm2863_vm0 = vcmp.lt.s32.totalorder %v2862_v38, 2  ;;  %v2657_v3 = vxor.u32 2147483648, %v8445_v59  ;;  %v2660_v27 = vxor.u32 2147483648, %v8446_v53  ;;  %v8453_v38 = vld [vmem:[#allocation31_spill] sm:$0xff] }
 0x4ec   : > { %v2869_v29 = vsel %vm2867_vm2, %v2868_v37, %v8441_v36  ;;  %v3987_v12 = vor.u32 %v3986_v35, %v3985_v32  ;;  %v3990_v51 = vshll.u32 %v3989_v48, 23  ;;  %vm2860_vm6 = vweird.f32 %v8447_v25  ;;  %v8454_v36 = vld [vmem:[#allocation25_spill] sm:$0xff] }
 0x4ed   : > { %v2870_v42 = vsel %vm2863_vm0, %v2866_v43, %v2869_v29  ;;  %vm3914_vm1 = vcmp.lt.s32.totalorder %v7640_v6, 0  ;;  %v2455_v21 = vsel %vm2444_vm8, nan, %v2454_v57  ;;  %vm2656_vm13 = vcmp.eq.s32.totalorder %v2654_v28, 0 }
 0x4ee   : > { %v2871_v17 = vsel %vm2860_vm6, nan, %v2870_v42  ;;  %v3070_v24 = vand.u32 3, %v8448_v16  ;;  %v8449_v18 = vand.u32 2147483647, %v7640_v6  ;;  %v3991_v26 = vor.u32 4788187, %v3990_v51 }
 0x4ef   : > { %v4457_v39 = vpack.c.bf16 %v2871_v17, %v2455_v21  ;;  %v2658_v13 = vsel %vm2656_vm13, %v8446_v53, %v2657_v3  ;;  %vm2659_vm9 = vcmp.eq.s32.totalorder %v2654_v28, 2  ;;  %v3994_v2 = vcvt.s32.f32 %v3987_v12 }
 0x4f0   : > { %vm7963_vm15 = vcmp.le.f32.partialorder %v8449_v18, 0.7853982  ;;  %vm2655_vm4 = vcmp.lt.s32.totalorder %v2654_v28, 2  ;;  %v2661_v56 = vsel %vm2659_vm9, %v2660_v27, %v8445_v59  ;;  %v3073_v19 = vxor.u32 2147483648, %v8452_v30 }
 0x4f1   : > { %v3992_v7 = vand.u32 2147483647, %v3991_v26  ;;  %4458 = vmatpush1.bf16.msra.mxu0 %v4457_v39  ;;  %v2662_v44 = vsel %vm2655_vm4, %v2658_v13, %v2661_v56  ;;  %vm3072_vm10 = vcmp.eq.s32.totalorder %v3070_v24, 0  ;;  %v3076_v47 = vxor.u32 2147483648, %v8453_v38  ;;  %v4782_v63 = vpop.eup %4781 }
 0x4f2   : > { %vm2652_vm8 = vweird.f32 %v8454_v36  ;;  %v3074_v31 = vsel %vm3072_vm10, %v8453_v38, %v3073_v19  ;;  %vm3075_vm7 = vcmp.eq.s32.totalorder %v3070_v24, 2  ;;  %v3374_v9 = vsub.s32 4, %v7500_v1  ;;  %v4784_v50 = vpop.eup %4783 }
 0x4f3   : > { %v3995_v58 = vmul.f32 %v3994_v2, %v3992_v7  ;;  %vm3068_vm14 = vweird.f32 %v8455_v11  ;;  %vm3071_vm2 = vcmp.lt.s32.totalorder %v3070_v24, 2  ;;  %v3077_v57 = vsel %vm3075_vm7, %v3076_v47, %v8452_v30 }
 0x4f4   : > { %v2663_v32 = vsel %vm2652_vm8, nan, %v2662_v44  ;;  %v3078_v55 = vsel %vm3071_vm2, %v3074_v31, %v3077_v57  ;;  %vm8456_vm0 = vcmp.lt.s32.totalorder %v7282_v14, 0  ;;  %v3790_v35 = vsub.s32 4, %v7837_v61  ;;  %v8458_v44 = vld [vmem:[#allocation33_spill] sm:$0xff]  ;;  %v8459_v31 = vld [vmem:[#allocation15_spill] sm:$0xff]  ;;  %v8461_v57 = vld [vmem:[#allocation36_spill] sm:$0xff] }
 0x4f5   : > { %v3375_v37 = vsel %vm8456_vm0, %v3374_v9, %v7500_v1  ;;  %v3996_v48 = vxor.u32 2147483648, %v3995_v58  ;;  %v3079_v43 = vsel %vm3068_vm14, nan, %v3078_v55  ;;  %v3385_v28 = vxor.u32 2147483648, %v7755_v5  ;;  %v8462_v55 = vld [vmem:[#allocation40_spill] sm:$0xff] }
 0x4f6   : > { %v3377_v33 = vsel %vm7596_vm12, 0, %v3375_v37  ;;  %v4465_v29 = vpack.c.bf16 %v3079_v43, %v2663_v32  ;;  %vm3380_vm6 = vweird.f32 %v7282_v14  ;;  %v3388_v3 = vxor.u32 2147483648, %v7733_v10 }
 0x4f7   : > { %v3381_v59 = vadd.s32 3, %v3377_v33  ;;  %v3791_v53 = vsel %vm3706_vm11, %v3790_v35, %v7837_v61  ;;  %v3997_v1 = vsel %vm3914_vm1, %v3996_v48, %v3995_v58  ;;  %vm3796_vm12 = vweird.f32 %v7634_v22  ;;  %v8460_v58 = vld [vmem:[#allocation27_spill] sm:$0xff] }
 0x4f8   : > { %v3793_v27 = vsel %vm7921_vm3, 0, %v3791_v53  ;;  %v3582_v40 = vsub.s32 4, %v7567_v34  ;;  %v4000_v12 = vsel %vm7963_vm15, %v7640_v6, %v3997_v1  ;;  %4466 = vmatpush1.bf16.msra.mxu1 %v4465_v29  ;;  %v3801_v42 = vxor.u32 2147483648, %v4784_v50 }
 0x4f9   : > { %v3382_v51 = vand.u32 3, %v3381_v59  ;;  %v3797_v25 = vadd.s32 3, %v3793_v27  ;;  %4785 = vcosq.f32 %v4000_v12  ;;  %v3804_v61 = vxor.u32 2147483648, %v4782_v63  ;;  %v8463_v27 = vld [vmem:[#allocation37_spill] sm:$0xff] }
 0x4fa   : > { %vm8457_vm11 = vcmp.lt.s32.totalorder %v7370_v23, 0  ;;  %v3998_v15 = vsub.s32 4, %v7897_v45  ;;  %4787 = vsinq.f32 %v4000_v12  ;;  %v3593_v13 = vxor.u32 2147483648, %v7779_v4  ;;  %v8464_v12 = vld [vmem:[#allocation39_spill] sm:$0xff] }
 0x4fb   : > { %v3583_v21 = vsel %vm8457_vm11, %v3582_v40, %v7567_v34  ;;  %vm3383_vm3 = vcmp.lt.s32.totalorder %v3382_v51, 2  ;;  %vm3384_vm13 = vcmp.eq.s32.totalorder %v3382_v51, 0  ;;  %vm3387_vm9 = vcmp.eq.s32.totalorder %v3382_v51, 2 }
 0x4fc   : > { %v3386_v17 = vsel %vm3384_vm13, %v7733_v10, %v3385_v28  ;;  %v3389_v16 = vsel %vm3387_vm9, %v3388_v3, %v7755_v5  ;;  %v3798_v24 = vand.u32 3, %v3797_v25  ;;  %v3585_v18 = vsel %vm7685_vm5, 0, %v3583_v21 }
 0x4fd   : > { %v3390_v26 = vsel %vm3383_vm3, %v3386_v17, %v3389_v16  ;;  %v3589_v39 = vadd.s32 3, %v3585_v18  ;;  %v3999_v34 = vsel %vm3914_vm1, %v3998_v15, %v7897_v45  ;;  %v3596_v2 = vxor.u32 2147483648, %v7774_v8 }
 0x4fe   : > { %vm3799_vm4 = vcmp.lt.s32.totalorder %v3798_v24, 2  ;;  %vm3800_vm10 = vcmp.eq.s32.totalorder %v3798_v24, 0  ;;  %vm3803_vm8 = vcmp.eq.s32.totalorder %v3798_v24, 2  ;;  %v4001_v52 = vsel %vm7963_vm15, 0, %v3999_v34  ;;  %v8466_v34 = vld [vmem:[#allocation20_spill] sm:$0xff] }
 0x4ff   : > { %v3802_v10 = vsel %vm3800_vm10, %v4782_v63, %v3801_v42  ;;  %v3805_v56 = vsel %vm3803_vm8, %v3804_v61, %v4784_v50  ;;  %v3590_v5 = vand.u32 3, %v3589_v39  ;;  %v3391_v30 = vsel %vm3380_vm6, nan, %v3390_v26  ;;  %v8465_v61 = vld [vmem:[#allocation38_spill] sm:$0xff]  ;;  %v280_v26 = vld [vmem:[%s8105_s4] sm:$0x7] }
 0x500   : > { %v3806_v19 = vsel %vm3799_vm4, %v3802_v10, %v3805_v56  ;;  %v4005_v7 = vadd.s32 3, %v4001_v52  ;;  %v3278_v38 = vand.u32 3, %v8458_v44  ;;  %vm3588_vm15 = vweird.f32 %v7370_v23 }
 0x501   : > { %v3807_v45 = vsel %vm3796_vm12, nan, %v3806_v19  ;;  %vm3591_vm5 = vcmp.lt.s32.totalorder %v3590_v5, 2  ;;  %vm3592_vm1 = vcmp.eq.s32.totalorder %v3590_v5, 0  ;;  %vm3595_vm7 = vcmp.eq.s32.totalorder %v3590_v5, 2  ;;  %v4019_v5 = vpop.permute.xlu0 %4018 }
 0x502   : > { %v4459_v47 = vpack.c.bf16 %v3807_v45, %v3391_v30  ;;  %v3594_v63 = vsel %vm3592_vm1, %v7774_v8, %v3593_v13  ;;  %v3597_v36 = vsel %vm3595_vm7, %v3596_v2, %v7779_v4  ;;  %v4006_v49 = vand.u32 3, %v4005_v7 }
 0x503   : > { %v3598_v14 = vsel %vm3591_vm5, %v3594_v63, %v3597_v36  ;;  %vm4004_vm14 = vweird.f32 %v7640_v6  ;;  %v3281_v9 = vxor.u32 2147483648, %v8459_v31  ;;  %v4786_v50 = vpop.eup %4785  ;;  %vm3276_vm2 = vweird.f32 %v8460_v58 }
 0x504   : > { %4460 = vmatprep.subr.bf16.mxu0 %v4459_v47  ;;  %v3599_v22 = vsel %vm3588_vm15, nan, %v3598_v14  ;;  %vm3279_vm0 = vcmp.lt.s32.totalorder %v3278_v38, 2  ;;  %vm3280_vm6 = vcmp.eq.s32.totalorder %v3278_v38, 0  ;;  %v4788_v11 = vpop.eup %4787  ;;  %vm4011_vm12 = vcmp.eq.s32.totalorder %v4006_v49, 2 }
 0x505   : > { %v4012_v8 = vxor.u32 2147483648, %v4786_v50  ;;  %v3282_v4 = vsel %vm3280_vm6, %v8461_v57, %v3281_v9  ;;  %v3284_v32 = vxor.u32 2147483648, %v8461_v57  ;;  %v4009_v23 = vxor.u32 2147483648, %v4788_v11 }
 0x506   : > { %vm3283_vm11 = vcmp.eq.s32.totalorder %v3278_v38, 2  ;;  %v3694_v37 = vand.u32 3, %v8462_v55  ;;  %v3697_v35 = vxor.u32 2147483648, %v7889_v46  ;;  %vm4008_vm3 = vcmp.eq.s32.totalorder %v4006_v49, 0 }
 0x507   : > { %v4013_v48 = vsel %vm4011_vm12, %v4012_v8, %v4788_v11  ;;  %v3285_v43 = vsel %vm3283_vm11, %v3284_v32, %v8459_v31  ;;  %v3700_v33 = vxor.u32 2147483648, %v7835_v20  ;;  %vm4007_vm13 = vcmp.lt.s32.totalorder %v4006_v49, 2 }
 0x508   : > { %v4010_v28 = vsel %vm4008_vm3, %v4786_v50, %v4009_v23  ;;  %v3286_v29 = vsel %vm3279_vm0, %v3282_v4, %v3285_v43  ;;  %vm3696_vm9 = vcmp.eq.s32.totalorder %v3694_v37, 0  ;;  %vm3695_vm4 = vcmp.lt.s32.totalorder %v3694_v37, 2 }
 0x509   : > { %v4014_v59 = vsel %vm4007_vm13, %v4010_v28, %v4013_v48  ;;  %v3698_v3 = vsel %vm3696_vm9, %v7835_v20, %v3697_v35  ;;  %vm3699_vm10 = vcmp.eq.s32.totalorder %v3694_v37, 2  ;;  %v3486_v40 = vand.u32 3, %v8463_v27 }
 0x50a   : > { %v4015_v53 = vsel %vm4004_vm14, nan, %v4014_v59  ;;  %v3701_v1 = vsel %vm3699_vm10, %v3700_v33, %v7889_v46  ;;  %v3489_v51 = vxor.u32 2147483648, %v8464_v12  ;;  %vm3692_vm8 = vweird.f32 %v7374_v54 }
 0x50b   : > { %v4467_v25 = vpack.c.bf16 %v4015_v53, %v3599_v22  ;;  %v3702_v42 = vsel %vm3695_vm4, %v3698_v3, %v3701_v1  ;;  %v3492_v21 = vxor.u32 2147483648, %v8465_v61  ;;  %v3287_v15 = vsel %vm3276_vm2, nan, %v3286_v29 }
 0x50c   : > { %v3703_v20 = vsel %vm3692_vm8, nan, %v3702_v42  ;;  %vm3488_vm5 = vcmp.eq.s32.totalorder %v3486_v40, 0  ;;  %vm3491_vm1 = vcmp.eq.s32.totalorder %v3486_v40, 2  ;;  %v3902_v16 = vand.u32 3, %v7802_v0 }
 0x50d   : > { %4468 = vmatprep.subr.bf16.mxu1 %v4467_v25  ;;  %v4461_v6 = vpack.c.bf16 %v3703_v20, %v3287_v15  ;;  %v3490_v46 = vsel %vm3488_vm5, %v8465_v61, %v3489_v51  ;;  %v3493_v17 = vsel %vm3491_vm1, %v3492_v21, %v8464_v12  ;;  %vm3487_vm7 = vcmp.lt.s32.totalorder %v3486_v40, 2 }
 0x50e   : > { %v3905_v54 = vxor.u32 2147483648, %v7907_v41  ;;  %v3908_v24 = vxor.u32 2147483648, %v7902_v62  ;;  %v3494_v18 = vsel %vm3487_vm7, %v3490_v46, %v3493_v17  ;;  %vm3904_vm15 = vcmp.eq.s32.totalorder %v3902_v16, 0 }
 0x50f   : > { %4462 = vmatpush1.bf16.msra.mxu0 %v4461_v6  ;;  %vm3907_vm14 = vcmp.eq.s32.totalorder %v3902_v16, 2  ;;  %vm3903_vm2 = vcmp.lt.s32.totalorder %v3902_v16, 2  ;;  %vm3484_vm0 = vweird.f32 %v8466_v34  ;;  %vm3900_vm6 = vweird.f32 %v7382_v60 }
 0x510   : > { %v3906_v39 = vsel %vm3904_vm15, %v7902_v62, %v3905_v54  ;;  %v3909_v13 = vsel %vm3907_vm14, %v3908_v24, %v7907_v41  ;;  %v3495_v2 = vsel %vm3484_vm0, nan, %v3494_v18  ;;  %vm8467_vm12 = vcmask 261120  }
 0x511   : > { %v3910_v0 = vsel %vm3903_vm2, %v3906_v39, %v3909_v13  ;;  %vm8468_vm11 = vmmov %vm8467_vm12 }
 0x512   : > { %v3911_v10 = vsel %vm3900_vm6, nan, %v3910_v0  ;;  %4431 = vmatmul.mubr.msk.f32.vlgmr.msra.gmra.mrb[16].mxu0 %vm8467_vm12, %v280_v26 }
 0x513   : > { %v4469_v56 = vpack.c.bf16 %v3911_v10, %v3495_v2 }
 0x515   : > { %4470 = vmatpush1.bf16.msra.mxu1 %v4469_v56 }
 0x518   : > { %4432 = vmatmul.mubr.msk.f32.vlgmr.msra.gmra.mrb[16].mxu1 %vm8468_vm11, %v280_v26 }
 0x5e5   : > { %v4090_v52 = vpop.f32.mrb[16].mxu0 }
 0x5e6   : > { %v4091_v30 = vadd.f32 %v4090_v52, %v4019_v5  ;;  %v4092_v62 = vpop.f32.mrb[17].mxu0 }
 0x5e7   : > { %v4093_v19 = vadd.f32 %v4092_v62, %v4019_v5 }
 0x5e8   : > { %v4166_v41 = vmul.f32 0.5, %v4091_v30 }
 0x5e9   : > { %v4167_v7 = vmul.f32 0.5, %v4093_v19 }
 0x5ea   : > { %4789 = vtanh.f32 %v4166_v41 }
 0x5eb   : > { %v4161_v44 = vpop.f32.mrb[16].mxu1  ;;  %4791 = vtanh.f32 %v4167_v7 }
 0x5ec   : > { %v4162_v60 = vadd.f32 %v4161_v44, %v4019_v5  ;;  %v4163_v38 = vpop.f32.mrb[17].mxu1 }
 0x5ed   : > { %v4164_v45 = vadd.f32 %v4163_v38, %v4019_v5 }
 0x5ee   : > { %v4168_v47 = vmul.f32 0.5, %v4162_v60 }
 0x5ef   : > { %v4169_v63 = vmul.f32 0.5, %v4164_v45 }
 0x5f0   : > { %4793 = vtanh.f32 %v4168_v47 }
 0x5f1   : > { %4795 = vtanh.f32 %v4169_v63 }
 0x5f4   : > { %v4790_v36 = vpop.eup %4789 }
 0x5f5   : > { %v4792_v49 = vpop.eup %4791  ;;  %v4174_v14 = vadd.f32 1.0, %v4790_v36 }
 0x5f6   : > { %v4175_v31 = vadd.f32 1.0, %v4792_v49 }
 0x5f7   : > { %v4178_v9 = vmul.f32 0.5, %v4174_v14 }
 0x5f8   : > { %v4179_v50 = vmul.f32 0.5, %v4175_v31 }
 0x5fa   : > { %v4794_v22 = vpop.eup %4793  ;;  %v4186_v58 = vcombine.low %v4178_v9, %v4179_v50 }
 0x5fb   : > { %v4796_v11 = vpop.eup %4795  ;;  %v4176_v8 = vadd.f32 1.0, %v4794_v22 }
 0x5fc   : > { %v4177_v57 = vadd.f32 1.0, %v4796_v11  ;;  %4190 = vst [vmem:[%s260_s28] sm:$0x77] %v4186_v58 }
 0x5fd   : > { %v4180_v4 = vmul.f32 0.5, %v4176_v8 }
 0x5fe   : > { %v4181_v32 = vmul.f32 0.5, %v4177_v57 }
 0x600   : > { %v4187_v23 = vcombine.low %v4180_v4, %v4181_v32 }
 0x602   : > { %4191 = vst [vmem:[%s260_s28 + $0x8] sm:$0x77] %v4187_v23 }
 0x603   : > { %4838 = shalt.err (!%p4835_p7)
}
 0x604   : > { %s4839_s17 = scalar_lea.hbm %s8059_s11, 256  ;;  %s4843_s20 = scalar_lea.hbm %s8107_s6, 512 }
 0x605   : > { %p4840_p8 = scmp.ne.s32.totalorder %s8059_s11, %s4839_s17  ;;  %p4844_p1 = scmp.lt.u32.totalorder %s8059_s11, %s8107_s6 }
 0x606   : > { %p4845_p0 = scmp.lt.u32.totalorder %s4843_s20, %s4839_s17  ;;  %p4847_p6 = scmp.lt.u32.totalorder %s4839_s17, %s8059_s11 }
 0x607   : > { %p4841_p11 = pnand %p4840_p8, %p8469_p9 }
 0x608   : > { %p4846_p5 = por %p4845_p0, %p4844_p1 }
 0x609   : > { %p4842_p13 = pneg %p4841_p11 }
 0x60a   : > { %p4848_p10 = por %p4847_p6, %p4846_p5 }
 0x60c   : > { %p4849_p12 = pnand %p4848_p10, %p4842_p13 }
 0x60e   : > { %4852 = shalt.err (!%p4849_p12)
}
 0x60f   : > { %4603 = dma.vmem_to_hbm [thread:$0]  (%p8469_p9), %s8061_s10, 256, %s8059_s11, %s4193_s14  }
 0x610 PF: > { %p4615_p2 = scmp.ge.s32.totalorder %s4891_s24, 2  ;;  %s4219_s29 = sand.u32 1, %s4879_s21  }
 0x611   : > { %p8470_p3 = scmp.ne.s32.totalorder %s8216_s8, 0  ;;  %s4220_s13 = scalar_lea.sflag [#allocation4], %s4219_s29 }
 0x613   : > { %p4610_p4 = pnand %p4615_p2, %p8470_p3 }
 0x615   : > { %4874 = dma.done.wait (!%p4610_p4), %s4220_s13, 256  }
 0x616   : > { %4876 = vsyncadd (!%p4610_p4), %s4220_s13, 4294967040  ;;  %p17_p7 = scmp.ge.s32.totalorder %s4965_s27, 4   ;;  %s8471_s21 = smov %s4883_s22 }
 0x617   : > { %s8472_s22 = smov %s4887_s23  ;;  %s8473_s23 = smov %s4976_s30 }
 0x618   : > { %s8474_s24 = smov %s4965_s27  ;;  %19 = sbr.rel (!%p17_p7) target bundleno = 4 (0x4), region = 84 }
 0x61f   :  { %4225 = vsyncpa [#allocation3], 1 }
 0x620   :  { %4227 = vsyncpa [#allocation3 + $0x1], 1 }
 0x621   :  { %4228 = vsyncpa [#allocation4], 1 }
 0x622   :  { %4230 = vsyncpa [#allocation4 + $0x1], 1 }

</bundles_post_ra>
